<compile_context>
chip_gen: v7x
topology: tpu7x:2x2x1
jax: 0.10.0
libtpu: 0.0.40
codegen_flags: <defaults>
</compile_context>

<pallas_src>
import numpy as np
import jax
import jax.numpy as jnp
from jax.experimental import pallas as pl
from jax.experimental.pallas import tpu as pltpu

MAX_LEN = 30       # maxL in the PyTorch forward
INPUT_DIM = 2      # n_letters (alphabet ['0', '1'])
HIDDEN_DIM = 32
OUTPUT_DIM = 2
NUM_LAYERS = 2


def rnn_fc_logsoftmax_kernel(x_ref, wih_ref, whh_ref, b_ref, wfc_ref, bfc_ref,
                             out_ref, seq_scratch, pre_scratch):
    """Per grid step (Bc = batch chunk):
       x_ref:   (T, Bc, H) f32   time-major padded one-hot features
       wih_ref: (L, H, H)  bf16  W_ih^T per layer (layer-0 rows zero-padded)
       whh_ref: (L, H, H)  bf16  W_hh^T per layer
       b_ref:   (L, 1, H)  f32   b_ih + b_hh per layer
       wfc_ref: (H, O)     f32   W_fc^T
       bfc_ref: (1, O)     f32
       out_ref: (Bc, O)    f32   log-probabilities
       seq_scratch / pre_scratch: (T, Bc, H) f32 VMEM scratch."""
    T, Bc, H = x_ref.shape
    L = wih_ref.shape[0]

    h = jnp.zeros((Bc, H), jnp.float32)
    for l in range(L):                        # static layer loop (unrolled)
        wih = wih_ref[l]                      # (H, H) bf16
        whh = whh_ref[l]                      # (H, H) bf16
        b_l = b_ref[l]                        # (1, H) f32

        # Hoisted, time-invariant input projection: one big MXU matmul covering
        # all T timesteps (plus the folded bias), off the serial h-chain.
        src = x_ref if l == 0 else seq_scratch
        seq2d = src[...].reshape(T * Bc, H).astype(jnp.bfloat16)
        pre2d = jnp.dot(seq2d, wih, preferred_element_type=jnp.float32) + b_l
        pre_scratch[...] = pre2d.reshape(T, Bc, H)

        write_back = l < L - 1                # only h_{T-1} of the top layer is used
        h = jnp.zeros((Bc, H), jnp.float32)
        # Fully unrolled static time loop: h lives in vregs, the only work on the
        # dependency chain is the (Bc,H)@(H,H) bf16 recurrent matmul + add + relu.
        for t in range(T):
            h = jnp.maximum(
                pre_scratch[t]
                + jnp.dot(h.astype(jnp.bfloat16), whh,
                          preferred_element_type=jnp.float32),
                0.0)
            if write_back:
                seq_scratch[t] = h            # feeds the next layer

    # fc(out[:, -1, :]) followed by LogSoftmax(dim=1)
    logits = jnp.dot(h, wfc_ref[...],
                     preferred_element_type=jnp.float32) + bfc_ref[...]
    m = jnp.max(logits, axis=1, keepdims=True)
    shifted = logits - m
    lse = jnp.log(jnp.sum(jnp.exp(shifted), axis=1, keepdims=True))
    out_ref[...] = shifted - lse


def rnn_model_forward(x_tbh, wih_t, whh_t, b_sum, wfc_t, bfc, *, block_b=None):
    """x_tbh: (T, B, H) f32 time-major padded one-hot. Returns (B, O) log-probs."""
    T, B, H = x_tbh.shape
    L = wih_t.shape[0]
    O = wfc_t.shape[1]
    if block_b is None:
        block_b = B
    assert B % block_b == 0 and (block_b == B or block_b % 8 == 0)
    grid = (B // block_b,)

    return pl.pallas_call(
        rnn_fc_logsoftmax_kernel,
        out_shape=jax.ShapeDtypeStruct((B, O), jnp.float32),
        grid_spec=pltpu.PrefetchScalarGridSpec(
            num_scalar_prefetch=0,
            grid=grid,
            in_specs=[
                pl.BlockSpec((T, block_b, H), lambda i: (0, i, 0)),   # x (batch-chunked)
                pl.BlockSpec((L, H, H), lambda i: (0, 0, 0)),         # W_ih^T (resident)
                pl.BlockSpec((L, H, H), lambda i: (0, 0, 0)),         # W_hh^T (resident)
                pl.BlockSpec((L, 1, H), lambda i: (0, 0, 0)),         # biases
                pl.BlockSpec((H, O), lambda i: (0, 0)),               # W_fc^T
                pl.BlockSpec((1, O), lambda i: (0, 0)),               # b_fc
            ],
            out_specs=pl.BlockSpec((block_b, O), lambda i: (i, 0)),
            scratch_shapes=[pltpu.VMEM((T, block_b, H), jnp.float32),   # layer activations
                            pltpu.VMEM((T, block_b, H), jnp.float32)],  # hoisted pre-activations
        ),
        compiler_params=pltpu.CompilerParams(
            dimension_semantics=("parallel",)),   # v7x: two TCs split the batch chunks
    )(x_tbh, wih_t, whh_t, b_sum, wfc_t, bfc)


# ----------------------- parameter init (deterministic) -----------------------
def init_params(key, input_dim, hidden_dim, output_dim, num_layers):
    bound = 1.0 / np.sqrt(hidden_dim)
    keys = jax.random.split(key, 4 * num_layers + 2)
    wih_t_list, whh_t_list, b_list = [], [], []
    k = 0
    for l in range(num_layers):
        in_dim = input_dim if l == 0 else hidden_dim
        w_ih = jax.random.uniform(keys[k], (hidden_dim, in_dim),
                                  minval=-bound, maxval=bound); k += 1
        w_hh = jax.random.uniform(keys[k], (hidden_dim, hidden_dim),
                                  minval=-bound, maxval=bound); k += 1
        b_ih = jax.random.uniform(keys[k], (hidden_dim,),
                                  minval=-bound, maxval=bound); k += 1
        b_hh = jax.random.uniform(keys[k], (hidden_dim,),
                                  minval=-bound, maxval=bound); k += 1
        w_ih_t = w_ih.T                                    # (in_dim, H)
        if in_dim < hidden_dim:                            # pad layer-0 rows to H
            w_ih_t = jnp.pad(w_ih_t, ((0, hidden_dim - in_dim), (0, 0)))
        wih_t_list.append(w_ih_t)
        whh_t_list.append(w_hh.T)
        b_list.append((b_ih + b_hh).reshape(1, hidden_dim))
    w_fc = jax.random.uniform(keys[k], (output_dim, hidden_dim),
                              minval=-bound, maxval=bound); k += 1
    b_fc = jax.random.uniform(keys[k], (output_dim,),
                              minval=-bound, maxval=bound)
    return (jnp.stack(wih_t_list).astype(jnp.bfloat16),      # (L, H, H) bf16
            jnp.stack(whh_t_list).astype(jnp.bfloat16),      # (L, H, H) bf16
            jnp.stack(b_list).astype(jnp.float32),           # (L, 1, H) f32
            w_fc.T.astype(jnp.float32),                      # (H, O)    f32
            b_fc.reshape(1, output_dim).astype(jnp.float32)) # (1, O)    f32


# ------------------- input construction (mirrors lineToTensor) ----------------
def line_to_padded_onehot(line, max_len, n_letters, hidden_dim):
    char_dict = {c: i for i, c in enumerate(['0', '1'])}    # tokenized_dict
    tokens = [char_dict[c] for c in line]                   # seq_to_tokens
    x = np.zeros((max_len, hidden_dim), dtype=np.float32)
    start = max_len - len(tokens)                           # left-padded, like lineToTensor
    for li, tok in enumerate(tokens):
        x[li + start, tok] = 1.0        # one-hot over n_letters, zero-padded to H
    return x


def build_batch(lines, max_len, n_letters, hidden_dim):
    xs = [line_to_padded_onehot(l, max_len, n_letters, hidden_dim) for l in lines]
    return jnp.asarray(np.stack(xs, axis=1))                # (T, B, H) time-major


# --------------------------- pure-JAX reference --------------------------------
# Mirrors the kernel's bf16-operand / f32-accumulate matmuls exactly, so the
# check verifies the Pallas implementation (bf16 weight storage is the only
# deliberate deviation from the f32 PyTorch module).
def reference_forward(x_tbh, wih_t, whh_t, b_sum, wfc_t, bfc):
    T, B, H = x_tbh.shape
    L = wih_t.shape[0]
    seq = x_tbh
    h = jnp.zeros((B, H), jnp.float32)
    for l in range(L):
        pre = (jnp.dot(seq.reshape(T * B, H).astype(jnp.bfloat16), wih_t[l],
                       preferred_element_type=jnp.float32)
               + b_sum[l]).reshape(T, B, H)
        h = jnp.zeros((B, H), jnp.float32)
        outs = []
        for t in range(T):
            h = jnp.maximum(
                pre[t] + jnp.dot(h.astype(jnp.bfloat16), whh_t[l],
                                 preferred_element_type=jnp.float32), 0.0)
            outs.append(h)
        seq = jnp.stack(outs, axis=0)
    logits = jnp.dot(h, wfc_t, preferred_element_type=jnp.float32) + bfc
    return jax.nn.log_softmax(logits, axis=1)


if __name__ == "__main__":
    root = jax.random.PRNGKey(0)
    pkey, dkey = jax.random.split(root)
    params = init_params(pkey, INPUT_DIM, HIDDEN_DIM, OUTPUT_DIM, NUM_LAYERS)

    # deterministic batch of binary "sentences" over the alphabet ['0', '1']
    B = 16
    lk, bk = jax.random.split(dkey)
    lens = np.asarray(jax.random.randint(lk, (B,), 1, MAX_LEN + 1))
    bits = np.asarray(jax.random.randint(bk, (B, MAX_LEN), 0, 2))
    lines = ["".join(str(int(b)) for b in bits[i, :int(lens[i])]) for i in range(B)]

    x_tbh = build_batch(lines, MAX_LEN, INPUT_DIM, HIDDEN_DIM)   # (30, 16, 32)

    out = rnn_model_forward(x_tbh, *params, block_b=8)           # grid=(2,), parallel
    out = jax.block_until_ready(out)

    ref = reference_forward(x_tbh, *params)
    np.testing.assert_allclose(np.asarray(out), np.asarray(ref),
                               rtol=1e-3, atol=1e-3)
    assert out.shape == (B, OUTPUT_DIM)
    print("KERNEL_OK")
</pallas_src>

<mosaic_0001>
module attributes {stable_mosaic.version = 11 : i64} {
  func.func @rnn_fc_logsoftmax_kernel(%arg0: i32, %arg1: memref<30x8x32xf32, #tpu.memory_space<vmem>>, %arg2: memref<2x32x32xbf16, #tpu.memory_space<vmem>>, %arg3: memref<2x32x32xbf16, #tpu.memory_space<vmem>>, %arg4: memref<2x1x32xf32, #tpu.memory_space<vmem>>, %arg5: memref<32x2xf32, #tpu.memory_space<vmem>>, %arg6: memref<1x2xf32, #tpu.memory_space<vmem>>, %arg7: memref<8x2xf32, #tpu.memory_space<vmem>>, %arg8: memref<30x8x32xf32, #tpu.memory_space<vmem>>, %arg9: memref<30x8x32xf32, #tpu.memory_space<vmem>>) attributes {dimension_semantics = [#tpu.dimension_semantics<parallel>], iteration_bounds = array<i64: 2>, scalar_prefetch = 0 : i64, scratch_operands = 2 : i64, tpu.core_type = #tpu.core_type<tc>, window_params = [{transform_indices = @transform_0, window_bounds = array<i64: 30, 8, 32>}, {pipeline_mode = #tpu.pipeline_mode<synchronous>, transform_indices = @transform_1, window_bounds = array<i64: 2, 32, 32>}, {pipeline_mode = #tpu.pipeline_mode<synchronous>, transform_indices = @transform_2, window_bounds = array<i64: 2, 32, 32>}, {pipeline_mode = #tpu.pipeline_mode<synchronous>, transform_indices = @transform_3, window_bounds = array<i64: 2, 1, 32>}, {pipeline_mode = #tpu.pipeline_mode<synchronous>, transform_indices = @transform_4, window_bounds = array<i64: 32, 2>}, {pipeline_mode = #tpu.pipeline_mode<synchronous>, transform_indices = @transform_5, window_bounds = array<i64: 1, 2>}, {transform_indices = @transform_6, window_bounds = array<i64: 8, 2>}]} {
    %c0 = arith.constant 0 : index
    %c0_0 = arith.constant 0 : index
    %c0_1 = arith.constant 0 : index
    %0 = vector.load %arg2[%c0, %c0_0, %c0_1] : memref<2x32x32xbf16, #tpu.memory_space<vmem>>, vector<1x32x32xbf16>
    %1 = vector.shape_cast %0 : vector<1x32x32xbf16> to vector<32x32xbf16>
    %c0_2 = arith.constant 0 : index
    %c0_3 = arith.constant 0 : index
    %c0_4 = arith.constant 0 : index
    %2 = vector.load %arg3[%c0_2, %c0_3, %c0_4] : memref<2x32x32xbf16, #tpu.memory_space<vmem>>, vector<1x32x32xbf16>
    %3 = vector.shape_cast %2 : vector<1x32x32xbf16> to vector<32x32xbf16>
    %c0_5 = arith.constant 0 : index
    %c0_6 = arith.constant 0 : index
    %c0_7 = arith.constant 0 : index
    %4 = vector.load %arg4[%c0_5, %c0_6, %c0_7] : memref<2x1x32xf32, #tpu.memory_space<vmem>>, vector<1x1x32xf32>
    %5 = vector.shape_cast %4 : vector<1x1x32xf32> to vector<1x32xf32>
    %c0_8 = arith.constant 0 : index
    %c0_9 = arith.constant 0 : index
    %c0_10 = arith.constant 0 : index
    %6 = vector.load %arg1[%c0_8, %c0_9, %c0_10] : memref<30x8x32xf32, #tpu.memory_space<vmem>>, vector<30x8x32xf32>
    %7 = vector.shape_cast %6 : vector<30x8x32xf32> to vector<240x32xf32>
    %8 = arith.truncf %7 : vector<240x32xf32> to vector<240x32xbf16>
    %cst = arith.constant dense<0.000000e+00> : vector<240x32xf32>
    %9 = tpu.matmul %8, %1, %cst {dimension_numbers = #tpu.dot_dimension_numbers<[1], [0], [0], [1], [0, 0, 1, 1], [], []>} : vector<240x32xbf16>, vector<32x32xbf16>, vector<240x32xf32> -> vector<240x32xf32>
    %10 = vector.broadcast %5 : vector<1x32xf32> to vector<240x32xf32>
    %11 = arith.addf %9, %10 : vector<240x32xf32>
    %12 = vector.shape_cast %11 : vector<240x32xf32> to vector<30x8x32xf32>
    %c0_11 = arith.constant 0 : index
    %c0_12 = arith.constant 0 : index
    %c0_13 = arith.constant 0 : index
    %13 = vector.load %arg9[%c0_11, %c0_12, %c0_13] : memref<30x8x32xf32, #tpu.memory_space<vmem>>, vector<30x8x32xf32>
    tpu.vector_store %arg9[%c0_11, %c0_12, %c0_13], %12 {strides = array<i32>} : memref<30x8x32xf32, #tpu.memory_space<vmem>>, vector<30x8x32xf32>,
    %cst_14 = arith.constant 0.000000e+00 : f32
    %14 = vector.broadcast %cst_14 : f32 to vector<8x32xf32>
    %c0_15 = arith.constant 0 : index
    %c0_16 = arith.constant 0 : index
    %c0_17 = arith.constant 0 : index
    %15 = vector.load %arg9[%c0_15, %c0_16, %c0_17] : memref<30x8x32xf32, #tpu.memory_space<vmem>>, vector<1x8x32xf32>
    %16 = vector.shape_cast %15 : vector<1x8x32xf32> to vector<8x32xf32>
    %17 = arith.truncf %14 : vector<8x32xf32> to vector<8x32xbf16>
    %cst_18 = arith.constant dense<0.000000e+00> : vector<8x32xf32>
    %18 = tpu.matmul %17, %3, %cst_18 {dimension_numbers = #tpu.dot_dimension_numbers<[1], [0], [0], [1], [0, 0, 1, 1], [], []>} : vector<8x32xbf16>, vector<32x32xbf16>, vector<8x32xf32> -> vector<8x32xf32>
    %19 = arith.addf %16, %18 : vector<8x32xf32>
    %cst_19 = arith.constant 0.000000e+00 : f32
    %20 = vector.broadcast %cst_19 : f32 to vector<8x32xf32>
    %21 = arith.maximumf %19, %20 : vector<8x32xf32>
    %c0_20 = arith.constant 0 : index
    %c0_21 = arith.constant 0 : index
    %c0_22 = arith.constant 0 : index
    %22 = vector.load %arg8[%c0_20, %c0_21, %c0_22] : memref<30x8x32xf32, #tpu.memory_space<vmem>>, vector<1x8x32xf32>
    %23 = vector.shape_cast %22 : vector<1x8x32xf32> to vector<8x32xf32>
    %24 = vector.shape_cast %21 : vector<8x32xf32> to vector<1x8x32xf32>
    tpu.vector_store %arg8[%c0_20, %c0_21, %c0_22], %24 {strides = array<i32>} : memref<30x8x32xf32, #tpu.memory_space<vmem>>, vector<1x8x32xf32>,
    %c1 = arith.constant 1 : index
    %c0_23 = arith.constant 0 : index
    %c0_24 = arith.constant 0 : index
    %25 = vector.load %arg9[%c1, %c0_23, %c0_24] : memref<30x8x32xf32, #tpu.memory_space<vmem>>, vector<1x8x32xf32>
    %26 = vector.shape_cast %25 : vector<1x8x32xf32> to vector<8x32xf32>
    %27 = arith.truncf %21 : vector<8x32xf32> to vector<8x32xbf16>
    %cst_25 = arith.constant dense<0.000000e+00> : vector<8x32xf32>
    %28 = tpu.matmul %27, %3, %cst_25 {dimension_numbers = #tpu.dot_dimension_numbers<[1], [0], [0], [1], [0, 0, 1, 1], [], []>} : vector<8x32xbf16>, vector<32x32xbf16>, vector<8x32xf32> -> vector<8x32xf32>
    %29 = arith.addf %26, %28 : vector<8x32xf32>
    %cst_26 = arith.constant 0.000000e+00 : f32
    %30 = vector.broadcast %cst_26 : f32 to vector<8x32xf32>
    %31 = arith.maximumf %29, %30 : vector<8x32xf32>
    %c1_27 = arith.constant 1 : index
    %c0_28 = arith.constant 0 : index
    %c0_29 = arith.constant 0 : index
    %32 = vector.load %arg8[%c1_27, %c0_28, %c0_29] : memref<30x8x32xf32, #tpu.memory_space<vmem>>, vector<1x8x32xf32>
    %33 = vector.shape_cast %32 : vector<1x8x32xf32> to vector<8x32xf32>
    %34 = vector.shape_cast %31 : vector<8x32xf32> to vector<1x8x32xf32>
    tpu.vector_store %arg8[%c1_27, %c0_28, %c0_29], %34 {strides = array<i32>} : memref<30x8x32xf32, #tpu.memory_space<vmem>>, vector<1x8x32xf32>,
    %c2 = arith.constant 2 : index
    %c0_30 = arith.constant 0 : index
    %c0_31 = arith.constant 0 : index
    %35 = vector.load %arg9[%c2, %c0_30, %c0_31] : memref<30x8x32xf32, #tpu.memory_space<vmem>>, vector<1x8x32xf32>
    %36 = vector.shape_cast %35 : vector<1x8x32xf32> to vector<8x32xf32>
    %37 = arith.truncf %31 : vector<8x32xf32> to vector<8x32xbf16>
    %cst_32 = arith.constant dense<0.000000e+00> : vector<8x32xf32>
    %38 = tpu.matmul %37, %3, %cst_32 {dimension_numbers = #tpu.dot_dimension_numbers<[1], [0], [0], [1], [0, 0, 1, 1], [], []>} : vector<8x32xbf16>, vector<32x32xbf16>, vector<8x32xf32> -> vector<8x32xf32>
    %39 = arith.addf %36, %38 : vector<8x32xf32>
    %cst_33 = arith.constant 0.000000e+00 : f32
    %40 = vector.broadcast %cst_33 : f32 to vector<8x32xf32>
    %41 = arith.maximumf %39, %40 : vector<8x32xf32>
    %c2_34 = arith.constant 2 : index
    %c0_35 = arith.constant 0 : index
    %c0_36 = arith.constant 0 : index
    %42 = vector.load %arg8[%c2_34, %c0_35, %c0_36] : memref<30x8x32xf32, #tpu.memory_space<vmem>>, vector<1x8x32xf32>
    %43 = vector.shape_cast %42 : vector<1x8x32xf32> to vector<8x32xf32>
    %44 = vector.shape_cast %41 : vector<8x32xf32> to vector<1x8x32xf32>
    tpu.vector_store %arg8[%c2_34, %c0_35, %c0_36], %44 {strides = array<i32>} : memref<30x8x32xf32, #tpu.memory_space<vmem>>, vector<1x8x32xf32>,
    %c3 = arith.constant 3 : index
    %c0_37 = arith.constant 0 : index
    %c0_38 = arith.constant 0 : index
    %45 = vector.load %arg9[%c3, %c0_37, %c0_38] : memref<30x8x32xf32, #tpu.memory_space<vmem>>, vector<1x8x32xf32>
    %46 = vector.shape_cast %45 : vector<1x8x32xf32> to vector<8x32xf32>
    %47 = arith.truncf %41 : vector<8x32xf32> to vector<8x32xbf16>
    %cst_39 = arith.constant dense<0.000000e+00> : vector<8x32xf32>
    %48 = tpu.matmul %47, %3, %cst_39 {dimension_numbers = #tpu.dot_dimension_numbers<[1], [0], [0], [1], [0, 0, 1, 1], [], []>} : vector<8x32xbf16>, vector<32x32xbf16>, vector<8x32xf32> -> vector<8x32xf32>
    %49 = arith.addf %46, %48 : vector<8x32xf32>
    %cst_40 = arith.constant 0.000000e+00 : f32
    %50 = vector.broadcast %cst_40 : f32 to vector<8x32xf32>
    %51 = arith.maximumf %49, %50 : vector<8x32xf32>
    %c3_41 = arith.constant 3 : index
    %c0_42 = arith.constant 0 : index
    %c0_43 = arith.constant 0 : index
    %52 = vector.load %arg8[%c3_41, %c0_42, %c0_43] : memref<30x8x32xf32, #tpu.memory_space<vmem>>, vector<1x8x32xf32>
    %53 = vector.shape_cast %52 : vector<1x8x32xf32> to vector<8x32xf32>
    %54 = vector.shape_cast %51 : vector<8x32xf32> to vector<1x8x32xf32>
    tpu.vector_store %arg8[%c3_41, %c0_42, %c0_43], %54 {strides = array<i32>} : memref<30x8x32xf32, #tpu.memory_space<vmem>>, vector<1x8x32xf32>,
    %c4 = arith.constant 4 : index
    %c0_44 = arith.constant 0 : index
    %c0_45 = arith.constant 0 : index
    %55 = vector.load %arg9[%c4, %c0_44, %c0_45] : memref<30x8x32xf32, #tpu.memory_space<vmem>>, vector<1x8x32xf32>
    %56 = vector.shape_cast %55 : vector<1x8x32xf32> to vector<8x32xf32>
    %57 = arith.truncf %51 : vector<8x32xf32> to vector<8x32xbf16>
    %cst_46 = arith.constant dense<0.000000e+00> : vector<8x32xf32>
    %58 = tpu.matmul %57, %3, %cst_46 {dimension_numbers = #tpu.dot_dimension_numbers<[1], [0], [0], [1], [0, 0, 1, 1], [], []>} : vector<8x32xbf16>, vector<32x32xbf16>, vector<8x32xf32> -> vector<8x32xf32>
    %59 = arith.addf %56, %58 : vector<8x32xf32>
    %cst_47 = arith.constant 0.000000e+00 : f32
    %60 = vector.broadcast %cst_47 : f32 to vector<8x32xf32>
    %61 = arith.maximumf %59, %60 : vector<8x32xf32>
    %c4_48 = arith.constant 4 : index
    %c0_49 = arith.constant 0 : index
    %c0_50 = arith.constant 0 : index
    %62 = vector.load %arg8[%c4_48, %c0_49, %c0_50] : memref<30x8x32xf32, #tpu.memory_space<vmem>>, vector<1x8x32xf32>
    %63 = vector.shape_cast %62 : vector<1x8x32xf32> to vector<8x32xf32>
    %64 = vector.shape_cast %61 : vector<8x32xf32> to vector<1x8x32xf32>
    tpu.vector_store %arg8[%c4_48, %c0_49, %c0_50], %64 {strides = array<i32>} : memref<30x8x32xf32, #tpu.memory_space<vmem>>, vector<1x8x32xf32>,
    %c5 = arith.constant 5 : index
    %c0_51 = arith.constant 0 : index
    %c0_52 = arith.constant 0 : index
    %65 = vector.load %arg9[%c5, %c0_51, %c0_52] : memref<30x8x32xf32, #tpu.memory_space<vmem>>, vector<1x8x32xf32>
    %66 = vector.shape_cast %65 : vector<1x8x32xf32> to vector<8x32xf32>
    %67 = arith.truncf %61 : vector<8x32xf32> to vector<8x32xbf16>
    %cst_53 = arith.constant dense<0.000000e+00> : vector<8x32xf32>
    %68 = tpu.matmul %67, %3, %cst_53 {dimension_numbers = #tpu.dot_dimension_numbers<[1], [0], [0], [1], [0, 0, 1, 1], [], []>} : vector<8x32xbf16>, vector<32x32xbf16>, vector<8x32xf32> -> vector<8x32xf32>
    %69 = arith.addf %66, %68 : vector<8x32xf32>
    %cst_54 = arith.constant 0.000000e+00 : f32
    %70 = vector.broadcast %cst_54 : f32 to vector<8x32xf32>
    %71 = arith.maximumf %69, %70 : vector<8x32xf32>
    %c5_55 = arith.constant 5 : index
    %c0_56 = arith.constant 0 : index
    %c0_57 = arith.constant 0 : index
    %72 = vector.load %arg8[%c5_55, %c0_56, %c0_57] : memref<30x8x32xf32, #tpu.memory_space<vmem>>, vector<1x8x32xf32>
    %73 = vector.shape_cast %72 : vector<1x8x32xf32> to vector<8x32xf32>
    %74 = vector.shape_cast %71 : vector<8x32xf32> to vector<1x8x32xf32>
    tpu.vector_store %arg8[%c5_55, %c0_56, %c0_57], %74 {strides = array<i32>} : memref<30x8x32xf32, #tpu.memory_space<vmem>>, vector<1x8x32xf32>,
    %c6 = arith.constant 6 : index
    %c0_58 = arith.constant 0 : index
    %c0_59 = arith.constant 0 : index
    %75 = vector.load %arg9[%c6, %c0_58, %c0_59] : memref<30x8x32xf32, #tpu.memory_space<vmem>>, vector<1x8x32xf32>
    %76 = vector.shape_cast %75 : vector<1x8x32xf32> to vector<8x32xf32>
    %77 = arith.truncf %71 : vector<8x32xf32> to vector<8x32xbf16>
    %cst_60 = arith.constant dense<0.000000e+00> : vector<8x32xf32>
    %78 = tpu.matmul %77, %3, %cst_60 {dimension_numbers = #tpu.dot_dimension_numbers<[1], [0], [0], [1], [0, 0, 1, 1], [], []>} : vector<8x32xbf16>, vector<32x32xbf16>, vector<8x32xf32> -> vector<8x32xf32>
    %79 = arith.addf %76, %78 : vector<8x32xf32>
    %cst_61 = arith.constant 0.000000e+00 : f32
    %80 = vector.broadcast %cst_61 : f32 to vector<8x32xf32>
    %81 = arith.maximumf %79, %80 : vector<8x32xf32>
    %c6_62 = arith.constant 6 : index
    %c0_63 = arith.constant 0 : index
    %c0_64 = arith.constant 0 : index
    %82 = vector.load %arg8[%c6_62, %c0_63, %c0_64] : memref<30x8x32xf32, #tpu.memory_space<vmem>>, vector<1x8x32xf32>
    %83 = vector.shape_cast %82 : vector<1x8x32xf32> to vector<8x32xf32>
    %84 = vector.shape_cast %81 : vector<8x32xf32> to vector<1x8x32xf32>
    tpu.vector_store %arg8[%c6_62, %c0_63, %c0_64], %84 {strides = array<i32>} : memref<30x8x32xf32, #tpu.memory_space<vmem>>, vector<1x8x32xf32>,
    %c7 = arith.constant 7 : index
    %c0_65 = arith.constant 0 : index
    %c0_66 = arith.constant 0 : index
    %85 = vector.load %arg9[%c7, %c0_65, %c0_66] : memref<30x8x32xf32, #tpu.memory_space<vmem>>, vector<1x8x32xf32>
    %86 = vector.shape_cast %85 : vector<1x8x32xf32> to vector<8x32xf32>
    %87 = arith.truncf %81 : vector<8x32xf32> to vector<8x32xbf16>
    %cst_67 = arith.constant dense<0.000000e+00> : vector<8x32xf32>
    %88 = tpu.matmul %87, %3, %cst_67 {dimension_numbers = #tpu.dot_dimension_numbers<[1], [0], [0], [1], [0, 0, 1, 1], [], []>} : vector<8x32xbf16>, vector<32x32xbf16>, vector<8x32xf32> -> vector<8x32xf32>
    %89 = arith.addf %86, %88 : vector<8x32xf32>
    %cst_68 = arith.constant 0.000000e+00 : f32
    %90 = vector.broadcast %cst_68 : f32 to vector<8x32xf32>
    %91 = arith.maximumf %89, %90 : vector<8x32xf32>
    %c7_69 = arith.constant 7 : index
    %c0_70 = arith.constant 0 : index
    %c0_71 = arith.constant 0 : index
    %92 = vector.load %arg8[%c7_69, %c0_70, %c0_71] : memref<30x8x32xf32, #tpu.memory_space<vmem>>, vector<1x8x32xf32>
    %93 = vector.shape_cast %92 : vector<1x8x32xf32> to vector<8x32xf32>
    %94 = vector.shape_cast %91 : vector<8x32xf32> to vector<1x8x32xf32>
    tpu.vector_store %arg8[%c7_69, %c0_70, %c0_71], %94 {strides = array<i32>} : memref<30x8x32xf32, #tpu.memory_space<vmem>>, vector<1x8x32xf32>,
    %c8 = arith.constant 8 : index
    %c0_72 = arith.constant 0 : index
    %c0_73 = arith.constant 0 : index
    %95 = vector.load %arg9[%c8, %c0_72, %c0_73] : memref<30x8x32xf32, #tpu.memory_space<vmem>>, vector<1x8x32xf32>
    %96 = vector.shape_cast %95 : vector<1x8x32xf32> to vector<8x32xf32>
    %97 = arith.truncf %91 : vector<8x32xf32> to vector<8x32xbf16>
    %cst_74 = arith.constant dense<0.000000e+00> : vector<8x32xf32>
    %98 = tpu.matmul %97, %3, %cst_74 {dimension_numbers = #tpu.dot_dimension_numbers<[1], [0], [0], [1], [0, 0, 1, 1], [], []>} : vector<8x32xbf16>, vector<32x32xbf16>, vector<8x32xf32> -> vector<8x32xf32>
    %99 = arith.addf %96, %98 : vector<8x32xf32>
    %cst_75 = arith.constant 0.000000e+00 : f32
    %100 = vector.broadcast %cst_75 : f32 to vector<8x32xf32>
    %101 = arith.maximumf %99, %100 : vector<8x32xf32>
    %c8_76 = arith.constant 8 : index
    %c0_77 = arith.constant 0 : index
    %c0_78 = arith.constant 0 : index
    %102 = vector.load %arg8[%c8_76, %c0_77, %c0_78] : memref<30x8x32xf32, #tpu.memory_space<vmem>>, vector<1x8x32xf32>
    %103 = vector.shape_cast %102 : vector<1x8x32xf32> to vector<8x32xf32>
    %104 = vector.shape_cast %101 : vector<8x32xf32> to vector<1x8x32xf32>
    tpu.vector_store %arg8[%c8_76, %c0_77, %c0_78], %104 {strides = array<i32>} : memref<30x8x32xf32, #tpu.memory_space<vmem>>, vector<1x8x32xf32>,
    %c9 = arith.constant 9 : index
    %c0_79 = arith.constant 0 : index
    %c0_80 = arith.constant 0 : index
    %105 = vector.load %arg9[%c9, %c0_79, %c0_80] : memref<30x8x32xf32, #tpu.memory_space<vmem>>, vector<1x8x32xf32>
    %106 = vector.shape_cast %105 : vector<1x8x32xf32> to vector<8x32xf32>
    %107 = arith.truncf %101 : vector<8x32xf32> to vector<8x32xbf16>
    %cst_81 = arith.constant dense<0.000000e+00> : vector<8x32xf32>
    %108 = tpu.matmul %107, %3, %cst_81 {dimension_numbers = #tpu.dot_dimension_numbers<[1], [0], [0], [1], [0, 0, 1, 1], [], []>} : vector<8x32xbf16>, vector<32x32xbf16>, vector<8x32xf32> -> vector<8x32xf32>
    %109 = arith.addf %106, %108 : vector<8x32xf32>
    %cst_82 = arith.constant 0.000000e+00 : f32
    %110 = vector.broadcast %cst_82 : f32 to vector<8x32xf32>
    %111 = arith.maximumf %109, %110 : vector<8x32xf32>
    %c9_83 = arith.constant 9 : index
    %c0_84 = arith.constant 0 : index
    %c0_85 = arith.constant 0 : index
    %112 = vector.load %arg8[%c9_83, %c0_84, %c0_85] : memref<30x8x32xf32, #tpu.memory_space<vmem>>, vector<1x8x32xf32>
    %113 = vector.shape_cast %112 : vector<1x8x32xf32> to vector<8x32xf32>
    %114 = vector.shape_cast %111 : vector<8x32xf32> to vector<1x8x32xf32>
    tpu.vector_store %arg8[%c9_83, %c0_84, %c0_85], %114 {strides = array<i32>} : memref<30x8x32xf32, #tpu.memory_space<vmem>>, vector<1x8x32xf32>,
    %c10 = arith.constant 10 : index
    %c0_86 = arith.constant 0 : index
    %c0_87 = arith.constant 0 : index
    %115 = vector.load %arg9[%c10, %c0_86, %c0_87] : memref<30x8x32xf32, #tpu.memory_space<vmem>>, vector<1x8x32xf32>
    %116 = vector.shape_cast %115 : vector<1x8x32xf32> to vector<8x32xf32>
    %117 = arith.truncf %111 : vector<8x32xf32> to vector<8x32xbf16>
    %cst_88 = arith.constant dense<0.000000e+00> : vector<8x32xf32>
    %118 = tpu.matmul %117, %3, %cst_88 {dimension_numbers = #tpu.dot_dimension_numbers<[1], [0], [0], [1], [0, 0, 1, 1], [], []>} : vector<8x32xbf16>, vector<32x32xbf16>, vector<8x32xf32> -> vector<8x32xf32>
    %119 = arith.addf %116, %118 : vector<8x32xf32>
    %cst_89 = arith.constant 0.000000e+00 : f32
    %120 = vector.broadcast %cst_89 : f32 to vector<8x32xf32>
    %121 = arith.maximumf %119, %120 : vector<8x32xf32>
    %c10_90 = arith.constant 10 : index
    %c0_91 = arith.constant 0 : index
    %c0_92 = arith.constant 0 : index
    %122 = vector.load %arg8[%c10_90, %c0_91, %c0_92] : memref<30x8x32xf32, #tpu.memory_space<vmem>>, vector<1x8x32xf32>
    %123 = vector.shape_cast %122 : vector<1x8x32xf32> to vector<8x32xf32>
    %124 = vector.shape_cast %121 : vector<8x32xf32> to vector<1x8x32xf32>
    tpu.vector_store %arg8[%c10_90, %c0_91, %c0_92], %124 {strides = array<i32>} : memref<30x8x32xf32, #tpu.memory_space<vmem>>, vector<1x8x32xf32>,
    %c11 = arith.constant 11 : index
    %c0_93 = arith.constant 0 : index
    %c0_94 = arith.constant 0 : index
    %125 = vector.load %arg9[%c11, %c0_93, %c0_94] : memref<30x8x32xf32, #tpu.memory_space<vmem>>, vector<1x8x32xf32>
    %126 = vector.shape_cast %125 : vector<1x8x32xf32> to vector<8x32xf32>
    %127 = arith.truncf %121 : vector<8x32xf32> to vector<8x32xbf16>
    %cst_95 = arith.constant dense<0.000000e+00> : vector<8x32xf32>
    %128 = tpu.matmul %127, %3, %cst_95 {dimension_numbers = #tpu.dot_dimension_numbers<[1], [0], [0], [1], [0, 0, 1, 1], [], []>} : vector<8x32xbf16>, vector<32x32xbf16>, vector<8x32xf32> -> vector<8x32xf32>
    %129 = arith.addf %126, %128 : vector<8x32xf32>
    %cst_96 = arith.constant 0.000000e+00 : f32
    %130 = vector.broadcast %cst_96 : f32 to vector<8x32xf32>
    %131 = arith.maximumf %129, %130 : vector<8x32xf32>
    %c11_97 = arith.constant 11 : index
    %c0_98 = arith.constant 0 : index
    %c0_99 = arith.constant 0 : index
    %132 = vector.load %arg8[%c11_97, %c0_98, %c0_99] : memref<30x8x32xf32, #tpu.memory_space<vmem>>, vector<1x8x32xf32>
    %133 = vector.shape_cast %132 : vector<1x8x32xf32> to vector<8x32xf32>
    %134 = vector.shape_cast %131 : vector<8x32xf32> to vector<1x8x32xf32>
    tpu.vector_store %arg8[%c11_97, %c0_98, %c0_99], %134 {strides = array<i32>} : memref<30x8x32xf32, #tpu.memory_space<vmem>>, vector<1x8x32xf32>,
    %c12 = arith.constant 12 : index
    %c0_100 = arith.constant 0 : index
    %c0_101 = arith.constant 0 : index
    %135 = vector.load %arg9[%c12, %c0_100, %c0_101] : memref<30x8x32xf32, #tpu.memory_space<vmem>>, vector<1x8x32xf32>
    %136 = vector.shape_cast %135 : vector<1x8x32xf32> to vector<8x32xf32>
    %137 = arith.truncf %131 : vector<8x32xf32> to vector<8x32xbf16>
    %cst_102 = arith.constant dense<0.000000e+00> : vector<8x32xf32>
    %138 = tpu.matmul %137, %3, %cst_102 {dimension_numbers = #tpu.dot_dimension_numbers<[1], [0], [0], [1], [0, 0, 1, 1], [], []>} : vector<8x32xbf16>, vector<32x32xbf16>, vector<8x32xf32> -> vector<8x32xf32>
    %139 = arith.addf %136, %138 : vector<8x32xf32>
    %cst_103 = arith.constant 0.000000e+00 : f32
    %140 = vector.broadcast %cst_103 : f32 to vector<8x32xf32>
    %141 = arith.maximumf %139, %140 : vector<8x32xf32>
    %c12_104 = arith.constant 12 : index
    %c0_105 = arith.constant 0 : index
    %c0_106 = arith.constant 0 : index
    %142 = vector.load %arg8[%c12_104, %c0_105, %c0_106] : memref<30x8x32xf32, #tpu.memory_space<vmem>>, vector<1x8x32xf32>
    %143 = vector.shape_cast %142 : vector<1x8x32xf32> to vector<8x32xf32>
    %144 = vector.shape_cast %141 : vector<8x32xf32> to vector<1x8x32xf32>
    tpu.vector_store %arg8[%c12_104, %c0_105, %c0_106], %144 {strides = array<i32>} : memref<30x8x32xf32, #tpu.memory_space<vmem>>, vector<1x8x32xf32>,
    %c13 = arith.constant 13 : index
    %c0_107 = arith.constant 0 : index
    %c0_108 = arith.constant 0 : index
    %145 = vector.load %arg9[%c13, %c0_107, %c0_108] : memref<30x8x32xf32, #tpu.memory_space<vmem>>, vector<1x8x32xf32>
    %146 = vector.shape_cast %145 : vector<1x8x32xf32> to vector<8x32xf32>
    %147 = arith.truncf %141 : vector<8x32xf32> to vector<8x32xbf16>
    %cst_109 = arith.constant dense<0.000000e+00> : vector<8x32xf32>
    %148 = tpu.matmul %147, %3, %cst_109 {dimension_numbers = #tpu.dot_dimension_numbers<[1], [0], [0], [1], [0, 0, 1, 1], [], []>} : vector<8x32xbf16>, vector<32x32xbf16>, vector<8x32xf32> -> vector<8x32xf32>
    %149 = arith.addf %146, %148 : vector<8x32xf32>
    %cst_110 = arith.constant 0.000000e+00 : f32
    %150 = vector.broadcast %cst_110 : f32 to vector<8x32xf32>
    %151 = arith.maximumf %149, %150 : vector<8x32xf32>
    %c13_111 = arith.constant 13 : index
    %c0_112 = arith.constant 0 : index
    %c0_113 = arith.constant 0 : index
    %152 = vector.load %arg8[%c13_111, %c0_112, %c0_113] : memref<30x8x32xf32, #tpu.memory_space<vmem>>, vector<1x8x32xf32>
    %153 = vector.shape_cast %152 : vector<1x8x32xf32> to vector<8x32xf32>
    %154 = vector.shape_cast %151 : vector<8x32xf32> to vector<1x8x32xf32>
    tpu.vector_store %arg8[%c13_111, %c0_112, %c0_113], %154 {strides = array<i32>} : memref<30x8x32xf32, #tpu.memory_space<vmem>>, vector<1x8x32xf32>,
    %c14 = arith.constant 14 : index
    %c0_114 = arith.constant 0 : index
    %c0_115 = arith.constant 0 : index
    %155 = vector.load %arg9[%c14, %c0_114, %c0_115] : memref<30x8x32xf32, #tpu.memory_space<vmem>>, vector<1x8x32xf32>
    %156 = vector.shape_cast %155 : vector<1x8x32xf32> to vector<8x32xf32>
    %157 = arith.truncf %151 : vector<8x32xf32> to vector<8x32xbf16>
    %cst_116 = arith.constant dense<0.000000e+00> : vector<8x32xf32>
    %158 = tpu.matmul %157, %3, %cst_116 {dimension_numbers = #tpu.dot_dimension_numbers<[1], [0], [0], [1], [0, 0, 1, 1], [], []>} : vector<8x32xbf16>, vector<32x32xbf16>, vector<8x32xf32> -> vector<8x32xf32>
    %159 = arith.addf %156, %158 : vector<8x32xf32>
    %cst_117 = arith.constant 0.000000e+00 : f32
    %160 = vector.broadcast %cst_117 : f32 to vector<8x32xf32>
    %161 = arith.maximumf %159, %160 : vector<8x32xf32>
    %c14_118 = arith.constant 14 : index
    %c0_119 = arith.constant 0 : index
    %c0_120 = arith.constant 0 : index
    %162 = vector.load %arg8[%c14_118, %c0_119, %c0_120] : memref<30x8x32xf32, #tpu.memory_space<vmem>>, vector<1x8x32xf32>
    %163 = vector.shape_cast %162 : vector<1x8x32xf32> to vector<8x32xf32>
    %164 = vector.shape_cast %161 : vector<8x32xf32> to vector<1x8x32xf32>
    tpu.vector_store %arg8[%c14_118, %c0_119, %c0_120], %164 {strides = array<i32>} : memref<30x8x32xf32, #tpu.memory_space<vmem>>, vector<1x8x32xf32>,
    %c15 = arith.constant 15 : index
    %c0_121 = arith.constant 0 : index
    %c0_122 = arith.constant 0 : index
    %165 = vector.load %arg9[%c15, %c0_121, %c0_122] : memref<30x8x32xf32, #tpu.memory_space<vmem>>, vector<1x8x32xf32>
    %166 = vector.shape_cast %165 : vector<1x8x32xf32> to vector<8x32xf32>
    %167 = arith.truncf %161 : vector<8x32xf32> to vector<8x32xbf16>
    %cst_123 = arith.constant dense<0.000000e+00> : vector<8x32xf32>
    %168 = tpu.matmul %167, %3, %cst_123 {dimension_numbers = #tpu.dot_dimension_numbers<[1], [0], [0], [1], [0, 0, 1, 1], [], []>} : vector<8x32xbf16>, vector<32x32xbf16>, vector<8x32xf32> -> vector<8x32xf32>
    %169 = arith.addf %166, %168 : vector<8x32xf32>
    %cst_124 = arith.constant 0.000000e+00 : f32
    %170 = vector.broadcast %cst_124 : f32 to vector<8x32xf32>
    %171 = arith.maximumf %169, %170 : vector<8x32xf32>
    %c15_125 = arith.constant 15 : index
    %c0_126 = arith.constant 0 : index
    %c0_127 = arith.constant 0 : index
    %172 = vector.load %arg8[%c15_125, %c0_126, %c0_127] : memref<30x8x32xf32, #tpu.memory_space<vmem>>, vector<1x8x32xf32>
    %173 = vector.shape_cast %172 : vector<1x8x32xf32> to vector<8x32xf32>
    %174 = vector.shape_cast %171 : vector<8x32xf32> to vector<1x8x32xf32>
    tpu.vector_store %arg8[%c15_125, %c0_126, %c0_127], %174 {strides = array<i32>} : memref<30x8x32xf32, #tpu.memory_space<vmem>>, vector<1x8x32xf32>,
    %c16 = arith.constant 16 : index
    %c0_128 = arith.constant 0 : index
    %c0_129 = arith.constant 0 : index
    %175 = vector.load %arg9[%c16, %c0_128, %c0_129] : memref<30x8x32xf32, #tpu.memory_space<vmem>>, vector<1x8x32xf32>
    %176 = vector.shape_cast %175 : vector<1x8x32xf32> to vector<8x32xf32>
    %177 = arith.truncf %171 : vector<8x32xf32> to vector<8x32xbf16>
    %cst_130 = arith.constant dense<0.000000e+00> : vector<8x32xf32>
    %178 = tpu.matmul %177, %3, %cst_130 {dimension_numbers = #tpu.dot_dimension_numbers<[1], [0], [0], [1], [0, 0, 1, 1], [], []>} : vector<8x32xbf16>, vector<32x32xbf16>, vector<8x32xf32> -> vector<8x32xf32>
    %179 = arith.addf %176, %178 : vector<8x32xf32>
    %cst_131 = arith.constant 0.000000e+00 : f32
    %180 = vector.broadcast %cst_131 : f32 to vector<8x32xf32>
    %181 = arith.maximumf %179, %180 : vector<8x32xf32>
    %c16_132 = arith.constant 16 : index
    %c0_133 = arith.constant 0 : index
    %c0_134 = arith.constant 0 : index
    %182 = vector.load %arg8[%c16_132, %c0_133, %c0_134] : memref<30x8x32xf32, #tpu.memory_space<vmem>>, vector<1x8x32xf32>
    %183 = vector.shape_cast %182 : vector<1x8x32xf32> to vector<8x32xf32>
    %184 = vector.shape_cast %181 : vector<8x32xf32> to vector<1x8x32xf32>
    tpu.vector_store %arg8[%c16_132, %c0_133, %c0_134], %184 {strides = array<i32>} : memref<30x8x32xf32, #tpu.memory_space<vmem>>, vector<1x8x32xf32>,
    %c17 = arith.constant 17 : index
    %c0_135 = arith.constant 0 : index
    %c0_136 = arith.constant 0 : index
    %185 = vector.load %arg9[%c17, %c0_135, %c0_136] : memref<30x8x32xf32, #tpu.memory_space<vmem>>, vector<1x8x32xf32>
    %186 = vector.shape_cast %185 : vector<1x8x32xf32> to vector<8x32xf32>
    %187 = arith.truncf %181 : vector<8x32xf32> to vector<8x32xbf16>
    %cst_137 = arith.constant dense<0.000000e+00> : vector<8x32xf32>
    %188 = tpu.matmul %187, %3, %cst_137 {dimension_numbers = #tpu.dot_dimension_numbers<[1], [0], [0], [1], [0, 0, 1, 1], [], []>} : vector<8x32xbf16>, vector<32x32xbf16>, vector<8x32xf32> -> vector<8x32xf32>
    %189 = arith.addf %186, %188 : vector<8x32xf32>
    %cst_138 = arith.constant 0.000000e+00 : f32
    %190 = vector.broadcast %cst_138 : f32 to vector<8x32xf32>
    %191 = arith.maximumf %189, %190 : vector<8x32xf32>
    %c17_139 = arith.constant 17 : index
    %c0_140 = arith.constant 0 : index
    %c0_141 = arith.constant 0 : index
    %192 = vector.load %arg8[%c17_139, %c0_140, %c0_141] : memref<30x8x32xf32, #tpu.memory_space<vmem>>, vector<1x8x32xf32>
    %193 = vector.shape_cast %192 : vector<1x8x32xf32> to vector<8x32xf32>
    %194 = vector.shape_cast %191 : vector<8x32xf32> to vector<1x8x32xf32>
    tpu.vector_store %arg8[%c17_139, %c0_140, %c0_141], %194 {strides = array<i32>} : memref<30x8x32xf32, #tpu.memory_space<vmem>>, vector<1x8x32xf32>,
    %c18 = arith.constant 18 : index
    %c0_142 = arith.constant 0 : index
    %c0_143 = arith.constant 0 : index
    %195 = vector.load %arg9[%c18, %c0_142, %c0_143] : memref<30x8x32xf32, #tpu.memory_space<vmem>>, vector<1x8x32xf32>
    %196 = vector.shape_cast %195 : vector<1x8x32xf32> to vector<8x32xf32>
    %197 = arith.truncf %191 : vector<8x32xf32> to vector<8x32xbf16>
    %cst_144 = arith.constant dense<0.000000e+00> : vector<8x32xf32>
    %198 = tpu.matmul %197, %3, %cst_144 {dimension_numbers = #tpu.dot_dimension_numbers<[1], [0], [0], [1], [0, 0, 1, 1], [], []>} : vector<8x32xbf16>, vector<32x32xbf16>, vector<8x32xf32> -> vector<8x32xf32>
    %199 = arith.addf %196, %198 : vector<8x32xf32>
    %cst_145 = arith.constant 0.000000e+00 : f32
    %200 = vector.broadcast %cst_145 : f32 to vector<8x32xf32>
    %201 = arith.maximumf %199, %200 : vector<8x32xf32>
    %c18_146 = arith.constant 18 : index
    %c0_147 = arith.constant 0 : index
    %c0_148 = arith.constant 0 : index
    %202 = vector.load %arg8[%c18_146, %c0_147, %c0_148] : memref<30x8x32xf32, #tpu.memory_space<vmem>>, vector<1x8x32xf32>
    %203 = vector.shape_cast %202 : vector<1x8x32xf32> to vector<8x32xf32>
    %204 = vector.shape_cast %201 : vector<8x32xf32> to vector<1x8x32xf32>
    tpu.vector_store %arg8[%c18_146, %c0_147, %c0_148], %204 {strides = array<i32>} : memref<30x8x32xf32, #tpu.memory_space<vmem>>, vector<1x8x32xf32>,
    %c19 = arith.constant 19 : index
    %c0_149 = arith.constant 0 : index
    %c0_150 = arith.constant 0 : index
    %205 = vector.load %arg9[%c19, %c0_149, %c0_150] : memref<30x8x32xf32, #tpu.memory_space<vmem>>, vector<1x8x32xf32>
    %206 = vector.shape_cast %205 : vector<1x8x32xf32> to vector<8x32xf32>
    %207 = arith.truncf %201 : vector<8x32xf32> to vector<8x32xbf16>
    %cst_151 = arith.constant dense<0.000000e+00> : vector<8x32xf32>
    %208 = tpu.matmul %207, %3, %cst_151 {dimension_numbers = #tpu.dot_dimension_numbers<[1], [0], [0], [1], [0, 0, 1, 1], [], []>} : vector<8x32xbf16>, vector<32x32xbf16>, vector<8x32xf32> -> vector<8x32xf32>
    %209 = arith.addf %206, %208 : vector<8x32xf32>
    %cst_152 = arith.constant 0.000000e+00 : f32
    %210 = vector.broadcast %cst_152 : f32 to vector<8x32xf32>
    %211 = arith.maximumf %209, %210 : vector<8x32xf32>
    %c19_153 = arith.constant 19 : index
    %c0_154 = arith.constant 0 : index
    %c0_155 = arith.constant 0 : index
    %212 = vector.load %arg8[%c19_153, %c0_154, %c0_155] : memref<30x8x32xf32, #tpu.memory_space<vmem>>, vector<1x8x32xf32>
    %213 = vector.shape_cast %212 : vector<1x8x32xf32> to vector<8x32xf32>
    %214 = vector.shape_cast %211 : vector<8x32xf32> to vector<1x8x32xf32>
    tpu.vector_store %arg8[%c19_153, %c0_154, %c0_155], %214 {strides = array<i32>} : memref<30x8x32xf32, #tpu.memory_space<vmem>>, vector<1x8x32xf32>,
    %c20 = arith.constant 20 : index
    %c0_156 = arith.constant 0 : index
    %c0_157 = arith.constant 0 : index
    %215 = vector.load %arg9[%c20, %c0_156, %c0_157] : memref<30x8x32xf32, #tpu.memory_space<vmem>>, vector<1x8x32xf32>
    %216 = vector.shape_cast %215 : vector<1x8x32xf32> to vector<8x32xf32>
    %217 = arith.truncf %211 : vector<8x32xf32> to vector<8x32xbf16>
    %cst_158 = arith.constant dense<0.000000e+00> : vector<8x32xf32>
    %218 = tpu.matmul %217, %3, %cst_158 {dimension_numbers = #tpu.dot_dimension_numbers<[1], [0], [0], [1], [0, 0, 1, 1], [], []>} : vector<8x32xbf16>, vector<32x32xbf16>, vector<8x32xf32> -> vector<8x32xf32>
    %219 = arith.addf %216, %218 : vector<8x32xf32>
    %cst_159 = arith.constant 0.000000e+00 : f32
    %220 = vector.broadcast %cst_159 : f32 to vector<8x32xf32>
    %221 = arith.maximumf %219, %220 : vector<8x32xf32>
    %c20_160 = arith.constant 20 : index
    %c0_161 = arith.constant 0 : index
    %c0_162 = arith.constant 0 : index
    %222 = vector.load %arg8[%c20_160, %c0_161, %c0_162] : memref<30x8x32xf32, #tpu.memory_space<vmem>>, vector<1x8x32xf32>
    %223 = vector.shape_cast %222 : vector<1x8x32xf32> to vector<8x32xf32>
    %224 = vector.shape_cast %221 : vector<8x32xf32> to vector<1x8x32xf32>
    tpu.vector_store %arg8[%c20_160, %c0_161, %c0_162], %224 {strides = array<i32>} : memref<30x8x32xf32, #tpu.memory_space<vmem>>, vector<1x8x32xf32>,
    %c21 = arith.constant 21 : index
    %c0_163 = arith.constant 0 : index
    %c0_164 = arith.constant 0 : index
    %225 = vector.load %arg9[%c21, %c0_163, %c0_164] : memref<30x8x32xf32, #tpu.memory_space<vmem>>, vector<1x8x32xf32>
    %226 = vector.shape_cast %225 : vector<1x8x32xf32> to vector<8x32xf32>
    %227 = arith.truncf %221 : vector<8x32xf32> to vector<8x32xbf16>
    %cst_165 = arith.constant dense<0.000000e+00> : vector<8x32xf32>
    %228 = tpu.matmul %227, %3, %cst_165 {dimension_numbers = #tpu.dot_dimension_numbers<[1], [0], [0], [1], [0, 0, 1, 1], [], []>} : vector<8x32xbf16>, vector<32x32xbf16>, vector<8x32xf32> -> vector<8x32xf32>
    %229 = arith.addf %226, %228 : vector<8x32xf32>
    %cst_166 = arith.constant 0.000000e+00 : f32
    %230 = vector.broadcast %cst_166 : f32 to vector<8x32xf32>
    %231 = arith.maximumf %229, %230 : vector<8x32xf32>
    %c21_167 = arith.constant 21 : index
    %c0_168 = arith.constant 0 : index
    %c0_169 = arith.constant 0 : index
    %232 = vector.load %arg8[%c21_167, %c0_168, %c0_169] : memref<30x8x32xf32, #tpu.memory_space<vmem>>, vector<1x8x32xf32>
    %233 = vector.shape_cast %232 : vector<1x8x32xf32> to vector<8x32xf32>
    %234 = vector.shape_cast %231 : vector<8x32xf32> to vector<1x8x32xf32>
    tpu.vector_store %arg8[%c21_167, %c0_168, %c0_169], %234 {strides = array<i32>} : memref<30x8x32xf32, #tpu.memory_space<vmem>>, vector<1x8x32xf32>,
    %c22 = arith.constant 22 : index
    %c0_170 = arith.constant 0 : index
    %c0_171 = arith.constant 0 : index
    %235 = vector.load %arg9[%c22, %c0_170, %c0_171] : memref<30x8x32xf32, #tpu.memory_space<vmem>>, vector<1x8x32xf32>
    %236 = vector.shape_cast %235 : vector<1x8x32xf32> to vector<8x32xf32>
    %237 = arith.truncf %231 : vector<8x32xf32> to vector<8x32xbf16>
    %cst_172 = arith.constant dense<0.000000e+00> : vector<8x32xf32>
    %238 = tpu.matmul %237, %3, %cst_172 {dimension_numbers = #tpu.dot_dimension_numbers<[1], [0], [0], [1], [0, 0, 1, 1], [], []>} : vector<8x32xbf16>, vector<32x32xbf16>, vector<8x32xf32> -> vector<8x32xf32>
    %239 = arith.addf %236, %238 : vector<8x32xf32>
    %cst_173 = arith.constant 0.000000e+00 : f32
    %240 = vector.broadcast %cst_173 : f32 to vector<8x32xf32>
    %241 = arith.maximumf %239, %240 : vector<8x32xf32>
    %c22_174 = arith.constant 22 : index
    %c0_175 = arith.constant 0 : index
    %c0_176 = arith.constant 0 : index
    %242 = vector.load %arg8[%c22_174, %c0_175, %c0_176] : memref<30x8x32xf32, #tpu.memory_space<vmem>>, vector<1x8x32xf32>
    %243 = vector.shape_cast %242 : vector<1x8x32xf32> to vector<8x32xf32>
    %244 = vector.shape_cast %241 : vector<8x32xf32> to vector<1x8x32xf32>
    tpu.vector_store %arg8[%c22_174, %c0_175, %c0_176], %244 {strides = array<i32>} : memref<30x8x32xf32, #tpu.memory_space<vmem>>, vector<1x8x32xf32>,
    %c23 = arith.constant 23 : index
    %c0_177 = arith.constant 0 : index
    %c0_178 = arith.constant 0 : index
    %245 = vector.load %arg9[%c23, %c0_177, %c0_178] : memref<30x8x32xf32, #tpu.memory_space<vmem>>, vector<1x8x32xf32>
    %246 = vector.shape_cast %245 : vector<1x8x32xf32> to vector<8x32xf32>
    %247 = arith.truncf %241 : vector<8x32xf32> to vector<8x32xbf16>
    %cst_179 = arith.constant dense<0.000000e+00> : vector<8x32xf32>
    %248 = tpu.matmul %247, %3, %cst_179 {dimension_numbers = #tpu.dot_dimension_numbers<[1], [0], [0], [1], [0, 0, 1, 1], [], []>} : vector<8x32xbf16>, vector<32x32xbf16>, vector<8x32xf32> -> vector<8x32xf32>
    %249 = arith.addf %246, %248 : vector<8x32xf32>
    %cst_180 = arith.constant 0.000000e+00 : f32
    %250 = vector.broadcast %cst_180 : f32 to vector<8x32xf32>
    %251 = arith.maximumf %249, %250 : vector<8x32xf32>
    %c23_181 = arith.constant 23 : index
    %c0_182 = arith.constant 0 : index
    %c0_183 = arith.constant 0 : index
    %252 = vector.load %arg8[%c23_181, %c0_182, %c0_183] : memref<30x8x32xf32, #tpu.memory_space<vmem>>, vector<1x8x32xf32>
    %253 = vector.shape_cast %252 : vector<1x8x32xf32> to vector<8x32xf32>
    %254 = vector.shape_cast %251 : vector<8x32xf32> to vector<1x8x32xf32>
    tpu.vector_store %arg8[%c23_181, %c0_182, %c0_183], %254 {strides = array<i32>} : memref<30x8x32xf32, #tpu.memory_space<vmem>>, vector<1x8x32xf32>,
    %c24 = arith.constant 24 : index
    %c0_184 = arith.constant 0 : index
    %c0_185 = arith.constant 0 : index
    %255 = vector.load %arg9[%c24, %c0_184, %c0_185] : memref<30x8x32xf32, #tpu.memory_space<vmem>>, vector<1x8x32xf32>
    %256 = vector.shape_cast %255 : vector<1x8x32xf32> to vector<8x32xf32>
    %257 = arith.truncf %251 : vector<8x32xf32> to vector<8x32xbf16>
    %cst_186 = arith.constant dense<0.000000e+00> : vector<8x32xf32>
    %258 = tpu.matmul %257, %3, %cst_186 {dimension_numbers = #tpu.dot_dimension_numbers<[1], [0], [0], [1], [0, 0, 1, 1], [], []>} : vector<8x32xbf16>, vector<32x32xbf16>, vector<8x32xf32> -> vector<8x32xf32>
    %259 = arith.addf %256, %258 : vector<8x32xf32>
    %cst_187 = arith.constant 0.000000e+00 : f32
    %260 = vector.broadcast %cst_187 : f32 to vector<8x32xf32>
    %261 = arith.maximumf %259, %260 : vector<8x32xf32>
    %c24_188 = arith.constant 24 : index
    %c0_189 = arith.constant 0 : index
    %c0_190 = arith.constant 0 : index
    %262 = vector.load %arg8[%c24_188, %c0_189, %c0_190] : memref<30x8x32xf32, #tpu.memory_space<vmem>>, vector<1x8x32xf32>
    %263 = vector.shape_cast %262 : vector<1x8x32xf32> to vector<8x32xf32>
    %264 = vector.shape_cast %261 : vector<8x32xf32> to vector<1x8x32xf32>
    tpu.vector_store %arg8[%c24_188, %c0_189, %c0_190], %264 {strides = array<i32>} : memref<30x8x32xf32, #tpu.memory_space<vmem>>, vector<1x8x32xf32>,
    %c25 = arith.constant 25 : index
    %c0_191 = arith.constant 0 : index
    %c0_192 = arith.constant 0 : index
    %265 = vector.load %arg9[%c25, %c0_191, %c0_192] : memref<30x8x32xf32, #tpu.memory_space<vmem>>, vector<1x8x32xf32>
    %266 = vector.shape_cast %265 : vector<1x8x32xf32> to vector<8x32xf32>
    %267 = arith.truncf %261 : vector<8x32xf32> to vector<8x32xbf16>
    %cst_193 = arith.constant dense<0.000000e+00> : vector<8x32xf32>
    %268 = tpu.matmul %267, %3, %cst_193 {dimension_numbers = #tpu.dot_dimension_numbers<[1], [0], [0], [1], [0, 0, 1, 1], [], []>} : vector<8x32xbf16>, vector<32x32xbf16>, vector<8x32xf32> -> vector<8x32xf32>
    %269 = arith.addf %266, %268 : vector<8x32xf32>
    %cst_194 = arith.constant 0.000000e+00 : f32
    %270 = vector.broadcast %cst_194 : f32 to vector<8x32xf32>
    %271 = arith.maximumf %269, %270 : vector<8x32xf32>
    %c25_195 = arith.constant 25 : index
    %c0_196 = arith.constant 0 : index
    %c0_197 = arith.constant 0 : index
    %272 = vector.load %arg8[%c25_195, %c0_196, %c0_197] : memref<30x8x32xf32, #tpu.memory_space<vmem>>, vector<1x8x32xf32>
    %273 = vector.shape_cast %272 : vector<1x8x32xf32> to vector<8x32xf32>
    %274 = vector.shape_cast %271 : vector<8x32xf32> to vector<1x8x32xf32>
    tpu.vector_store %arg8[%c25_195, %c0_196, %c0_197], %274 {strides = array<i32>} : memref<30x8x32xf32, #tpu.memory_space<vmem>>, vector<1x8x32xf32>,
    %c26 = arith.constant 26 : index
    %c0_198 = arith.constant 0 : index
    %c0_199 = arith.constant 0 : index
    %275 = vector.load %arg9[%c26, %c0_198, %c0_199] : memref<30x8x32xf32, #tpu.memory_space<vmem>>, vector<1x8x32xf32>
    %276 = vector.shape_cast %275 : vector<1x8x32xf32> to vector<8x32xf32>
    %277 = arith.truncf %271 : vector<8x32xf32> to vector<8x32xbf16>
    %cst_200 = arith.constant dense<0.000000e+00> : vector<8x32xf32>
    %278 = tpu.matmul %277, %3, %cst_200 {dimension_numbers = #tpu.dot_dimension_numbers<[1], [0], [0], [1], [0, 0, 1, 1], [], []>} : vector<8x32xbf16>, vector<32x32xbf16>, vector<8x32xf32> -> vector<8x32xf32>
    %279 = arith.addf %276, %278 : vector<8x32xf32>
    %cst_201 = arith.constant 0.000000e+00 : f32
    %280 = vector.broadcast %cst_201 : f32 to vector<8x32xf32>
    %281 = arith.maximumf %279, %280 : vector<8x32xf32>
    %c26_202 = arith.constant 26 : index
    %c0_203 = arith.constant 0 : index
    %c0_204 = arith.constant 0 : index
    %282 = vector.load %arg8[%c26_202, %c0_203, %c0_204] : memref<30x8x32xf32, #tpu.memory_space<vmem>>, vector<1x8x32xf32>
    %283 = vector.shape_cast %282 : vector<1x8x32xf32> to vector<8x32xf32>
    %284 = vector.shape_cast %281 : vector<8x32xf32> to vector<1x8x32xf32>
    tpu.vector_store %arg8[%c26_202, %c0_203, %c0_204], %284 {strides = array<i32>} : memref<30x8x32xf32, #tpu.memory_space<vmem>>, vector<1x8x32xf32>,
    %c27 = arith.constant 27 : index
    %c0_205 = arith.constant 0 : index
    %c0_206 = arith.constant 0 : index
    %285 = vector.load %arg9[%c27, %c0_205, %c0_206] : memref<30x8x32xf32, #tpu.memory_space<vmem>>, vector<1x8x32xf32>
    %286 = vector.shape_cast %285 : vector<1x8x32xf32> to vector<8x32xf32>
    %287 = arith.truncf %281 : vector<8x32xf32> to vector<8x32xbf16>
    %cst_207 = arith.constant dense<0.000000e+00> : vector<8x32xf32>
    %288 = tpu.matmul %287, %3, %cst_207 {dimension_numbers = #tpu.dot_dimension_numbers<[1], [0], [0], [1], [0, 0, 1, 1], [], []>} : vector<8x32xbf16>, vector<32x32xbf16>, vector<8x32xf32> -> vector<8x32xf32>
    %289 = arith.addf %286, %288 : vector<8x32xf32>
    %cst_208 = arith.constant 0.000000e+00 : f32
    %290 = vector.broadcast %cst_208 : f32 to vector<8x32xf32>
    %291 = arith.maximumf %289, %290 : vector<8x32xf32>
    %c27_209 = arith.constant 27 : index
    %c0_210 = arith.constant 0 : index
    %c0_211 = arith.constant 0 : index
    %292 = vector.load %arg8[%c27_209, %c0_210, %c0_211] : memref<30x8x32xf32, #tpu.memory_space<vmem>>, vector<1x8x32xf32>
    %293 = vector.shape_cast %292 : vector<1x8x32xf32> to vector<8x32xf32>
    %294 = vector.shape_cast %291 : vector<8x32xf32> to vector<1x8x32xf32>
    tpu.vector_store %arg8[%c27_209, %c0_210, %c0_211], %294 {strides = array<i32>} : memref<30x8x32xf32, #tpu.memory_space<vmem>>, vector<1x8x32xf32>,
    %c28 = arith.constant 28 : index
    %c0_212 = arith.constant 0 : index
    %c0_213 = arith.constant 0 : index
    %295 = vector.load %arg9[%c28, %c0_212, %c0_213] : memref<30x8x32xf32, #tpu.memory_space<vmem>>, vector<1x8x32xf32>
    %296 = vector.shape_cast %295 : vector<1x8x32xf32> to vector<8x32xf32>
    %297 = arith.truncf %291 : vector<8x32xf32> to vector<8x32xbf16>
    %cst_214 = arith.constant dense<0.000000e+00> : vector<8x32xf32>
    %298 = tpu.matmul %297, %3, %cst_214 {dimension_numbers = #tpu.dot_dimension_numbers<[1], [0], [0], [1], [0, 0, 1, 1], [], []>} : vector<8x32xbf16>, vector<32x32xbf16>, vector<8x32xf32> -> vector<8x32xf32>
    %299 = arith.addf %296, %298 : vector<8x32xf32>
    %cst_215 = arith.constant 0.000000e+00 : f32
    %300 = vector.broadcast %cst_215 : f32 to vector<8x32xf32>
    %301 = arith.maximumf %299, %300 : vector<8x32xf32>
    %c28_216 = arith.constant 28 : index
    %c0_217 = arith.constant 0 : index
    %c0_218 = arith.constant 0 : index
    %302 = vector.load %arg8[%c28_216, %c0_217, %c0_218] : memref<30x8x32xf32, #tpu.memory_space<vmem>>, vector<1x8x32xf32>
    %303 = vector.shape_cast %302 : vector<1x8x32xf32> to vector<8x32xf32>
    %304 = vector.shape_cast %301 : vector<8x32xf32> to vector<1x8x32xf32>
    tpu.vector_store %arg8[%c28_216, %c0_217, %c0_218], %304 {strides = array<i32>} : memref<30x8x32xf32, #tpu.memory_space<vmem>>, vector<1x8x32xf32>,
    %c29 = arith.constant 29 : index
    %c0_219 = arith.constant 0 : index
    %c0_220 = arith.constant 0 : index
    %305 = vector.load %arg9[%c29, %c0_219, %c0_220] : memref<30x8x32xf32, #tpu.memory_space<vmem>>, vector<1x8x32xf32>
    %306 = vector.shape_cast %305 : vector<1x8x32xf32> to vector<8x32xf32>
    %307 = arith.truncf %301 : vector<8x32xf32> to vector<8x32xbf16>
    %cst_221 = arith.constant dense<0.000000e+00> : vector<8x32xf32>
    %308 = tpu.matmul %307, %3, %cst_221 {dimension_numbers = #tpu.dot_dimension_numbers<[1], [0], [0], [1], [0, 0, 1, 1], [], []>} : vector<8x32xbf16>, vector<32x32xbf16>, vector<8x32xf32> -> vector<8x32xf32>
    %309 = arith.addf %306, %308 : vector<8x32xf32>
    %cst_222 = arith.constant 0.000000e+00 : f32
    %310 = vector.broadcast %cst_222 : f32 to vector<8x32xf32>
    %311 = arith.maximumf %309, %310 : vector<8x32xf32>
    %c29_223 = arith.constant 29 : index
    %c0_224 = arith.constant 0 : index
    %c0_225 = arith.constant 0 : index
    %312 = vector.load %arg8[%c29_223, %c0_224, %c0_225] : memref<30x8x32xf32, #tpu.memory_space<vmem>>, vector<1x8x32xf32>
    %313 = vector.shape_cast %312 : vector<1x8x32xf32> to vector<8x32xf32>
    %314 = vector.shape_cast %311 : vector<8x32xf32> to vector<1x8x32xf32>
    tpu.vector_store %arg8[%c29_223, %c0_224, %c0_225], %314 {strides = array<i32>} : memref<30x8x32xf32, #tpu.memory_space<vmem>>, vector<1x8x32xf32>,
    %c1_226 = arith.constant 1 : index
    %c0_227 = arith.constant 0 : index
    %c0_228 = arith.constant 0 : index
    %315 = vector.load %arg2[%c1_226, %c0_227, %c0_228] : memref<2x32x32xbf16, #tpu.memory_space<vmem>>, vector<1x32x32xbf16>
    %316 = vector.shape_cast %315 : vector<1x32x32xbf16> to vector<32x32xbf16>
    %c1_229 = arith.constant 1 : index
    %c0_230 = arith.constant 0 : index
    %c0_231 = arith.constant 0 : index
    %317 = vector.load %arg3[%c1_229, %c0_230, %c0_231] : memref<2x32x32xbf16, #tpu.memory_space<vmem>>, vector<1x32x32xbf16>
    %318 = vector.shape_cast %317 : vector<1x32x32xbf16> to vector<32x32xbf16>
    %c1_232 = arith.constant 1 : index
    %c0_233 = arith.constant 0 : index
    %c0_234 = arith.constant 0 : index
    %319 = vector.load %arg4[%c1_232, %c0_233, %c0_234] : memref<2x1x32xf32, #tpu.memory_space<vmem>>, vector<1x1x32xf32>
    %320 = vector.shape_cast %319 : vector<1x1x32xf32> to vector<1x32xf32>
    %c0_235 = arith.constant 0 : index
    %c0_236 = arith.constant 0 : index
    %c0_237 = arith.constant 0 : index
    %321 = vector.load %arg8[%c0_235, %c0_236, %c0_237] : memref<30x8x32xf32, #tpu.memory_space<vmem>>, vector<30x8x32xf32>
    %322 = vector.shape_cast %321 : vector<30x8x32xf32> to vector<240x32xf32>
    %323 = arith.truncf %322 : vector<240x32xf32> to vector<240x32xbf16>
    %cst_238 = arith.constant dense<0.000000e+00> : vector<240x32xf32>
    %324 = tpu.matmul %323, %316, %cst_238 {dimension_numbers = #tpu.dot_dimension_numbers<[1], [0], [0], [1], [0, 0, 1, 1], [], []>} : vector<240x32xbf16>, vector<32x32xbf16>, vector<240x32xf32> -> vector<240x32xf32>
    %325 = vector.broadcast %320 : vector<1x32xf32> to vector<240x32xf32>
    %326 = arith.addf %324, %325 : vector<240x32xf32>
    %327 = vector.shape_cast %326 : vector<240x32xf32> to vector<30x8x32xf32>
    %c0_239 = arith.constant 0 : index
    %c0_240 = arith.constant 0 : index
    %c0_241 = arith.constant 0 : index
    %328 = vector.load %arg9[%c0_239, %c0_240, %c0_241] : memref<30x8x32xf32, #tpu.memory_space<vmem>>, vector<30x8x32xf32>
    tpu.vector_store %arg9[%c0_239, %c0_240, %c0_241], %327 {strides = array<i32>} : memref<30x8x32xf32, #tpu.memory_space<vmem>>, vector<30x8x32xf32>,
    %cst_242 = arith.constant 0.000000e+00 : f32
    %329 = vector.broadcast %cst_242 : f32 to vector<8x32xf32>
    %c0_243 = arith.constant 0 : index
    %c0_244 = arith.constant 0 : index
    %c0_245 = arith.constant 0 : index
    %330 = vector.load %arg9[%c0_243, %c0_244, %c0_245] : memref<30x8x32xf32, #tpu.memory_space<vmem>>, vector<1x8x32xf32>
    %331 = vector.shape_cast %330 : vector<1x8x32xf32> to vector<8x32xf32>
    %332 = arith.truncf %329 : vector<8x32xf32> to vector<8x32xbf16>
    %cst_246 = arith.constant dense<0.000000e+00> : vector<8x32xf32>
    %333 = tpu.matmul %332, %318, %cst_246 {dimension_numbers = #tpu.dot_dimension_numbers<[1], [0], [0], [1], [0, 0, 1, 1], [], []>} : vector<8x32xbf16>, vector<32x32xbf16>, vector<8x32xf32> -> vector<8x32xf32>
    %334 = arith.addf %331, %333 : vector<8x32xf32>
    %cst_247 = arith.constant 0.000000e+00 : f32
    %335 = vector.broadcast %cst_247 : f32 to vector<8x32xf32>
    %336 = arith.maximumf %334, %335 : vector<8x32xf32>
    %c1_248 = arith.constant 1 : index
    %c0_249 = arith.constant 0 : index
    %c0_250 = arith.constant 0 : index
    %337 = vector.load %arg9[%c1_248, %c0_249, %c0_250] : memref<30x8x32xf32, #tpu.memory_space<vmem>>, vector<1x8x32xf32>
    %338 = vector.shape_cast %337 : vector<1x8x32xf32> to vector<8x32xf32>
    %339 = arith.truncf %336 : vector<8x32xf32> to vector<8x32xbf16>
    %cst_251 = arith.constant dense<0.000000e+00> : vector<8x32xf32>
    %340 = tpu.matmul %339, %318, %cst_251 {dimension_numbers = #tpu.dot_dimension_numbers<[1], [0], [0], [1], [0, 0, 1, 1], [], []>} : vector<8x32xbf16>, vector<32x32xbf16>, vector<8x32xf32> -> vector<8x32xf32>
    %341 = arith.addf %338, %340 : vector<8x32xf32>
    %cst_252 = arith.constant 0.000000e+00 : f32
    %342 = vector.broadcast %cst_252 : f32 to vector<8x32xf32>
    %343 = arith.maximumf %341, %342 : vector<8x32xf32>
    %c2_253 = arith.constant 2 : index
    %c0_254 = arith.constant 0 : index
    %c0_255 = arith.constant 0 : index
    %344 = vector.load %arg9[%c2_253, %c0_254, %c0_255] : memref<30x8x32xf32, #tpu.memory_space<vmem>>, vector<1x8x32xf32>
    %345 = vector.shape_cast %344 : vector<1x8x32xf32> to vector<8x32xf32>
    %346 = arith.truncf %343 : vector<8x32xf32> to vector<8x32xbf16>
    %cst_256 = arith.constant dense<0.000000e+00> : vector<8x32xf32>
    %347 = tpu.matmul %346, %318, %cst_256 {dimension_numbers = #tpu.dot_dimension_numbers<[1], [0], [0], [1], [0, 0, 1, 1], [], []>} : vector<8x32xbf16>, vector<32x32xbf16>, vector<8x32xf32> -> vector<8x32xf32>
    %348 = arith.addf %345, %347 : vector<8x32xf32>
    %cst_257 = arith.constant 0.000000e+00 : f32
    %349 = vector.broadcast %cst_257 : f32 to vector<8x32xf32>
    %350 = arith.maximumf %348, %349 : vector<8x32xf32>
    %c3_258 = arith.constant 3 : index
    %c0_259 = arith.constant 0 : index
    %c0_260 = arith.constant 0 : index
    %351 = vector.load %arg9[%c3_258, %c0_259, %c0_260] : memref<30x8x32xf32, #tpu.memory_space<vmem>>, vector<1x8x32xf32>
    %352 = vector.shape_cast %351 : vector<1x8x32xf32> to vector<8x32xf32>
    %353 = arith.truncf %350 : vector<8x32xf32> to vector<8x32xbf16>
    %cst_261 = arith.constant dense<0.000000e+00> : vector<8x32xf32>
    %354 = tpu.matmul %353, %318, %cst_261 {dimension_numbers = #tpu.dot_dimension_numbers<[1], [0], [0], [1], [0, 0, 1, 1], [], []>} : vector<8x32xbf16>, vector<32x32xbf16>, vector<8x32xf32> -> vector<8x32xf32>
    %355 = arith.addf %352, %354 : vector<8x32xf32>
    %cst_262 = arith.constant 0.000000e+00 : f32
    %356 = vector.broadcast %cst_262 : f32 to vector<8x32xf32>
    %357 = arith.maximumf %355, %356 : vector<8x32xf32>
    %c4_263 = arith.constant 4 : index
    %c0_264 = arith.constant 0 : index
    %c0_265 = arith.constant 0 : index
    %358 = vector.load %arg9[%c4_263, %c0_264, %c0_265] : memref<30x8x32xf32, #tpu.memory_space<vmem>>, vector<1x8x32xf32>
    %359 = vector.shape_cast %358 : vector<1x8x32xf32> to vector<8x32xf32>
    %360 = arith.truncf %357 : vector<8x32xf32> to vector<8x32xbf16>
    %cst_266 = arith.constant dense<0.000000e+00> : vector<8x32xf32>
    %361 = tpu.matmul %360, %318, %cst_266 {dimension_numbers = #tpu.dot_dimension_numbers<[1], [0], [0], [1], [0, 0, 1, 1], [], []>} : vector<8x32xbf16>, vector<32x32xbf16>, vector<8x32xf32> -> vector<8x32xf32>
    %362 = arith.addf %359, %361 : vector<8x32xf32>
    %cst_267 = arith.constant 0.000000e+00 : f32
    %363 = vector.broadcast %cst_267 : f32 to vector<8x32xf32>
    %364 = arith.maximumf %362, %363 : vector<8x32xf32>
    %c5_268 = arith.constant 5 : index
    %c0_269 = arith.constant 0 : index
    %c0_270 = arith.constant 0 : index
    %365 = vector.load %arg9[%c5_268, %c0_269, %c0_270] : memref<30x8x32xf32, #tpu.memory_space<vmem>>, vector<1x8x32xf32>
    %366 = vector.shape_cast %365 : vector<1x8x32xf32> to vector<8x32xf32>
    %367 = arith.truncf %364 : vector<8x32xf32> to vector<8x32xbf16>
    %cst_271 = arith.constant dense<0.000000e+00> : vector<8x32xf32>
    %368 = tpu.matmul %367, %318, %cst_271 {dimension_numbers = #tpu.dot_dimension_numbers<[1], [0], [0], [1], [0, 0, 1, 1], [], []>} : vector<8x32xbf16>, vector<32x32xbf16>, vector<8x32xf32> -> vector<8x32xf32>
    %369 = arith.addf %366, %368 : vector<8x32xf32>
    %cst_272 = arith.constant 0.000000e+00 : f32
    %370 = vector.broadcast %cst_272 : f32 to vector<8x32xf32>
    %371 = arith.maximumf %369, %370 : vector<8x32xf32>
    %c6_273 = arith.constant 6 : index
    %c0_274 = arith.constant 0 : index
    %c0_275 = arith.constant 0 : index
    %372 = vector.load %arg9[%c6_273, %c0_274, %c0_275] : memref<30x8x32xf32, #tpu.memory_space<vmem>>, vector<1x8x32xf32>
    %373 = vector.shape_cast %372 : vector<1x8x32xf32> to vector<8x32xf32>
    %374 = arith.truncf %371 : vector<8x32xf32> to vector<8x32xbf16>
    %cst_276 = arith.constant dense<0.000000e+00> : vector<8x32xf32>
    %375 = tpu.matmul %374, %318, %cst_276 {dimension_numbers = #tpu.dot_dimension_numbers<[1], [0], [0], [1], [0, 0, 1, 1], [], []>} : vector<8x32xbf16>, vector<32x32xbf16>, vector<8x32xf32> -> vector<8x32xf32>
    %376 = arith.addf %373, %375 : vector<8x32xf32>
    %cst_277 = arith.constant 0.000000e+00 : f32
    %377 = vector.broadcast %cst_277 : f32 to vector<8x32xf32>
    %378 = arith.maximumf %376, %377 : vector<8x32xf32>
    %c7_278 = arith.constant 7 : index
    %c0_279 = arith.constant 0 : index
    %c0_280 = arith.constant 0 : index
    %379 = vector.load %arg9[%c7_278, %c0_279, %c0_280] : memref<30x8x32xf32, #tpu.memory_space<vmem>>, vector<1x8x32xf32>
    %380 = vector.shape_cast %379 : vector<1x8x32xf32> to vector<8x32xf32>
    %381 = arith.truncf %378 : vector<8x32xf32> to vector<8x32xbf16>
    %cst_281 = arith.constant dense<0.000000e+00> : vector<8x32xf32>
    %382 = tpu.matmul %381, %318, %cst_281 {dimension_numbers = #tpu.dot_dimension_numbers<[1], [0], [0], [1], [0, 0, 1, 1], [], []>} : vector<8x32xbf16>, vector<32x32xbf16>, vector<8x32xf32> -> vector<8x32xf32>
    %383 = arith.addf %380, %382 : vector<8x32xf32>
    %cst_282 = arith.constant 0.000000e+00 : f32
    %384 = vector.broadcast %cst_282 : f32 to vector<8x32xf32>
    %385 = arith.maximumf %383, %384 : vector<8x32xf32>
    %c8_283 = arith.constant 8 : index
    %c0_284 = arith.constant 0 : index
    %c0_285 = arith.constant 0 : index
    %386 = vector.load %arg9[%c8_283, %c0_284, %c0_285] : memref<30x8x32xf32, #tpu.memory_space<vmem>>, vector<1x8x32xf32>
    %387 = vector.shape_cast %386 : vector<1x8x32xf32> to vector<8x32xf32>
    %388 = arith.truncf %385 : vector<8x32xf32> to vector<8x32xbf16>
    %cst_286 = arith.constant dense<0.000000e+00> : vector<8x32xf32>
    %389 = tpu.matmul %388, %318, %cst_286 {dimension_numbers = #tpu.dot_dimension_numbers<[1], [0], [0], [1], [0, 0, 1, 1], [], []>} : vector<8x32xbf16>, vector<32x32xbf16>, vector<8x32xf32> -> vector<8x32xf32>
    %390 = arith.addf %387, %389 : vector<8x32xf32>
    %cst_287 = arith.constant 0.000000e+00 : f32
    %391 = vector.broadcast %cst_287 : f32 to vector<8x32xf32>
    %392 = arith.maximumf %390, %391 : vector<8x32xf32>
    %c9_288 = arith.constant 9 : index
    %c0_289 = arith.constant 0 : index
    %c0_290 = arith.constant 0 : index
    %393 = vector.load %arg9[%c9_288, %c0_289, %c0_290] : memref<30x8x32xf32, #tpu.memory_space<vmem>>, vector<1x8x32xf32>
    %394 = vector.shape_cast %393 : vector<1x8x32xf32> to vector<8x32xf32>
    %395 = arith.truncf %392 : vector<8x32xf32> to vector<8x32xbf16>
    %cst_291 = arith.constant dense<0.000000e+00> : vector<8x32xf32>
    %396 = tpu.matmul %395, %318, %cst_291 {dimension_numbers = #tpu.dot_dimension_numbers<[1], [0], [0], [1], [0, 0, 1, 1], [], []>} : vector<8x32xbf16>, vector<32x32xbf16>, vector<8x32xf32> -> vector<8x32xf32>
    %397 = arith.addf %394, %396 : vector<8x32xf32>
    %cst_292 = arith.constant 0.000000e+00 : f32
    %398 = vector.broadcast %cst_292 : f32 to vector<8x32xf32>
    %399 = arith.maximumf %397, %398 : vector<8x32xf32>
    %c10_293 = arith.constant 10 : index
    %c0_294 = arith.constant 0 : index
    %c0_295 = arith.constant 0 : index
    %400 = vector.load %arg9[%c10_293, %c0_294, %c0_295] : memref<30x8x32xf32, #tpu.memory_space<vmem>>, vector<1x8x32xf32>
    %401 = vector.shape_cast %400 : vector<1x8x32xf32> to vector<8x32xf32>
    %402 = arith.truncf %399 : vector<8x32xf32> to vector<8x32xbf16>
    %cst_296 = arith.constant dense<0.000000e+00> : vector<8x32xf32>
    %403 = tpu.matmul %402, %318, %cst_296 {dimension_numbers = #tpu.dot_dimension_numbers<[1], [0], [0], [1], [0, 0, 1, 1], [], []>} : vector<8x32xbf16>, vector<32x32xbf16>, vector<8x32xf32> -> vector<8x32xf32>
    %404 = arith.addf %401, %403 : vector<8x32xf32>
    %cst_297 = arith.constant 0.000000e+00 : f32
    %405 = vector.broadcast %cst_297 : f32 to vector<8x32xf32>
    %406 = arith.maximumf %404, %405 : vector<8x32xf32>
    %c11_298 = arith.constant 11 : index
    %c0_299 = arith.constant 0 : index
    %c0_300 = arith.constant 0 : index
    %407 = vector.load %arg9[%c11_298, %c0_299, %c0_300] : memref<30x8x32xf32, #tpu.memory_space<vmem>>, vector<1x8x32xf32>
    %408 = vector.shape_cast %407 : vector<1x8x32xf32> to vector<8x32xf32>
    %409 = arith.truncf %406 : vector<8x32xf32> to vector<8x32xbf16>
    %cst_301 = arith.constant dense<0.000000e+00> : vector<8x32xf32>
    %410 = tpu.matmul %409, %318, %cst_301 {dimension_numbers = #tpu.dot_dimension_numbers<[1], [0], [0], [1], [0, 0, 1, 1], [], []>} : vector<8x32xbf16>, vector<32x32xbf16>, vector<8x32xf32> -> vector<8x32xf32>
    %411 = arith.addf %408, %410 : vector<8x32xf32>
    %cst_302 = arith.constant 0.000000e+00 : f32
    %412 = vector.broadcast %cst_302 : f32 to vector<8x32xf32>
    %413 = arith.maximumf %411, %412 : vector<8x32xf32>
    %c12_303 = arith.constant 12 : index
    %c0_304 = arith.constant 0 : index
    %c0_305 = arith.constant 0 : index
    %414 = vector.load %arg9[%c12_303, %c0_304, %c0_305] : memref<30x8x32xf32, #tpu.memory_space<vmem>>, vector<1x8x32xf32>
    %415 = vector.shape_cast %414 : vector<1x8x32xf32> to vector<8x32xf32>
    %416 = arith.truncf %413 : vector<8x32xf32> to vector<8x32xbf16>
    %cst_306 = arith.constant dense<0.000000e+00> : vector<8x32xf32>
    %417 = tpu.matmul %416, %318, %cst_306 {dimension_numbers = #tpu.dot_dimension_numbers<[1], [0], [0], [1], [0, 0, 1, 1], [], []>} : vector<8x32xbf16>, vector<32x32xbf16>, vector<8x32xf32> -> vector<8x32xf32>
    %418 = arith.addf %415, %417 : vector<8x32xf32>
    %cst_307 = arith.constant 0.000000e+00 : f32
    %419 = vector.broadcast %cst_307 : f32 to vector<8x32xf32>
    %420 = arith.maximumf %418, %419 : vector<8x32xf32>
    %c13_308 = arith.constant 13 : index
    %c0_309 = arith.constant 0 : index
    %c0_310 = arith.constant 0 : index
    %421 = vector.load %arg9[%c13_308, %c0_309, %c0_310] : memref<30x8x32xf32, #tpu.memory_space<vmem>>, vector<1x8x32xf32>
    %422 = vector.shape_cast %421 : vector<1x8x32xf32> to vector<8x32xf32>
    %423 = arith.truncf %420 : vector<8x32xf32> to vector<8x32xbf16>
    %cst_311 = arith.constant dense<0.000000e+00> : vector<8x32xf32>
    %424 = tpu.matmul %423, %318, %cst_311 {dimension_numbers = #tpu.dot_dimension_numbers<[1], [0], [0], [1], [0, 0, 1, 1], [], []>} : vector<8x32xbf16>, vector<32x32xbf16>, vector<8x32xf32> -> vector<8x32xf32>
    %425 = arith.addf %422, %424 : vector<8x32xf32>
    %cst_312 = arith.constant 0.000000e+00 : f32
    %426 = vector.broadcast %cst_312 : f32 to vector<8x32xf32>
    %427 = arith.maximumf %425, %426 : vector<8x32xf32>
    %c14_313 = arith.constant 14 : index
    %c0_314 = arith.constant 0 : index
    %c0_315 = arith.constant 0 : index
    %428 = vector.load %arg9[%c14_313, %c0_314, %c0_315] : memref<30x8x32xf32, #tpu.memory_space<vmem>>, vector<1x8x32xf32>
    %429 = vector.shape_cast %428 : vector<1x8x32xf32> to vector<8x32xf32>
    %430 = arith.truncf %427 : vector<8x32xf32> to vector<8x32xbf16>
    %cst_316 = arith.constant dense<0.000000e+00> : vector<8x32xf32>
    %431 = tpu.matmul %430, %318, %cst_316 {dimension_numbers = #tpu.dot_dimension_numbers<[1], [0], [0], [1], [0, 0, 1, 1], [], []>} : vector<8x32xbf16>, vector<32x32xbf16>, vector<8x32xf32> -> vector<8x32xf32>
    %432 = arith.addf %429, %431 : vector<8x32xf32>
    %cst_317 = arith.constant 0.000000e+00 : f32
    %433 = vector.broadcast %cst_317 : f32 to vector<8x32xf32>
    %434 = arith.maximumf %432, %433 : vector<8x32xf32>
    %c15_318 = arith.constant 15 : index
    %c0_319 = arith.constant 0 : index
    %c0_320 = arith.constant 0 : index
    %435 = vector.load %arg9[%c15_318, %c0_319, %c0_320] : memref<30x8x32xf32, #tpu.memory_space<vmem>>, vector<1x8x32xf32>
    %436 = vector.shape_cast %435 : vector<1x8x32xf32> to vector<8x32xf32>
    %437 = arith.truncf %434 : vector<8x32xf32> to vector<8x32xbf16>
    %cst_321 = arith.constant dense<0.000000e+00> : vector<8x32xf32>
    %438 = tpu.matmul %437, %318, %cst_321 {dimension_numbers = #tpu.dot_dimension_numbers<[1], [0], [0], [1], [0, 0, 1, 1], [], []>} : vector<8x32xbf16>, vector<32x32xbf16>, vector<8x32xf32> -> vector<8x32xf32>
    %439 = arith.addf %436, %438 : vector<8x32xf32>
    %cst_322 = arith.constant 0.000000e+00 : f32
    %440 = vector.broadcast %cst_322 : f32 to vector<8x32xf32>
    %441 = arith.maximumf %439, %440 : vector<8x32xf32>
    %c16_323 = arith.constant 16 : index
    %c0_324 = arith.constant 0 : index
    %c0_325 = arith.constant 0 : index
    %442 = vector.load %arg9[%c16_323, %c0_324, %c0_325] : memref<30x8x32xf32, #tpu.memory_space<vmem>>, vector<1x8x32xf32>
    %443 = vector.shape_cast %442 : vector<1x8x32xf32> to vector<8x32xf32>
    %444 = arith.truncf %441 : vector<8x32xf32> to vector<8x32xbf16>
    %cst_326 = arith.constant dense<0.000000e+00> : vector<8x32xf32>
    %445 = tpu.matmul %444, %318, %cst_326 {dimension_numbers = #tpu.dot_dimension_numbers<[1], [0], [0], [1], [0, 0, 1, 1], [], []>} : vector<8x32xbf16>, vector<32x32xbf16>, vector<8x32xf32> -> vector<8x32xf32>
    %446 = arith.addf %443, %445 : vector<8x32xf32>
    %cst_327 = arith.constant 0.000000e+00 : f32
    %447 = vector.broadcast %cst_327 : f32 to vector<8x32xf32>
    %448 = arith.maximumf %446, %447 : vector<8x32xf32>
    %c17_328 = arith.constant 17 : index
    %c0_329 = arith.constant 0 : index
    %c0_330 = arith.constant 0 : index
    %449 = vector.load %arg9[%c17_328, %c0_329, %c0_330] : memref<30x8x32xf32, #tpu.memory_space<vmem>>, vector<1x8x32xf32>
    %450 = vector.shape_cast %449 : vector<1x8x32xf32> to vector<8x32xf32>
    %451 = arith.truncf %448 : vector<8x32xf32> to vector<8x32xbf16>
    %cst_331 = arith.constant dense<0.000000e+00> : vector<8x32xf32>
    %452 = tpu.matmul %451, %318, %cst_331 {dimension_numbers = #tpu.dot_dimension_numbers<[1], [0], [0], [1], [0, 0, 1, 1], [], []>} : vector<8x32xbf16>, vector<32x32xbf16>, vector<8x32xf32> -> vector<8x32xf32>
    %453 = arith.addf %450, %452 : vector<8x32xf32>
    %cst_332 = arith.constant 0.000000e+00 : f32
    %454 = vector.broadcast %cst_332 : f32 to vector<8x32xf32>
    %455 = arith.maximumf %453, %454 : vector<8x32xf32>
    %c18_333 = arith.constant 18 : index
    %c0_334 = arith.constant 0 : index
    %c0_335 = arith.constant 0 : index
    %456 = vector.load %arg9[%c18_333, %c0_334, %c0_335] : memref<30x8x32xf32, #tpu.memory_space<vmem>>, vector<1x8x32xf32>
    %457 = vector.shape_cast %456 : vector<1x8x32xf32> to vector<8x32xf32>
    %458 = arith.truncf %455 : vector<8x32xf32> to vector<8x32xbf16>
    %cst_336 = arith.constant dense<0.000000e+00> : vector<8x32xf32>
    %459 = tpu.matmul %458, %318, %cst_336 {dimension_numbers = #tpu.dot_dimension_numbers<[1], [0], [0], [1], [0, 0, 1, 1], [], []>} : vector<8x32xbf16>, vector<32x32xbf16>, vector<8x32xf32> -> vector<8x32xf32>
    %460 = arith.addf %457, %459 : vector<8x32xf32>
    %cst_337 = arith.constant 0.000000e+00 : f32
    %461 = vector.broadcast %cst_337 : f32 to vector<8x32xf32>
    %462 = arith.maximumf %460, %461 : vector<8x32xf32>
    %c19_338 = arith.constant 19 : index
    %c0_339 = arith.constant 0 : index
    %c0_340 = arith.constant 0 : index
    %463 = vector.load %arg9[%c19_338, %c0_339, %c0_340] : memref<30x8x32xf32, #tpu.memory_space<vmem>>, vector<1x8x32xf32>
    %464 = vector.shape_cast %463 : vector<1x8x32xf32> to vector<8x32xf32>
    %465 = arith.truncf %462 : vector<8x32xf32> to vector<8x32xbf16>
    %cst_341 = arith.constant dense<0.000000e+00> : vector<8x32xf32>
    %466 = tpu.matmul %465, %318, %cst_341 {dimension_numbers = #tpu.dot_dimension_numbers<[1], [0], [0], [1], [0, 0, 1, 1], [], []>} : vector<8x32xbf16>, vector<32x32xbf16>, vector<8x32xf32> -> vector<8x32xf32>
    %467 = arith.addf %464, %466 : vector<8x32xf32>
    %cst_342 = arith.constant 0.000000e+00 : f32
    %468 = vector.broadcast %cst_342 : f32 to vector<8x32xf32>
    %469 = arith.maximumf %467, %468 : vector<8x32xf32>
    %c20_343 = arith.constant 20 : index
    %c0_344 = arith.constant 0 : index
    %c0_345 = arith.constant 0 : index
    %470 = vector.load %arg9[%c20_343, %c0_344, %c0_345] : memref<30x8x32xf32, #tpu.memory_space<vmem>>, vector<1x8x32xf32>
    %471 = vector.shape_cast %470 : vector<1x8x32xf32> to vector<8x32xf32>
    %472 = arith.truncf %469 : vector<8x32xf32> to vector<8x32xbf16>
    %cst_346 = arith.constant dense<0.000000e+00> : vector<8x32xf32>
    %473 = tpu.matmul %472, %318, %cst_346 {dimension_numbers = #tpu.dot_dimension_numbers<[1], [0], [0], [1], [0, 0, 1, 1], [], []>} : vector<8x32xbf16>, vector<32x32xbf16>, vector<8x32xf32> -> vector<8x32xf32>
    %474 = arith.addf %471, %473 : vector<8x32xf32>
    %cst_347 = arith.constant 0.000000e+00 : f32
    %475 = vector.broadcast %cst_347 : f32 to vector<8x32xf32>
    %476 = arith.maximumf %474, %475 : vector<8x32xf32>
    %c21_348 = arith.constant 21 : index
    %c0_349 = arith.constant 0 : index
    %c0_350 = arith.constant 0 : index
    %477 = vector.load %arg9[%c21_348, %c0_349, %c0_350] : memref<30x8x32xf32, #tpu.memory_space<vmem>>, vector<1x8x32xf32>
    %478 = vector.shape_cast %477 : vector<1x8x32xf32> to vector<8x32xf32>
    %479 = arith.truncf %476 : vector<8x32xf32> to vector<8x32xbf16>
    %cst_351 = arith.constant dense<0.000000e+00> : vector<8x32xf32>
    %480 = tpu.matmul %479, %318, %cst_351 {dimension_numbers = #tpu.dot_dimension_numbers<[1], [0], [0], [1], [0, 0, 1, 1], [], []>} : vector<8x32xbf16>, vector<32x32xbf16>, vector<8x32xf32> -> vector<8x32xf32>
    %481 = arith.addf %478, %480 : vector<8x32xf32>
    %cst_352 = arith.constant 0.000000e+00 : f32
    %482 = vector.broadcast %cst_352 : f32 to vector<8x32xf32>
    %483 = arith.maximumf %481, %482 : vector<8x32xf32>
    %c22_353 = arith.constant 22 : index
    %c0_354 = arith.constant 0 : index
    %c0_355 = arith.constant 0 : index
    %484 = vector.load %arg9[%c22_353, %c0_354, %c0_355] : memref<30x8x32xf32, #tpu.memory_space<vmem>>, vector<1x8x32xf32>
    %485 = vector.shape_cast %484 : vector<1x8x32xf32> to vector<8x32xf32>
    %486 = arith.truncf %483 : vector<8x32xf32> to vector<8x32xbf16>
    %cst_356 = arith.constant dense<0.000000e+00> : vector<8x32xf32>
    %487 = tpu.matmul %486, %318, %cst_356 {dimension_numbers = #tpu.dot_dimension_numbers<[1], [0], [0], [1], [0, 0, 1, 1], [], []>} : vector<8x32xbf16>, vector<32x32xbf16>, vector<8x32xf32> -> vector<8x32xf32>
    %488 = arith.addf %485, %487 : vector<8x32xf32>
    %cst_357 = arith.constant 0.000000e+00 : f32
    %489 = vector.broadcast %cst_357 : f32 to vector<8x32xf32>
    %490 = arith.maximumf %488, %489 : vector<8x32xf32>
    %c23_358 = arith.constant 23 : index
    %c0_359 = arith.constant 0 : index
    %c0_360 = arith.constant 0 : index
    %491 = vector.load %arg9[%c23_358, %c0_359, %c0_360] : memref<30x8x32xf32, #tpu.memory_space<vmem>>, vector<1x8x32xf32>
    %492 = vector.shape_cast %491 : vector<1x8x32xf32> to vector<8x32xf32>
    %493 = arith.truncf %490 : vector<8x32xf32> to vector<8x32xbf16>
    %cst_361 = arith.constant dense<0.000000e+00> : vector<8x32xf32>
    %494 = tpu.matmul %493, %318, %cst_361 {dimension_numbers = #tpu.dot_dimension_numbers<[1], [0], [0], [1], [0, 0, 1, 1], [], []>} : vector<8x32xbf16>, vector<32x32xbf16>, vector<8x32xf32> -> vector<8x32xf32>
    %495 = arith.addf %492, %494 : vector<8x32xf32>
    %cst_362 = arith.constant 0.000000e+00 : f32
    %496 = vector.broadcast %cst_362 : f32 to vector<8x32xf32>
    %497 = arith.maximumf %495, %496 : vector<8x32xf32>
    %c24_363 = arith.constant 24 : index
    %c0_364 = arith.constant 0 : index
    %c0_365 = arith.constant 0 : index
    %498 = vector.load %arg9[%c24_363, %c0_364, %c0_365] : memref<30x8x32xf32, #tpu.memory_space<vmem>>, vector<1x8x32xf32>
    %499 = vector.shape_cast %498 : vector<1x8x32xf32> to vector<8x32xf32>
    %500 = arith.truncf %497 : vector<8x32xf32> to vector<8x32xbf16>
    %cst_366 = arith.constant dense<0.000000e+00> : vector<8x32xf32>
    %501 = tpu.matmul %500, %318, %cst_366 {dimension_numbers = #tpu.dot_dimension_numbers<[1], [0], [0], [1], [0, 0, 1, 1], [], []>} : vector<8x32xbf16>, vector<32x32xbf16>, vector<8x32xf32> -> vector<8x32xf32>
    %502 = arith.addf %499, %501 : vector<8x32xf32>
    %cst_367 = arith.constant 0.000000e+00 : f32
    %503 = vector.broadcast %cst_367 : f32 to vector<8x32xf32>
    %504 = arith.maximumf %502, %503 : vector<8x32xf32>
    %c25_368 = arith.constant 25 : index
    %c0_369 = arith.constant 0 : index
    %c0_370 = arith.constant 0 : index
    %505 = vector.load %arg9[%c25_368, %c0_369, %c0_370] : memref<30x8x32xf32, #tpu.memory_space<vmem>>, vector<1x8x32xf32>
    %506 = vector.shape_cast %505 : vector<1x8x32xf32> to vector<8x32xf32>
    %507 = arith.truncf %504 : vector<8x32xf32> to vector<8x32xbf16>
    %cst_371 = arith.constant dense<0.000000e+00> : vector<8x32xf32>
    %508 = tpu.matmul %507, %318, %cst_371 {dimension_numbers = #tpu.dot_dimension_numbers<[1], [0], [0], [1], [0, 0, 1, 1], [], []>} : vector<8x32xbf16>, vector<32x32xbf16>, vector<8x32xf32> -> vector<8x32xf32>
    %509 = arith.addf %506, %508 : vector<8x32xf32>
    %cst_372 = arith.constant 0.000000e+00 : f32
    %510 = vector.broadcast %cst_372 : f32 to vector<8x32xf32>
    %511 = arith.maximumf %509, %510 : vector<8x32xf32>
    %c26_373 = arith.constant 26 : index
    %c0_374 = arith.constant 0 : index
    %c0_375 = arith.constant 0 : index
    %512 = vector.load %arg9[%c26_373, %c0_374, %c0_375] : memref<30x8x32xf32, #tpu.memory_space<vmem>>, vector<1x8x32xf32>
    %513 = vector.shape_cast %512 : vector<1x8x32xf32> to vector<8x32xf32>
    %514 = arith.truncf %511 : vector<8x32xf32> to vector<8x32xbf16>
    %cst_376 = arith.constant dense<0.000000e+00> : vector<8x32xf32>
    %515 = tpu.matmul %514, %318, %cst_376 {dimension_numbers = #tpu.dot_dimension_numbers<[1], [0], [0], [1], [0, 0, 1, 1], [], []>} : vector<8x32xbf16>, vector<32x32xbf16>, vector<8x32xf32> -> vector<8x32xf32>
    %516 = arith.addf %513, %515 : vector<8x32xf32>
    %cst_377 = arith.constant 0.000000e+00 : f32
    %517 = vector.broadcast %cst_377 : f32 to vector<8x32xf32>
    %518 = arith.maximumf %516, %517 : vector<8x32xf32>
    %c27_378 = arith.constant 27 : index
    %c0_379 = arith.constant 0 : index
    %c0_380 = arith.constant 0 : index
    %519 = vector.load %arg9[%c27_378, %c0_379, %c0_380] : memref<30x8x32xf32, #tpu.memory_space<vmem>>, vector<1x8x32xf32>
    %520 = vector.shape_cast %519 : vector<1x8x32xf32> to vector<8x32xf32>
    %521 = arith.truncf %518 : vector<8x32xf32> to vector<8x32xbf16>
    %cst_381 = arith.constant dense<0.000000e+00> : vector<8x32xf32>
    %522 = tpu.matmul %521, %318, %cst_381 {dimension_numbers = #tpu.dot_dimension_numbers<[1], [0], [0], [1], [0, 0, 1, 1], [], []>} : vector<8x32xbf16>, vector<32x32xbf16>, vector<8x32xf32> -> vector<8x32xf32>
    %523 = arith.addf %520, %522 : vector<8x32xf32>
    %cst_382 = arith.constant 0.000000e+00 : f32
    %524 = vector.broadcast %cst_382 : f32 to vector<8x32xf32>
    %525 = arith.maximumf %523, %524 : vector<8x32xf32>
    %c28_383 = arith.constant 28 : index
    %c0_384 = arith.constant 0 : index
    %c0_385 = arith.constant 0 : index
    %526 = vector.load %arg9[%c28_383, %c0_384, %c0_385] : memref<30x8x32xf32, #tpu.memory_space<vmem>>, vector<1x8x32xf32>
    %527 = vector.shape_cast %526 : vector<1x8x32xf32> to vector<8x32xf32>
    %528 = arith.truncf %525 : vector<8x32xf32> to vector<8x32xbf16>
    %cst_386 = arith.constant dense<0.000000e+00> : vector<8x32xf32>
    %529 = tpu.matmul %528, %318, %cst_386 {dimension_numbers = #tpu.dot_dimension_numbers<[1], [0], [0], [1], [0, 0, 1, 1], [], []>} : vector<8x32xbf16>, vector<32x32xbf16>, vector<8x32xf32> -> vector<8x32xf32>
    %530 = arith.addf %527, %529 : vector<8x32xf32>
    %cst_387 = arith.constant 0.000000e+00 : f32
    %531 = vector.broadcast %cst_387 : f32 to vector<8x32xf32>
    %532 = arith.maximumf %530, %531 : vector<8x32xf32>
    %c29_388 = arith.constant 29 : index
    %c0_389 = arith.constant 0 : index
    %c0_390 = arith.constant 0 : index
    %533 = vector.load %arg9[%c29_388, %c0_389, %c0_390] : memref<30x8x32xf32, #tpu.memory_space<vmem>>, vector<1x8x32xf32>
    %534 = vector.shape_cast %533 : vector<1x8x32xf32> to vector<8x32xf32>
    %535 = arith.truncf %532 : vector<8x32xf32> to vector<8x32xbf16>
    %cst_391 = arith.constant dense<0.000000e+00> : vector<8x32xf32>
    %536 = tpu.matmul %535, %318, %cst_391 {dimension_numbers = #tpu.dot_dimension_numbers<[1], [0], [0], [1], [0, 0, 1, 1], [], []>} : vector<8x32xbf16>, vector<32x32xbf16>, vector<8x32xf32> -> vector<8x32xf32>
    %537 = arith.addf %534, %536 : vector<8x32xf32>
    %cst_392 = arith.constant 0.000000e+00 : f32
    %538 = vector.broadcast %cst_392 : f32 to vector<8x32xf32>
    %539 = arith.maximumf %537, %538 : vector<8x32xf32>
    %c0_393 = arith.constant 0 : index
    %c0_394 = arith.constant 0 : index
    %540 = vector.load %arg5[%c0_393, %c0_394] : memref<32x2xf32, #tpu.memory_space<vmem>>, vector<32x2xf32>
    %cst_395 = arith.constant dense<0.000000e+00> : vector<8x2xf32>
    %541 = tpu.matmul %539, %540, %cst_395 {dimension_numbers = #tpu.dot_dimension_numbers<[1], [0], [0], [1], [0, 0, 1, 1], [], []>} : vector<8x32xf32>, vector<32x2xf32>, vector<8x2xf32> -> vector<8x2xf32>
    %c0_396 = arith.constant 0 : index
    %c0_397 = arith.constant 0 : index
    %542 = vector.load %arg6[%c0_396, %c0_397] : memref<1x2xf32, #tpu.memory_space<vmem>>, vector<1x2xf32>
    %543 = vector.broadcast %542 : vector<1x2xf32> to vector<8x2xf32>
    %544 = arith.addf %541, %543 : vector<8x2xf32>
    %cst_398 = arith.constant dense<0xFF800000> : vector<8xf32>
    %545 = vector.multi_reduction <maximumf>, %544, %cst_398 [1] : vector<8x2xf32> to vector<8xf32>
    %546 = vector.shape_cast %545 : vector<8xf32> to vector<8x1xf32>
    %547 = vector.broadcast %546 : vector<8x1xf32> to vector<8x2xf32>
    %548 = arith.subf %544, %547 : vector<8x2xf32>
    %549 = math.exp %548 : vector<8x2xf32>
    %cst_399 = arith.constant dense<0.000000e+00> : vector<8xf32>
    %550 = vector.multi_reduction <add>, %549, %cst_399 [1] : vector<8x2xf32> to vector<8xf32>
    %551 = vector.shape_cast %550 : vector<8xf32> to vector<8x1xf32>
    %552 = math.log %551 : vector<8x1xf32>
    %553 = vector.broadcast %552 : vector<8x1xf32> to vector<8x2xf32>
    %554 = arith.subf %548, %553 : vector<8x2xf32>
    %c0_400 = arith.constant 0 : index
    %c0_401 = arith.constant 0 : index
    %555 = vector.load %arg7[%c0_400, %c0_401] : memref<8x2xf32, #tpu.memory_space<vmem>>, vector<8x2xf32>
    tpu.vector_store %arg7[%c0_400, %c0_401], %554 {strides = array<i32>} : memref<8x2xf32, #tpu.memory_space<vmem>>, vector<8x2xf32>,
    return
  }
  func.func @transform_0(%arg0: i32) -> (i32, i32, i32) {
    %c0_i32 = arith.constant 0 : i32
    %c0_i32_0 = arith.constant 0 : i32
    %c0_i32_1 = arith.constant 0 : i32
    return %c0_i32, %arg0, %c0_i32_0 : i32, i32, i32
  }
  func.func @transform_1(%arg0: i32) -> (i32, i32, i32) {
    %c0_i32 = arith.constant 0 : i32
    %c0_i32_0 = arith.constant 0 : i32
    %c0_i32_1 = arith.constant 0 : i32
    %c0_i32_2 = arith.constant 0 : i32
    return %c0_i32, %c0_i32_0, %c0_i32_1 : i32, i32, i32
  }
  func.func @transform_2(%arg0: i32) -> (i32, i32, i32) {
    %c0_i32 = arith.constant 0 : i32
    %c0_i32_0 = arith.constant 0 : i32
    %c0_i32_1 = arith.constant 0 : i32
    %c0_i32_2 = arith.constant 0 : i32
    return %c0_i32, %c0_i32_0, %c0_i32_1 : i32, i32, i32
  }
  func.func @transform_3(%arg0: i32) -> (i32, i32, i32) {
    %c0_i32 = arith.constant 0 : i32
    %c0_i32_0 = arith.constant 0 : i32
    %c0_i32_1 = arith.constant 0 : i32
    %c0_i32_2 = arith.constant 0 : i32
    return %c0_i32, %c0_i32_0, %c0_i32_1 : i32, i32, i32
  }
  func.func @transform_4(%arg0: i32) -> (i32, i32) {
    %c0_i32 = arith.constant 0 : i32
    %c0_i32_0 = arith.constant 0 : i32
    %c0_i32_1 = arith.constant 0 : i32
    return %c0_i32, %c0_i32_0 : i32, i32
  }
  func.func @transform_5(%arg0: i32) -> (i32, i32) {
    %c0_i32 = arith.constant 0 : i32
    %c0_i32_0 = arith.constant 0 : i32
    %c0_i32_1 = arith.constant 0 : i32
    return %c0_i32, %c0_i32_0 : i32, i32
  }
  func.func @transform_6(%arg0: i32) -> (i32, i32) {
    %c0_i32 = arith.constant 0 : i32
    %c0_i32_0 = arith.constant 0 : i32
    return %arg0, %c0_i32 : i32, i32
  }
}

</mosaic_0001>

<bundles_post_ra>
// kernel: tpu_custom_call.1
= control target key start
LH: loop header
LB: loop body
LE: loop exit
PB: predicated region body
PF: predicated region fallthrough
CT: control target
= control target key end

     0   :  { %11 = vsyncpa [#allocation5], 0  ;;  %s6062_s0 = inlined_call_operand.hbm [shape: f32[30,16,32], index: 0, kind: input, shape index: {}]   ;;  %s6063_s1 = inlined_call_operand.vmem [shape: bf16[2,32,32], index: 1, kind: input, shape index: {}]   ;;  %s6064_s2 = inlined_call_operand.hbm [shape: bf16[2,32,32], index: 2, kind: input, shape index: {}]   ;;  %s6065_s3 = inlined_call_operand.vmem [shape: f32[2,1,32], index: 3, kind: input, shape index: {}]   ;;  %s6066_s4 = inlined_call_operand.vmem [shape: f32[32,2], index: 4, kind: input, shape index: {}]   ;;  %s6067_s5 = inlined_call_operand.vmem [shape: f32[1,2], index: 5, kind: input, shape index: {}]   ;;  %s6068_s6 = inlined_call_operand.vmem [shape: f32[16,2], index: 6, kind: output, shape index: {}]  }
   0x1   :  { %13 = vsyncpa [#allocation5 + $0x1], 0 }
   0x2   :  { %14 = vsyncpa [#allocation7], 0  ;;  %s5169_s21 = smov 0   ;;  %s5171_s22 = smov 0  }
   0x3   :  { %s5173_s23 = smov 0   ;;  %s5175_s24 = smov 0  }
   0x4 LB: > { %s5188_s25 = sadd.s32 4294967295, %s5121_s24   ;;  %s5191_s26 = sadd.s32 1, %s5121_s24   ;;  %s5121_s24 = sphi %s5175_s24, %s6086_s24   ;;  %s5117_s23 = sphi %s5173_s23, %s6085_s23   ;;  %s5113_s22 = sphi %s5171_s22, %s6084_s22   ;;  %s5109_s21 = sphi %s5169_s21, %s6083_s21  }
   0x5   : > { %s24_s27 = ssub.s32 %s5121_s24, %s5191_s26  ;;  %s27_s28 = sadd.s32 1, %s5117_s23 }
   0x6   : > { %p25_p0 = scmp.eq.s32.totalorder %s24_s27, 0  ;;  %p34_p1 = scmp.ne.s32.totalorder %s5117_s23, %s5113_s22 }
   0x7   : > { %p35_p2 = scmp.eq.s32.totalorder %s5121_s24, 0  ;;  %p40_p3 = scmp.ne.s32.totalorder %s5113_s22, %s5109_s21 }
   0x8   : > { %s5201_s29 = scalar_select %p25_p0, %s5117_s23, %s27_s28  }
   0x9   : > { %p5203_p4 = por %p35_p2, %p34_p1  ;;  %p6069_p5 = scmp.eq.s32.totalorder %s5188_s25, 0 }
   0xa   : > { %p3990_p6 = scmp.ge.s32.totalorder %s5121_s24, 1  ;;  %p182_p7 = scmp.lt.s32.totalorder %s5121_s24, 3 }
   0xb   : > { %p5212_p8 = por %p6069_p5, %p40_p3  ;;  %s5123_s9 = smov [#allocation6]  }
   0xc   : > { %p5216_p9 = pnand %p3990_p6, %p182_p7  ;;  %s197_s10 = sshll.u32 %s5123_s9, 4  ;;  %s198_s10 = int_to_ptr.vmem [resolvable:$true] %s197_s10 }
   0xd   : > { %s6074_s7 = scalar_select %p5212_p8, 1, 0 }
   0xe   : > { %s6075_s8 = scalar_select %p5216_p9, 1, 0 }
   0xf   : > { %p4956_p10 = pneg %p5216_p9  ;;  %p4965_p12 = scmp.lt.s32.totalorder %s5121_s24, 2 }
  0x10   : > { %s220_s12 = sand.u32 1, %s5117_s23   ;;  %s3993_s13 = sshll.u32 %s5121_s24, 7 }
  0x11   : > { %p5224_p11 = pnand %p4956_p10, %p6069_p5  ;;  %p5233_p13 = pnand %p4965_p12, %p5203_p4 }
  0x12   : > { %s5025_s17 = scalar_lea.hbm %s6064_s2, 512 }
  0x13   : > { %s6077_s14 = scalar_select %p5233_p13, 1, 0 }
  0x14   : > { %p5026_p0 = scmp.ne.s32.totalorder %s6064_s2, %s5025_s17  ;;  %p5027_p1 = pneg %p5224_p11 }
  0x15   : > { %p5032_p6 = scmp.lt.u32.totalorder %s5025_s17, %s6064_s2 }
  0x16   : > { %p5028_p2 = pnand %p5027_p1, %p5026_p0 }
  0x18   : > { %p5029_p3 = pneg %p5028_p2 }
  0x1a   : > { %p5034_p4 = pnand %p5032_p6, %p5029_p3 }
  0x1c   : > { %5037 = shalt.err (!%p5034_p4)
}
  0x1d   : > { %s5038_s24 = scalar_lea.vmem %s198_s10, 512  ;;  %p5046_p5 = scmp.lt.s32.totalorder %s198_s10, %s198_s10 }
  0x1e   : > { %p5039_p7 = scmp.ne.s32.totalorder %s198_s10, %s5038_s24  ;;  %p5047_p8 = scmp.lt.s32.totalorder %s5038_s24, %s5038_s24 }
  0x20   : > { %p5041_p10 = pnand %p5039_p7, %p5027_p1  ;;  %p5048_p9 = por %p5047_p8, %p5046_p5 }
  0x22   : > { %p5042_p12 = pneg %p5041_p10 }
  0x24   : > { %p5049_p13 = pnand %p5048_p9, %p5042_p12 }
  0x26   : > { %5052 = shalt.err (!%p5049_p13)
}
  0x27   : > { %s5124_s27 = smov 64   ;;  %s5125_s28 = smov 4  }
  0x28   : > { %4959 = dma.hbm_to_vmem [thread:$0]  (!%p5224_p11), %s6064_s2, 512, %s198_s10, [#allocation7], %s5124_s27, %s5124_s27, %s5125_s28  }
  0x29   : > { %s4948_s15 = smul.u32 240, %s220_s12  ;;  %s5256_s18 = scalar_lea.hbm %s6062_s0, %s3993_s13 }
  0x2a   : > { %s5260_s21 = scalar_lea.sflag [#allocation5], %s220_s12  ;;  %s5053_s11 = scalar_lea.hbm %s5256_s18, 3840 }
  0x2b   : > { %s224_s19 = scalar_lea.vmem [#allocation4], %s4948_s15  ;;  %p5054_p5 = scmp.ne.s32.totalorder %s5256_s18, %s5053_s11 }
  0x2c   : > { %s230_s20 = sshll.u32 %s224_s19, 4  ;;  %p6078_p8 = scmp.ne.s32.totalorder %s6077_s14, 0  ;;  %s5258_s20 = int_to_ptr.vmem [resolvable:$true] %s230_s20 }
  0x2d   : > { %s5058_s24 = scalar_lea.hbm %s6062_s0, 7680  ;;  %p5059_p0 = scmp.lt.u32.totalorder %s5256_s18, %s6062_s0 }
  0x2e   : > { %p5055_p9 = pneg %p6078_p8  ;;  %p5060_p1 = scmp.lt.u32.totalorder %s5058_s24, %s5053_s11 }
  0x2f   : > { %p5062_p3 = scmp.lt.u32.totalorder %s5053_s11, %s5256_s18 }
  0x30   : > { %p5056_p11 = pnand %p5055_p9, %p5054_p5  ;;  %p5061_p2 = por %p5060_p1, %p5059_p0 }
  0x32   : > { %p5057_p13 = pneg %p5056_p11  ;;  %p5063_p6 = por %p5062_p3, %p5061_p2 }
  0x34   : > { %p5064_p4 = pnand %p5063_p6, %p5057_p13 }
  0x36   : > { %5067 = shalt.err (!%p5064_p4)
}
  0x37   : > { %s5068_s12 = scalar_lea.vmem %s5258_s20, 3840  ;;  %s5126_s30 = smov [#allocation4]  }
  0x38   : > { %p5069_p7 = scmp.ne.s32.totalorder %s5258_s20, %s5068_s12  ;;  %s5073_s9 = sshll.u32 %s5126_s30, 4  ;;  %s5074_s9 = int_to_ptr.vmem [resolvable:$false] %s5073_s9 }
  0x39   : > { %s5075_s15 = scalar_lea.vmem %s5074_s9, 7680  ;;  %p5076_p5 = scmp.lt.s32.totalorder %s5258_s20, %s5074_s9 }
  0x3a   : > { %p5071_p10 = pnand %p5069_p7, %p5055_p9  ;;  %p5077_p11 = scmp.lt.s32.totalorder %s5075_s15, %s5068_s12 }
  0x3c   : > { %p5072_p12 = pneg %p5071_p10  ;;  %p5078_p0 = por %p5077_p11, %p5076_p5 }
  0x3e   : > { %p5079_p1 = pnand %p5078_p0, %p5072_p12 }
  0x40   : > { %5082 = shalt.err (!%p5079_p1)
}
  0x41   : > { %s5127_s16 = smov 256   ;;  %s5128_s17 = smov 128  }
  0x42   : > { %s5129_s19 = smov 8   ;;  %p6079_p9 = scmp.ne.s32.totalorder %s6075_s8, 0 }
  0x43   : > { %4963 = dma.hbm_to_vmem [thread:$0]  (!%p6078_p8), %s5256_s18, 3840, %s5258_s20, %s5260_s21, %s5127_s16, %s5128_s17, %s5129_s19  }
  0x44   : > { %242 = sbr.rel (%p6079_p9) target bundleno = 13498 (0x34ba), region = 44  ;;  %s244_s11 = sand.u32 (!%p6079_p9), 1, %s5113_s22  }
  0x45   : > { %s4949_s10 = smul.u32 (!%p6079_p9), 240, %s244_s11  ;;  %s245_s13 = scalar_lea.sflag (!%p6079_p9), [#allocation5], %s244_s11 }
  0x46   : > { %p6080_p13 = scmp.ne.s32.totalorder (!%p6079_p9), %s6074_s7, 0 }
  0x47   : > { %s5291_s24 = scalar_lea.vmem (!%p6079_p9), [#allocation4], %s4949_s10 }
  0x4b   : > { %5100 = dma.done.wait (%p6080_p13), %s245_s13, 3840  }
  0x4c   : > { %5102 = vsyncadd (%p6080_p13), %s245_s13, 4294963456  ;;  %p6081_p2 = scmp.eq.s32.totalorder %s5188_s25, 0 }
  0x4e   : > { %5104 = dma.done.wait (%p6081_p2), [#allocation7], 512   ;;  %p6082_p8 = pmov %p6081_p2 }
  0x4f   : > { %v5130_v0 = vmov 0.0   ;;  %vm5131_vm0 = vmmov 0   ;;  %v5009_v1 = vld [vmem:[%s6063_s1] sm:$0xff]   ;;  %v5010_v2 = vld [vmem:[%s6063_s1 + $0x8] sm:$0xff]   ;;  %vm357_vm1 = vcmask 261120   ;;  %v5132_v8 = vmov 0  }
  0x50   : > { %5106 = vsyncadd (%p6082_p8), [#allocation7], 4294966784  ;;  %4323 = vmatprep.subr.bf16.mxu0 %v5130_v0  ;;  %4327 = vmatprep.mubr.msk.bf16.mxu0 %vm5131_vm0, %v5130_v0  ;;  %v294_v3 = vld [vmem:[%s5291_s24] sm:$0xff]  ;;  %v295_v4 = vld [vmem:[%s5291_s24 + $0x8] sm:$0xff]  ;;  %vm3900_vm2 = vcmask 15360   ;;  %p280_p3 = scmp.lt.s32.totalorder %s5188_s25, 1 }
  0x51   : > { %4387 = vmatprep.subr.bf16.mxu1 %v5130_v0  ;;  %4391 = vmatprep.mubr.msk.bf16.mxu1 %vm5131_vm0, %v5130_v0  ;;  %v5316_v5 = vld [vmem:[#allocation6] sm:$0xff]   ;;  %v5318_v6 = vld [vmem:[#allocation6 + $0x8] sm:$0xff]   ;;  %v324_v7 = vpack.c.bf16 %v295_v4, %v294_v3 }
  0x52   : > { %4324 = vmatpush3.bf16.msra.mxu0 %v5009_v1  ;;  %4388 = vmatpush3.bf16.msra.mxu1 %v5316_v5  ;;  %v296_v9 = vld [vmem:[%s5291_s24 + $0x10] sm:$0xff]  ;;  %v297_v10 = vld [vmem:[%s5291_s24 + $0x18] sm:$0xff]  ;;  %v298_v41 = vld [vmem:[%s5291_s24 + $0x20] sm:$0xff]  ;;  %s6088_s25 = smov (!%p280_p3, %s5188_s25), 1 }
  0x53   : > { %4325 = vmatprep.subr.bf16.mxu0 %v5130_v0  ;;  %4389 = vmatprep.subr.bf16.mxu1 %v5130_v0  ;;  %v325_v11 = vpack.c.bf16 %v297_v10, %v296_v9  ;;  %v5347_v12 = vld [vmem:[%s6065_s3] ss:$0 sm:$0xff]  ;;  %v299_v42 = vld [vmem:[%s5291_s24 + $0x28] sm:$0xff]  ;;  %v301_v4 = vld [vmem:[%s5291_s24 + $0x38] sm:$0xff]  ;;  %s3996_s18 = sshll.u32 %s6088_s25, 3 }
  0x54   : > { %v326_v43 = vpack.c.bf16 %v299_v42, %v298_v41  ;;  %v300_v3 = vld [vmem:[%s5291_s24 + $0x30] sm:$0xff]  ;;  %s283_s27 = scalar_lea.vmem %s6068_s6, %s3996_s18 }
  0x56   : > { %4326 = vmatpush3.bf16.msra.mxu0 %v5010_v2  ;;  %4390 = vmatpush3.bf16.msra.mxu1 %v5318_v6 }
  0x57   : > { %4507 = vmatprep.subr.bf16.mxu0 %v5130_v0  ;;  %4395 = vmatprep.subr.bf16.mxu1 %v5130_v0 }
  0x59   : > { %4328 = vmatmul.mubr.msk.bf16.vlgmr.msra.gmra.mrb[0].mxu0 %vm357_vm1, %v324_v7  ;;  %4392 = vmatmul.mubr.bf16.vlgmr.msra.gmra.mrb[0].mxu1 %v5132_v8  ;;  %v327_v7 = vpack.c.bf16 %v301_v4, %v300_v3 }
  0x5a   : > { %4331 = vmatprep.mubr.msk.bf16.mxu0 %vm5131_vm0, %v5130_v0  ;;  %4508 = vmatpush3.bf16.msra.mxu0 %v5316_v5 }
  0x5b   : > { %4509 = vmatprep.subr.bf16.mxu0 %v5130_v0  ;;  %4396 = vmatpush3.bf16.msra.mxu1 %v5316_v5 }
  0x5c   : > { %4399 = vmatprep.mubr.msk.bf16.mxu1 %vm5131_vm0, %v5130_v0  ;;  %4397 = vmatprep.subr.bf16.mxu1 %v5130_v0 }
  0x5e   : > { %4510 = vmatpush3.bf16.msra.mxu0 %v5318_v6 }
  0x5f   : > { %4523 = vmatprep.subr.bf16.mxu0 %v5130_v0  ;;  %4398 = vmatpush3.bf16.msra.mxu1 %v5318_v6 }
  0x60   : > { %4403 = vmatprep.subr.bf16.mxu1 %v5130_v0 }
  0x61   : > { %4332 = vmatmul.mubr.msk.bf16.gmra.mrb[4].mxu0 %vm357_vm1, %v325_v11 }
  0x62   : > { %4335 = vmatprep.mubr.msk.bf16.mxu0 %vm5131_vm0, %v5130_v0 }
  0x69   : > { %4336 = vmatmul.mubr.msk.bf16.gmra.mrb[8].mxu0 %vm357_vm1, %v326_v43 }
  0x6a   : > { %4339 = vmatprep.mubr.msk.bf16.mxu0 %vm5131_vm0, %v5130_v0 }
  0x71   : > { %4340 = vmatmul.mubr.msk.bf16.gmra.mrb[12].mxu0 %vm357_vm1, %v327_v7 }
  0x72   : > { %4343 = vmatprep.mubr.msk.bf16.mxu0 %vm5131_vm0, %v5130_v0 }
 0x12c   : > { %v437_v13 = vpop.f32.mrb[0].mxu0  ;;  %v636_v19 = vpop.f32.mrb[0].mxu1 }
 0x12d   : > { %v438_v14 = vadd.f32 %v5347_v12, %v437_v13  ;;  %v4329_v15 = vpop.f32.mrb[1].mxu0  ;;  %v4393_v20 = vpop.f32.mrb[1].mxu1 }
 0x12e   : > { %v440_v16 = vpop.f32.mrb[2].mxu0  ;;  %v639_v21 = vpop.f32.mrb[2].mxu1 }
 0x12f   : > { %556 = vst.msk [vmem:[#allocation3] sm:$0xff] %vm357_vm1, %v438_v14  ;;  %v441_v17 = vadd.f32 %v5347_v12, %v440_v16  ;;  %v4330_v18 = vpop.f32.mrb[3].mxu0  ;;  %v4394_v22 = vpop.f32.mrb[3].mxu1 }
 0x131   : > { %557 = vst.msk [vmem:[#allocation3 + $0x8] sm:$0xff] %vm357_vm1, %v441_v17 }
 0x134   : > { %v445_v27 = vpop.f32.mrb[4].mxu0 }
 0x135   : > { %v446_v28 = vadd.f32 %v5347_v12, %v445_v27  ;;  %v4333_v29 = vpop.f32.mrb[5].mxu0 }
 0x136   : > { %v586_v23 = vld [vmem:[#allocation3] sm:$0xff]  ;;  %v448_v30 = vpop.f32.mrb[6].mxu0 }
 0x137   : > { %v642_v24 = vadd.f32 %v636_v19, %v586_v23  ;;  %558 = vst.msk [vmem:[#allocation3 + $0x10] sm:$0xff] %vm357_vm1, %v446_v28  ;;  %v449_v31 = vadd.f32 %v5347_v12, %v448_v30  ;;  %v4334_v32 = vpop.f32.mrb[7].mxu0 }
 0x138   : > { %v646_v33 = vld [vmem:[#allocation3 + $0x8] sm:$0xff]  ;;  %v302_v32 = vld [vmem:[%s5291_s24 + $0x40] sm:$0xff] }
 0x139   : > { %v643_v25 = vmax.f32 %v642_v24, 0.0  ;;  %559 = vst.msk [vmem:[#allocation3 + $0x18] sm:$0xff] %vm357_vm1, %v449_v31 }
 0x13b   : > { %644 = vst.msk [vmem:[#allocation2] sm:$0xff] %vm357_vm1, %v643_v25  ;;  %v647_v26 = vpack.c.bf16 %v643_v25, %v643_v25 }
 0x13c   : > { %v453_v52 = vpop.f32.mrb[8].mxu0 }
 0x13d   : > { %4400 = vmatmul.mubr.msk.bf16.vlgmr.msra.gmra.mrb[4].mxu1 %vm357_vm1, %v647_v26  ;;  %v454_v53 = vadd.f32 %v5347_v12, %v453_v52  ;;  %v4337_v54 = vpop.f32.mrb[9].mxu0 }
 0x13e   : > { %4404 = vmatpush3.bf16.msra.mxu1 %v5316_v5  ;;  %4407 = vmatprep.mubr.msk.bf16.mxu1 %vm5131_vm0, %v5130_v0  ;;  %v696_v44 = vld [vmem:[#allocation3 + $0x10] sm:$0xff]  ;;  %v456_v55 = vpop.f32.mrb[10].mxu0 }
 0x13f   : > { %4405 = vmatprep.subr.bf16.mxu1 %v5130_v0  ;;  %560 = vst.msk [vmem:[#allocation3 + $0x20] sm:$0xff] %vm357_vm1, %v454_v53  ;;  %v457_v56 = vadd.f32 %v5347_v12, %v456_v55  ;;  %v4338_v57 = vpop.f32.mrb[11].mxu0 }
 0x140   : > { %v746_v58 = vld [vmem:[#allocation3 + $0x18] sm:$0xff]  ;;  %v304_v57 = vld [vmem:[%s5291_s24 + $0x50] sm:$0xff] }
 0x141   : > { %561 = vst.msk [vmem:[#allocation3 + $0x28] sm:$0xff] %vm357_vm1, %v457_v56 }
 0x142   : > { %4406 = vmatpush3.bf16.msra.mxu1 %v5318_v6 }
 0x143   : > { %4411 = vmatprep.subr.bf16.mxu1 %v5130_v0 }
 0x144   : > { %v461_v18 = vpop.f32.mrb[12].mxu0 }
 0x145   : > { %v462_v19 = vadd.f32 %v5347_v12, %v461_v18  ;;  %v4341_v20 = vpop.f32.mrb[13].mxu0 }
 0x146   : > { %v796_v9 = vld [vmem:[#allocation3 + $0x20] sm:$0xff]  ;;  %v464_v21 = vpop.f32.mrb[14].mxu0 }
 0x147   : > { %562 = vst.msk [vmem:[#allocation3 + $0x30] sm:$0xff] %vm357_vm1, %v462_v19  ;;  %v465_v22 = vadd.f32 %v5347_v12, %v464_v21  ;;  %v4342_v23 = vpop.f32.mrb[15].mxu0 }
 0x148   : > { %v846_v24 = vld [vmem:[#allocation3 + $0x28] sm:$0xff]  ;;  %v306_v23 = vld [vmem:[%s5291_s24 + $0x60] sm:$0xff] }
 0x149   : > { %563 = vst.msk [vmem:[#allocation3 + $0x38] sm:$0xff] %vm357_vm1, %v465_v22 }
 0x210   : > { %v685_v34 = vpop.f32.mrb[4].mxu1 }
 0x211   : > { %v691_v35 = vadd.f32 %v685_v34, %v646_v33  ;;  %v4401_v36 = vpop.f32.mrb[5].mxu1  ;;  %v303_v33 = vld [vmem:[%s5291_s24 + $0x48] sm:$0xff] }
 0x212   : > { %v688_v37 = vpop.f32.mrb[6].mxu1  ;;  %v328_v34 = vpack.c.bf16 %v303_v33, %v302_v32 }
 0x213   : > { %v692_v38 = vmax.f32 %v691_v35, 0.0  ;;  %v4402_v39 = vpop.f32.mrb[7].mxu1  ;;  %v896_v35 = vld [vmem:[#allocation3 + $0x30] sm:$0xff] }
 0x214   : > { %4344 = vmatmul.mubr.msk.bf16.gmra.mrb[16].mxu0 %vm357_vm1, %v328_v34 }
 0x215   : > { %694 = vst.msk [vmem:[#allocation2 + $0x8] sm:$0xff] %vm357_vm1, %v692_v38  ;;  %v697_v40 = vpack.c.bf16 %v692_v38, %v692_v38  ;;  %4347 = vmatprep.mubr.msk.bf16.mxu0 %vm5131_vm0, %v5130_v0 }
 0x217   : > { %4408 = vmatmul.mubr.msk.bf16.vlgmr.msra.gmra.mrb[8].mxu1 %vm357_vm1, %v697_v40 }
 0x218   : > { %4412 = vmatpush3.bf16.msra.mxu1 %v5316_v5  ;;  %4415 = vmatprep.mubr.msk.bf16.mxu1 %vm5131_vm0, %v5130_v0 }
 0x219   : > { %4413 = vmatprep.subr.bf16.mxu1 %v5130_v0 }
 0x21c   : > { %4414 = vmatpush3.bf16.msra.mxu1 %v5318_v6 }
 0x21d   : > { %4419 = vmatprep.subr.bf16.mxu1 %v5130_v0 }
 0x2e7   : > { %v469_v43 = vpop.f32.mrb[16].mxu0 }
 0x2ea   : > { %v735_v45 = vpop.f32.mrb[8].mxu1 }
 0x2eb   : > { %v741_v46 = vadd.f32 %v735_v45, %v696_v44  ;;  %v4409_v47 = vpop.f32.mrb[9].mxu1  ;;  %v470_v44 = vadd.f32 %v5347_v12, %v469_v43  ;;  %v4345_v45 = vpop.f32.mrb[17].mxu0 }
 0x2ec   : > { %v738_v48 = vpop.f32.mrb[10].mxu1 }
 0x2ed   : > { %v742_v49 = vmax.f32 %v741_v46, 0.0  ;;  %v4410_v50 = vpop.f32.mrb[11].mxu1  ;;  %v472_v46 = vpop.f32.mrb[18].mxu0  ;;  %564 = vst.msk [vmem:[#allocation3 + $0x40] sm:$0xff] %vm357_vm1, %v470_v44 }
 0x2ee   : > { %v473_v47 = vadd.f32 %v5347_v12, %v472_v46  ;;  %v4346_v48 = vpop.f32.mrb[19].mxu0 }
 0x2ef   : > { %744 = vst.msk [vmem:[#allocation2 + $0x10] sm:$0xff] %vm357_vm1, %v742_v49  ;;  %v747_v51 = vpack.c.bf16 %v742_v49, %v742_v49  ;;  %v946_v49 = vld [vmem:[#allocation3 + $0x38] sm:$0xff]  ;;  %v308_v48 = vld [vmem:[%s5291_s24 + $0x70] sm:$0xff] }
 0x2f0   : > { %565 = vst.msk [vmem:[#allocation3 + $0x48] sm:$0xff] %vm357_vm1, %v473_v47 }
 0x2f1   : > { %4416 = vmatmul.mubr.msk.bf16.vlgmr.msra.gmra.mrb[12].mxu1 %vm357_vm1, %v747_v51 }
 0x2f2   : > { %4420 = vmatpush3.bf16.msra.mxu1 %v5316_v5  ;;  %4423 = vmatprep.mubr.msk.bf16.mxu1 %vm5131_vm0, %v5130_v0 }
 0x2f3   : > { %4421 = vmatprep.subr.bf16.mxu1 %v5130_v0 }
 0x2f6   : > { %4422 = vmatpush3.bf16.msra.mxu1 %v5318_v6 }
 0x2f7   : > { %4427 = vmatprep.subr.bf16.mxu1 %v5130_v0 }
 0x3c4   : > { %v785_v59 = vpop.f32.mrb[12].mxu1 }
 0x3c5   : > { %v791_v60 = vadd.f32 %v785_v59, %v746_v58  ;;  %v4417_v61 = vpop.f32.mrb[13].mxu1  ;;  %v305_v58 = vld [vmem:[%s5291_s24 + $0x58] sm:$0xff] }
 0x3c6   : > { %v788_v62 = vpop.f32.mrb[14].mxu1  ;;  %v329_v59 = vpack.c.bf16 %v305_v58, %v304_v57 }
 0x3c7   : > { %v792_v63 = vmax.f32 %v791_v60, 0.0  ;;  %v4418_v1 = vpop.f32.mrb[15].mxu1  ;;  %v996_v60 = vld [vmem:[#allocation3 + $0x40] sm:$0xff] }
 0x3c8   : > { %4348 = vmatmul.mubr.msk.bf16.gmra.mrb[20].mxu0 %vm357_vm1, %v329_v59  ;;  %v310_v59 = vld [vmem:[%s5291_s24 + $0x80] sm:$0xff] }
 0x3c9   : > { %794 = vst.msk [vmem:[#allocation2 + $0x18] sm:$0xff] %vm357_vm1, %v792_v63  ;;  %v797_v2 = vpack.c.bf16 %v792_v63, %v792_v63  ;;  %4351 = vmatprep.mubr.msk.bf16.mxu0 %vm5131_vm0, %v5130_v0 }
 0x3cb   : > { %4424 = vmatmul.mubr.msk.bf16.vlgmr.msra.gmra.mrb[16].mxu1 %vm357_vm1, %v797_v2 }
 0x3cc   : > { %4428 = vmatpush3.bf16.msra.mxu1 %v5316_v5  ;;  %4431 = vmatprep.mubr.msk.bf16.mxu1 %vm5131_vm0, %v5130_v0 }
 0x3cd   : > { %4429 = vmatprep.subr.bf16.mxu1 %v5130_v0 }
 0x3d0   : > { %4430 = vmatpush3.bf16.msra.mxu1 %v5318_v6 }
 0x3d1   : > { %4435 = vmatprep.subr.bf16.mxu1 %v5130_v0 }
 0x49b   : > { %v477_v7 = vpop.f32.mrb[20].mxu0 }
 0x49e   : > { %v835_v10 = vpop.f32.mrb[16].mxu1 }
 0x49f   : > { %v841_v11 = vadd.f32 %v835_v10, %v796_v9  ;;  %v4425_v13 = vpop.f32.mrb[17].mxu1  ;;  %v478_v9 = vadd.f32 %v5347_v12, %v477_v7  ;;  %v4349_v10 = vpop.f32.mrb[21].mxu0  ;;  %v312_v7 = vld [vmem:[%s5291_s24 + $0x90] sm:$0xff] }
 0x4a0   : > { %v838_v14 = vpop.f32.mrb[18].mxu1 }
 0x4a1   : > { %v842_v15 = vmax.f32 %v841_v11, 0.0  ;;  %v4426_v16 = vpop.f32.mrb[19].mxu1  ;;  %v480_v11 = vpop.f32.mrb[22].mxu0  ;;  %566 = vst.msk [vmem:[#allocation3 + $0x50] sm:$0xff] %vm357_vm1, %v478_v9  ;;  %v313_v9 = vld [vmem:[%s5291_s24 + $0x98] sm:$0xff] }
 0x4a2   : > { %v481_v13 = vadd.f32 %v5347_v12, %v480_v11  ;;  %v4350_v14 = vpop.f32.mrb[23].mxu0  ;;  %v333_v10 = vpack.c.bf16 %v313_v9, %v312_v7  ;;  %v314_v11 = vld [vmem:[%s5291_s24 + $0xa0] sm:$0xff] }
 0x4a3   : > { %844 = vst.msk [vmem:[#allocation2 + $0x20] sm:$0xff] %vm357_vm1, %v842_v15  ;;  %v847_v17 = vpack.c.bf16 %v842_v15, %v842_v15  ;;  %v1046_v15 = vld [vmem:[#allocation3 + $0x48] sm:$0xff] }
 0x4a4   : > { %567 = vst.msk [vmem:[#allocation3 + $0x58] sm:$0xff] %vm357_vm1, %v481_v13  ;;  %v315_v13 = vld [vmem:[%s5291_s24 + $0xa8] sm:$0xff] }
 0x4a5   : > { %4432 = vmatmul.mubr.msk.bf16.vlgmr.msra.gmra.mrb[20].mxu1 %vm357_vm1, %v847_v17  ;;  %v334_v14 = vpack.c.bf16 %v315_v13, %v314_v11 }
 0x4a6   : > { %4436 = vmatpush3.bf16.msra.mxu1 %v5316_v5  ;;  %4439 = vmatprep.mubr.msk.bf16.mxu1 %vm5131_vm0, %v5130_v0 }
 0x4a7   : > { %4437 = vmatprep.subr.bf16.mxu1 %v5130_v0 }
 0x4aa   : > { %4438 = vmatpush3.bf16.msra.mxu1 %v5318_v6 }
 0x4ab   : > { %4443 = vmatprep.subr.bf16.mxu1 %v5130_v0 }
 0x578   : > { %v885_v25 = vpop.f32.mrb[20].mxu1 }
 0x579   : > { %v891_v26 = vadd.f32 %v885_v25, %v846_v24  ;;  %v4433_v27 = vpop.f32.mrb[21].mxu1  ;;  %v307_v24 = vld [vmem:[%s5291_s24 + $0x68] sm:$0xff] }
 0x57a   : > { %v888_v28 = vpop.f32.mrb[22].mxu1  ;;  %v330_v25 = vpack.c.bf16 %v307_v24, %v306_v23  ;;  %v322_v24 = vld [vmem:[%s5291_s24 + $0xe0] sm:$0xff] }
 0x57b   : > { %v892_v29 = vmax.f32 %v891_v26, 0.0  ;;  %v4434_v30 = vpop.f32.mrb[23].mxu1  ;;  %v1096_v26 = vld [vmem:[#allocation3 + $0x50] sm:$0xff] }
 0x57c   : > { %4352 = vmatmul.mubr.msk.bf16.gmra.mrb[24].mxu0 %vm357_vm1, %v330_v25  ;;  %v323_v25 = vld [vmem:[%s5291_s24 + $0xe8] sm:$0xff] }
 0x57d   : > { %894 = vst.msk [vmem:[#allocation2 + $0x28] sm:$0xff] %vm357_vm1, %v892_v29  ;;  %v897_v31 = vpack.c.bf16 %v892_v29, %v892_v29  ;;  %4355 = vmatprep.mubr.msk.bf16.mxu0 %vm5131_vm0, %v5130_v0 }
 0x57f   : > { %4440 = vmatmul.mubr.msk.bf16.vlgmr.msra.gmra.mrb[24].mxu1 %vm357_vm1, %v897_v31 }
 0x580   : > { %4444 = vmatpush3.bf16.msra.mxu1 %v5316_v5  ;;  %4447 = vmatprep.mubr.msk.bf16.mxu1 %vm5131_vm0, %v5130_v0 }
 0x581   : > { %4445 = vmatprep.subr.bf16.mxu1 %v5130_v0 }
 0x584   : > { %4446 = vmatpush3.bf16.msra.mxu1 %v5318_v6 }
 0x585   : > { %4451 = vmatprep.subr.bf16.mxu1 %v5130_v0 }
 0x64f   : > { %v485_v34 = vpop.f32.mrb[24].mxu0 }
 0x652   : > { %v935_v36 = vpop.f32.mrb[24].mxu1 }
 0x653   : > { %v941_v37 = vadd.f32 %v935_v36, %v896_v35  ;;  %v4441_v38 = vpop.f32.mrb[25].mxu1  ;;  %v486_v35 = vadd.f32 %v5347_v12, %v485_v34  ;;  %v4353_v36 = vpop.f32.mrb[25].mxu0 }
 0x654   : > { %v938_v39 = vpop.f32.mrb[26].mxu1 }
 0x655   : > { %v942_v40 = vmax.f32 %v941_v37, 0.0  ;;  %v4442_v41 = vpop.f32.mrb[27].mxu1  ;;  %v488_v37 = vpop.f32.mrb[26].mxu0  ;;  %568 = vst.msk [vmem:[#allocation3 + $0x60] sm:$0xff] %vm357_vm1, %v486_v35 }
 0x656   : > { %v489_v38 = vadd.f32 %v5347_v12, %v488_v37  ;;  %v4354_v39 = vpop.f32.mrb[27].mxu0 }
 0x657   : > { %944 = vst.msk [vmem:[#allocation2 + $0x30] sm:$0xff] %vm357_vm1, %v942_v40  ;;  %v947_v42 = vpack.c.bf16 %v942_v40, %v942_v40  ;;  %v1146_v40 = vld [vmem:[#allocation3 + $0x58] sm:$0xff] }
 0x658   : > { %569 = vst.msk [vmem:[#allocation3 + $0x68] sm:$0xff] %vm357_vm1, %v489_v38 }
 0x659   : > { %4448 = vmatmul.mubr.msk.bf16.vlgmr.msra.gmra.mrb[28].mxu1 %vm357_vm1, %v947_v42 }
 0x65a   : > { %4452 = vmatpush3.bf16.msra.mxu1 %v5316_v5  ;;  %4455 = vmatprep.mubr.msk.bf16.mxu1 %vm5131_vm0, %v5130_v0 }
 0x65b   : > { %4453 = vmatprep.subr.bf16.mxu1 %v5130_v0 }
 0x65e   : > { %4454 = vmatpush3.bf16.msra.mxu1 %v5318_v6 }
 0x65f   : > { %4459 = vmatprep.subr.bf16.mxu1 %v5130_v0 }
 0x72c   : > { %v985_v50 = vpop.f32.mrb[28].mxu1 }
 0x72d   : > { %v991_v51 = vadd.f32 %v985_v50, %v946_v49  ;;  %v4449_v52 = vpop.f32.mrb[29].mxu1  ;;  %v309_v49 = vld [vmem:[%s5291_s24 + $0x78] sm:$0xff] }
 0x72e   : > { %v988_v53 = vpop.f32.mrb[30].mxu1  ;;  %v331_v50 = vpack.c.bf16 %v309_v49, %v308_v48 }
 0x72f   : > { %v992_v54 = vmax.f32 %v991_v51, 0.0  ;;  %v4450_v55 = vpop.f32.mrb[31].mxu1  ;;  %v1196_v51 = vld [vmem:[#allocation3 + $0x60] sm:$0xff] }
 0x730   : > { %4356 = vmatmul.mubr.msk.bf16.gmra.mrb[28].mxu0 %vm357_vm1, %v331_v50 }
 0x731   : > { %994 = vst.msk [vmem:[#allocation2 + $0x38] sm:$0xff] %vm357_vm1, %v992_v54  ;;  %v997_v56 = vpack.c.bf16 %v992_v54, %v992_v54  ;;  %4359 = vmatprep.mubr.msk.bf16.mxu0 %vm5131_vm0, %v5130_v0 }
 0x733   : > { %4456 = vmatmul.mubr.msk.bf16.vlgmr.msra.gmra.mrb[32].mxu1 %vm357_vm1, %v997_v56 }
 0x734   : > { %4460 = vmatpush3.bf16.msra.mxu1 %v5316_v5  ;;  %4463 = vmatprep.mubr.msk.bf16.mxu1 %vm5131_vm0, %v5130_v0 }
 0x735   : > { %4461 = vmatprep.subr.bf16.mxu1 %v5130_v0 }
 0x738   : > { %4462 = vmatpush3.bf16.msra.mxu1 %v5318_v6 }
 0x739   : > { %4467 = vmatprep.subr.bf16.mxu1 %v5130_v0 }
 0x806   : > { %v1035_v61 = vpop.f32.mrb[32].mxu1 }
 0x807   : > { %v1041_v62 = vadd.f32 %v1035_v61, %v996_v60  ;;  %v4457_v63 = vpop.f32.mrb[33].mxu1  ;;  %v311_v60 = vld [vmem:[%s5291_s24 + $0x88] sm:$0xff]  ;;  %v493_v61 = vpop.f32.mrb[28].mxu0 }
 0x808   : > { %v1038_v1 = vpop.f32.mrb[34].mxu1  ;;  %v494_v63 = vadd.f32 %v5347_v12, %v493_v61 }
 0x809   : > { %v1042_v2 = vmax.f32 %v1041_v62, 0.0  ;;  %v4458_v3 = vpop.f32.mrb[35].mxu1  ;;  %v332_v62 = vpack.c.bf16 %v311_v60, %v310_v59  ;;  %v4357_v1 = vpop.f32.mrb[29].mxu0 }
 0x80a   : > { %570 = vst.msk [vmem:[#allocation3 + $0x70] sm:$0xff] %vm357_vm1, %v494_v63 }
 0x80b   : > { %1044 = vst.msk [vmem:[#allocation2 + $0x40] sm:$0xff] %vm357_vm1, %v1042_v2  ;;  %v1047_v4 = vpack.c.bf16 %v1042_v2, %v1042_v2  ;;  %v496_v2 = vpop.f32.mrb[30].mxu0  ;;  %4360 = vmatmul.mubr.msk.bf16.gmra.mrb[32].mxu0 %vm357_vm1, %v332_v62 }
 0x80c   : > { %v497_v3 = vadd.f32 %v5347_v12, %v496_v2  ;;  %4363 = vmatprep.mubr.msk.bf16.mxu0 %vm5131_vm0, %v5130_v0 }
 0x80d   : > { %4464 = vmatmul.mubr.msk.bf16.vlgmr.msra.gmra.mrb[36].mxu1 %vm357_vm1, %v1047_v4  ;;  %v4358_v4 = vpop.f32.mrb[31].mxu0 }
 0x80e   : > { %4468 = vmatpush3.bf16.msra.mxu1 %v5316_v5  ;;  %4471 = vmatprep.mubr.msk.bf16.mxu1 %vm5131_vm0, %v5130_v0  ;;  %571 = vst.msk [vmem:[#allocation3 + $0x78] sm:$0xff] %vm357_vm1, %v497_v3 }
 0x80f   : > { %4469 = vmatprep.subr.bf16.mxu1 %v5130_v0 }
 0x812   : > { %4470 = vmatpush3.bf16.msra.mxu1 %v5318_v6 }
 0x813   : > { %4475 = vmatprep.subr.bf16.mxu1 %v5130_v0  ;;  %4364 = vmatmul.mubr.msk.bf16.gmra.mrb[36].mxu0 %vm357_vm1, %v333_v10 }
 0x814   : > { %4367 = vmatprep.mubr.msk.bf16.mxu0 %vm5131_vm0, %v5130_v0 }
 0x81b   : > { %4368 = vmatmul.mubr.msk.bf16.gmra.mrb[40].mxu0 %vm357_vm1, %v334_v14 }
 0x81c   : > { %4371 = vmatprep.mubr.msk.bf16.mxu0 %vm5131_vm0, %v5130_v0 }
 0x8de   : > { %v501_v35 = vpop.f32.mrb[32].mxu0 }
 0x8df   : > { %v502_v36 = vadd.f32 %v5347_v12, %v501_v35  ;;  %v4361_v37 = vpop.f32.mrb[33].mxu0 }
 0x8e0   : > { %v1085_v16 = vpop.f32.mrb[36].mxu1  ;;  %v504_v38 = vpop.f32.mrb[34].mxu0 }
 0x8e1   : > { %v1091_v17 = vadd.f32 %v1085_v16, %v1046_v15  ;;  %v4465_v18 = vpop.f32.mrb[37].mxu1  ;;  %v316_v15 = vld [vmem:[%s5291_s24 + $0xb0] sm:$0xff]  ;;  %v317_v16 = vld [vmem:[%s5291_s24 + $0xb8] sm:$0xff]  ;;  %572 = vst.msk [vmem:[#allocation3 + $0x80] sm:$0xff] %vm357_vm1, %v502_v36  ;;  %v505_v39 = vadd.f32 %v5347_v12, %v504_v38 }
 0x8e2   : > { %v1088_v19 = vpop.f32.mrb[38].mxu1  ;;  %v318_v18 = vld [vmem:[%s5291_s24 + $0xc0] sm:$0xff] }
 0x8e3   : > { %v1092_v20 = vmax.f32 %v1091_v17, 0.0  ;;  %v4466_v21 = vpop.f32.mrb[39].mxu1  ;;  %v335_v17 = vpack.c.bf16 %v317_v16, %v316_v15  ;;  %v319_v19 = vld [vmem:[%s5291_s24 + $0xc8] sm:$0xff]  ;;  %573 = vst.msk [vmem:[#allocation3 + $0x88] sm:$0xff] %vm357_vm1, %v505_v39 }
 0x8e4   : > { %v320_v21 = vld [vmem:[%s5291_s24 + $0xd0] sm:$0xff] }
 0x8e5   : > { %1094 = vst.msk [vmem:[#allocation2 + $0x48] sm:$0xff] %vm357_vm1, %v1092_v20  ;;  %v1097_v22 = vpack.c.bf16 %v1092_v20, %v1092_v20  ;;  %4372 = vmatmul.mubr.msk.bf16.gmra.mrb[44].mxu0 %vm357_vm1, %v335_v17  ;;  %v336_v20 = vpack.c.bf16 %v319_v19, %v318_v18  ;;  %v1296_v18 = vld [vmem:[#allocation3 + $0x70] sm:$0xff] }
 0x8e6   : > { %4375 = vmatprep.mubr.msk.bf16.mxu0 %vm5131_vm0, %v5130_v0 }
 0x8e7   : > { %4472 = vmatmul.mubr.msk.bf16.vlgmr.msra.gmra.mrb[40].mxu1 %vm357_vm1, %v1097_v22  ;;  %v321_v22 = vld [vmem:[%s5291_s24 + $0xd8] sm:$0xff] }
 0x8e8   : > { %4476 = vmatpush3.bf16.msra.mxu1 %v5316_v5  ;;  %4479 = vmatprep.mubr.msk.bf16.mxu1 %vm5131_vm0, %v5130_v0  ;;  %v337_v23 = vpack.c.bf16 %v321_v22, %v320_v21 }
 0x8e9   : > { %4477 = vmatprep.subr.bf16.mxu1 %v5130_v0 }
 0x8ec   : > { %4478 = vmatpush3.bf16.msra.mxu1 %v5318_v6 }
 0x8ed   : > { %4483 = vmatprep.subr.bf16.mxu1 %v5130_v0  ;;  %4376 = vmatmul.mubr.msk.bf16.gmra.mrb[48].mxu0 %vm357_vm1, %v336_v20 }
 0x8ee   : > { %4379 = vmatprep.mubr.msk.bf16.mxu0 %vm5131_vm0, %v5130_v0 }
 0x8f5   : > { %4380 = vmatmul.mubr.msk.bf16.gmra.mrb[52].mxu0 %vm357_vm1, %v337_v23 }
 0x8f6   : > { %4383 = vmatprep.mubr.msk.bf16.mxu0 %vm5131_vm0, %v5130_v0 }
 0x9ba   : > { %v1135_v27 = vpop.f32.mrb[40].mxu1 }
 0x9bb   : > { %v1141_v28 = vadd.f32 %v1135_v27, %v1096_v26  ;;  %v4473_v29 = vpop.f32.mrb[41].mxu1  ;;  %v338_v26 = vpack.c.bf16 %v323_v25, %v322_v24  ;;  %v1246_v27 = vld [vmem:[#allocation3 + $0x68] sm:$0xff] }
 0x9bc   : > { %v1138_v30 = vpop.f32.mrb[42].mxu1 }
 0x9bd   : > { %v1142_v31 = vmax.f32 %v1141_v28, 0.0  ;;  %v4474_v32 = vpop.f32.mrb[43].mxu1  ;;  %4384 = vmatmul.mubr.msk.bf16.gmra.mrb[56].mxu0 %vm357_vm1, %v338_v26 }
 0x9be   : > { %4511 = vmatprep.mubr.msk.bf16.mxu0 %vm5131_vm0, %v5130_v0 }
 0x9bf   : > { %1144 = vst.msk [vmem:[#allocation2 + $0x50] sm:$0xff] %vm357_vm1, %v1142_v31  ;;  %v1147_v33 = vpack.c.bf16 %v1142_v31, %v1142_v31 }
 0x9c1   : > { %4480 = vmatmul.mubr.msk.bf16.vlgmr.msra.gmra.mrb[44].mxu1 %vm357_vm1, %v1147_v33 }
 0x9c2   : > { %4484 = vmatpush3.bf16.msra.mxu1 %v5316_v5  ;;  %4487 = vmatprep.mubr.msk.bf16.mxu1 %vm5131_vm0, %v5130_v0 }
 0x9c3   : > { %4485 = vmatprep.subr.bf16.mxu1 %v5130_v0 }
 0x9c6   : > { %4486 = vmatpush3.bf16.msra.mxu1 %v5318_v6 }
 0x9c7   : > { %4491 = vmatprep.subr.bf16.mxu1 %v5130_v0 }
 0xa94   : > { %v1185_v41 = vpop.f32.mrb[44].mxu1 }
 0xa95   : > { %v1191_v42 = vadd.f32 %v1185_v41, %v1146_v40  ;;  %v4481_v43 = vpop.f32.mrb[45].mxu1  ;;  %v4362_v40 = vpop.f32.mrb[35].mxu0 }
 0xa96   : > { %v1188_v44 = vpop.f32.mrb[46].mxu1  ;;  %v509_v41 = vpop.f32.mrb[36].mxu0 }
 0xa97   : > { %v1192_v45 = vmax.f32 %v1191_v42, 0.0  ;;  %v4482_v46 = vpop.f32.mrb[47].mxu1  ;;  %v510_v42 = vadd.f32 %v5347_v12, %v509_v41  ;;  %v4365_v43 = vpop.f32.mrb[37].mxu0  ;;  %v1446_v41 = vld [vmem:[#allocation3 + $0x88] sm:$0xff] }
 0xa98   : > { %v512_v44 = vpop.f32.mrb[38].mxu0 }
 0xa99   : > { %1194 = vst.msk [vmem:[#allocation2 + $0x58] sm:$0xff] %vm357_vm1, %v1192_v45  ;;  %v1197_v47 = vpack.c.bf16 %v1192_v45, %v1192_v45  ;;  %574 = vst.msk [vmem:[#allocation3 + $0x90] sm:$0xff] %vm357_vm1, %v510_v42  ;;  %v513_v45 = vadd.f32 %v5347_v12, %v512_v44  ;;  %v4366_v46 = vpop.f32.mrb[39].mxu0 }
 0xa9b   : > { %4488 = vmatmul.mubr.msk.bf16.vlgmr.msra.gmra.mrb[48].mxu1 %vm357_vm1, %v1197_v47  ;;  %575 = vst.msk [vmem:[#allocation3 + $0x98] sm:$0xff] %vm357_vm1, %v513_v45  ;;  %v517_v47 = vpop.f32.mrb[40].mxu0 }
 0xa9c   : > { %4492 = vmatpush3.bf16.msra.mxu1 %v5316_v5  ;;  %4495 = vmatprep.mubr.msk.bf16.mxu1 %vm5131_vm0, %v5130_v0  ;;  %v518_v48 = vadd.f32 %v5347_v12, %v517_v47  ;;  %v4369_v49 = vpop.f32.mrb[41].mxu0 }
 0xa9d   : > { %4493 = vmatprep.subr.bf16.mxu1 %v5130_v0  ;;  %v520_v50 = vpop.f32.mrb[42].mxu0 }
 0xa9e   : > { %576 = vst.msk [vmem:[#allocation3 + $0xa0] sm:$0xff] %vm357_vm1, %v518_v48 }
 0xaa0   : > { %4494 = vmatpush3.bf16.msra.mxu1 %v5318_v6  ;;  %v1496_v49 = vld [vmem:[#allocation3 + $0x90] sm:$0xff] }
 0xaa1   : > { %4499 = vmatprep.subr.bf16.mxu1 %v5130_v0 }
 0xb6e   : > { %v1235_v52 = vpop.f32.mrb[48].mxu1 }
 0xb6f   : > { %v1241_v53 = vadd.f32 %v1235_v52, %v1196_v51  ;;  %v4489_v54 = vpop.f32.mrb[49].mxu1  ;;  %v521_v51 = vadd.f32 %v5347_v12, %v520_v50  ;;  %v4370_v52 = vpop.f32.mrb[43].mxu0 }
 0xb70   : > { %v1238_v55 = vpop.f32.mrb[50].mxu1 }
 0xb71   : > { %v1242_v56 = vmax.f32 %v1241_v53, 0.0  ;;  %v4490_v57 = vpop.f32.mrb[51].mxu1  ;;  %577 = vst.msk [vmem:[#allocation3 + $0xa8] sm:$0xff] %vm357_vm1, %v521_v51  ;;  %v525_v53 = vpop.f32.mrb[44].mxu0 }
 0xb72   : > { %v526_v54 = vadd.f32 %v5347_v12, %v525_v53  ;;  %v4373_v55 = vpop.f32.mrb[45].mxu0 }
 0xb73   : > { %1244 = vst.msk [vmem:[#allocation2 + $0x60] sm:$0xff] %vm357_vm1, %v1242_v56  ;;  %v1247_v58 = vpack.c.bf16 %v1242_v56, %v1242_v56  ;;  %v528_v56 = vpop.f32.mrb[46].mxu0 }
 0xb74   : > { %578 = vst.msk [vmem:[#allocation3 + $0xb0] sm:$0xff] %vm357_vm1, %v526_v54  ;;  %v529_v57 = vadd.f32 %v5347_v12, %v528_v56 }
 0xb75   : > { %4496 = vmatmul.mubr.msk.bf16.vlgmr.msra.gmra.mrb[52].mxu1 %vm357_vm1, %v1247_v58  ;;  %v4374_v58 = vpop.f32.mrb[47].mxu0 }
 0xb76   : > { %4500 = vmatpush3.bf16.msra.mxu1 %v5316_v5  ;;  %4503 = vmatprep.mubr.msk.bf16.mxu1 %vm5131_vm0, %v5130_v0  ;;  %579 = vst.msk [vmem:[#allocation3 + $0xb8] sm:$0xff] %vm357_vm1, %v529_v57  ;;  %v533_v59 = vpop.f32.mrb[48].mxu0  ;;  %v1546_v57 = vld [vmem:[#allocation3 + $0x98] sm:$0xff] }
 0xb77   : > { %4501 = vmatprep.subr.bf16.mxu1 %v5130_v0  ;;  %v534_v60 = vadd.f32 %v5347_v12, %v533_v59  ;;  %v4377_v61 = vpop.f32.mrb[49].mxu0 }
 0xb78   : > { %v536_v62 = vpop.f32.mrb[50].mxu0 }
 0xb79   : > { %580 = vst.msk [vmem:[#allocation3 + $0xc0] sm:$0xff] %vm357_vm1, %v534_v60  ;;  %v537_v63 = vadd.f32 %v5347_v12, %v536_v62  ;;  %v4378_v1 = vpop.f32.mrb[51].mxu0 }
 0xb7a   : > { %4502 = vmatpush3.bf16.msra.mxu1 %v5318_v6  ;;  %v541_v2 = vpop.f32.mrb[52].mxu0 }
 0xb7b   : > { %4515 = vmatprep.subr.bf16.mxu1 %v5130_v0  ;;  %581 = vst.msk [vmem:[#allocation3 + $0xc8] sm:$0xff] %vm357_vm1, %v537_v63  ;;  %v542_v3 = vadd.f32 %v5347_v12, %v541_v2  ;;  %v4381_v4 = vpop.f32.mrb[53].mxu0  ;;  %v1596_v2 = vld [vmem:[#allocation3 + $0xa0] sm:$0xff] }
 0xb7c   : > { %v544_v7 = vpop.f32.mrb[54].mxu0 }
 0xb7d   : > { %582 = vst.msk [vmem:[#allocation3 + $0xd0] sm:$0xff] %vm357_vm1, %v542_v3  ;;  %v545_v9 = vadd.f32 %v5347_v12, %v544_v7  ;;  %v4382_v10 = vpop.f32.mrb[55].mxu0 }
 0xb7e   : > { %v549_v11 = vpop.f32.mrb[56].mxu0 }
 0xb7f   : > { %583 = vst.msk [vmem:[#allocation3 + $0xd8] sm:$0xff] %vm357_vm1, %v545_v9  ;;  %v550_v13 = vadd.f32 %v5347_v12, %v549_v11  ;;  %v4385_v14 = vpop.f32.mrb[57].mxu0 }
 0xb80   : > { %v552_v15 = vpop.f32.mrb[58].mxu0  ;;  %v1646_v14 = vld [vmem:[#allocation3 + $0xa8] sm:$0xff] }
 0xb81   : > { %584 = vst.msk [vmem:[#allocation3 + $0xe0] sm:$0xff] %vm357_vm1, %v550_v13  ;;  %v553_v16 = vadd.f32 %v5347_v12, %v552_v15  ;;  %v4386_v17 = vpop.f32.mrb[59].mxu0  ;;  %v1346_v12 = vld [vmem:[#allocation3 + $0x78] sm:$0xff] }
 0xb83   : > { %585 = vst.msk [vmem:[#allocation3 + $0xe8] sm:$0xff] %vm357_vm1, %v553_v16 }
 0xc48   : > { %v1285_v28 = vpop.f32.mrb[52].mxu1 }
 0xc49   : > { %v1291_v29 = vadd.f32 %v1285_v28, %v1246_v27  ;;  %v4497_v30 = vpop.f32.mrb[53].mxu1 }
 0xc4a   : > { %v1288_v31 = vpop.f32.mrb[54].mxu1 }
 0xc4b   : > { %v1292_v32 = vmax.f32 %v1291_v29, 0.0  ;;  %v4498_v33 = vpop.f32.mrb[55].mxu1 }
 0xc4c   : > { %v1396_v33 = vld [vmem:[#allocation3 + $0x80] sm:$0xff] }
 0xc4d   : > { %1294 = vst.msk [vmem:[#allocation2 + $0x68] sm:$0xff] %vm357_vm1, %v1292_v32  ;;  %v1297_v34 = vpack.c.bf16 %v1292_v32, %v1292_v32 }
 0xc4f   : > { %4504 = vmatmul.mubr.msk.bf16.vlgmr.msra.gmra.mrb[56].mxu1 %vm357_vm1, %v1297_v34 }
 0xc50   : > { %4516 = vmatpush3.bf16.msra.mxu1 %v5316_v5  ;;  %4519 = vmatprep.mubr.msk.bf16.mxu1 %vm5131_vm0, %v5130_v0 }
 0xc51   : > { %4517 = vmatprep.subr.bf16.mxu1 %v5130_v0 }
 0xc54   : > { %4518 = vmatpush3.bf16.msra.mxu1 %v5318_v6 }
 0xc55   : > { %4531 = vmatprep.subr.bf16.mxu1 %v5130_v0 }
 0xd22   : > { %v1335_v19 = vpop.f32.mrb[56].mxu1 }
 0xd23   : > { %v1341_v20 = vadd.f32 %v1335_v19, %v1296_v18  ;;  %v4505_v21 = vpop.f32.mrb[57].mxu1 }
 0xd24   : > { %v1338_v22 = vpop.f32.mrb[58].mxu1 }
 0xd25   : > { %v1342_v23 = vmax.f32 %v1341_v20, 0.0  ;;  %v4506_v24 = vpop.f32.mrb[59].mxu1  ;;  %v1696_v22 = vld [vmem:[#allocation3 + $0xb0] sm:$0xff] }
 0xd27   : > { %1344 = vst.msk [vmem:[#allocation2 + $0x70] sm:$0xff] %vm357_vm1, %v1342_v23  ;;  %v1347_v25 = vpack.c.bf16 %v1342_v23, %v1342_v23 }
 0xd29   : > { %4512 = vmatmul.mubr.msk.bf16.vlgmr.msra.gmra.mrb[60].mxu0 %vm357_vm1, %v1347_v25 }
 0xd2a   : > { %4524 = vmatpush3.bf16.msra.mxu0 %v5316_v5  ;;  %4527 = vmatprep.mubr.msk.bf16.mxu0 %vm5131_vm0, %v5130_v0 }
 0xd2b   : > { %4525 = vmatprep.subr.bf16.mxu0 %v5130_v0 }
 0xd2e   : > { %4526 = vmatpush3.bf16.msra.mxu0 %v5318_v6 }
 0xd2f   : > { %4539 = vmatprep.subr.bf16.mxu0 %v5130_v0 }
 0xdfc   : > { %v1385_v26 = vpop.f32.mrb[60].mxu0 }
 0xdfd   : > { %v1391_v27 = vadd.f32 %v1385_v26, %v1346_v12  ;;  %v4513_v28 = vpop.f32.mrb[61].mxu0 }
 0xdfe   : > { %v1388_v29 = vpop.f32.mrb[62].mxu0 }
 0xdff   : > { %v1392_v30 = vmax.f32 %v1391_v27, 0.0  ;;  %v4514_v31 = vpop.f32.mrb[63].mxu0  ;;  %v1746_v29 = vld [vmem:[#allocation3 + $0xb8] sm:$0xff] }
 0xe01   : > { %1394 = vst.msk [vmem:[#allocation2 + $0x78] sm:$0xff] %vm357_vm1, %v1392_v30  ;;  %v1397_v32 = vpack.c.bf16 %v1392_v30, %v1392_v30 }
 0xe03   : > { %4520 = vmatmul.mubr.msk.bf16.vlgmr.msra.gmra.mrb[60].mxu1 %vm357_vm1, %v1397_v32 }
 0xe04   : > { %4532 = vmatpush3.bf16.msra.mxu1 %v5316_v5  ;;  %4535 = vmatprep.mubr.msk.bf16.mxu1 %vm5131_vm0, %v5130_v0 }
 0xe05   : > { %4533 = vmatprep.subr.bf16.mxu1 %v5130_v0 }
 0xe08   : > { %4534 = vmatpush3.bf16.msra.mxu1 %v5318_v6 }
 0xe09   : > { %4547 = vmatprep.subr.bf16.mxu1 %v5130_v0 }
 0xed6   : > { %v1435_v34 = vpop.f32.mrb[60].mxu1 }
 0xed7   : > { %v1441_v35 = vadd.f32 %v1435_v34, %v1396_v33  ;;  %v4521_v36 = vpop.f32.mrb[61].mxu1 }
 0xed8   : > { %v1438_v37 = vpop.f32.mrb[62].mxu1 }
 0xed9   : > { %v1442_v38 = vmax.f32 %v1441_v35, 0.0  ;;  %v4522_v39 = vpop.f32.mrb[63].mxu1  ;;  %v1796_v37 = vld [vmem:[#allocation3 + $0xc0] sm:$0xff] }
 0xedb   : > { %1444 = vst.msk [vmem:[#allocation2 + $0x80] sm:$0xff] %vm357_vm1, %v1442_v38  ;;  %v1447_v40 = vpack.c.bf16 %v1442_v38, %v1442_v38 }
 0xedd   : > { %4528 = vmatmul.mubr.msk.bf16.vlgmr.msra.gmra.mrb[64].mxu0 %vm357_vm1, %v1447_v40 }
 0xede   : > { %4540 = vmatpush3.bf16.msra.mxu0 %v5316_v5  ;;  %4543 = vmatprep.mubr.msk.bf16.mxu0 %vm5131_vm0, %v5130_v0 }
 0xedf   : > { %4541 = vmatprep.subr.bf16.mxu0 %v5130_v0 }
 0xee2   : > { %4542 = vmatpush3.bf16.msra.mxu0 %v5318_v6 }
 0xee3   : > { %4555 = vmatprep.subr.bf16.mxu0 %v5130_v0 }
 0xfb0   : > { %v1485_v42 = vpop.f32.mrb[64].mxu0 }
 0xfb1   : > { %v1491_v43 = vadd.f32 %v1485_v42, %v1446_v41  ;;  %v4529_v44 = vpop.f32.mrb[65].mxu0 }
 0xfb2   : > { %v1488_v45 = vpop.f32.mrb[66].mxu0 }
 0xfb3   : > { %v1492_v46 = vmax.f32 %v1491_v43, 0.0  ;;  %v4530_v47 = vpop.f32.mrb[67].mxu0  ;;  %v1846_v45 = vld [vmem:[#allocation3 + $0xc8] sm:$0xff] }
 0xfb5   : > { %1494 = vst.msk [vmem:[#allocation2 + $0x88] sm:$0xff] %vm357_vm1, %v1492_v46  ;;  %v1497_v48 = vpack.c.bf16 %v1492_v46, %v1492_v46 }
 0xfb7   : > { %4536 = vmatmul.mubr.msk.bf16.vlgmr.msra.gmra.mrb[64].mxu1 %vm357_vm1, %v1497_v48 }
 0xfb8   : > { %4548 = vmatpush3.bf16.msra.mxu1 %v5316_v5  ;;  %4551 = vmatprep.mubr.msk.bf16.mxu1 %vm5131_vm0, %v5130_v0 }
 0xfb9   : > { %4549 = vmatprep.subr.bf16.mxu1 %v5130_v0 }
 0xfbc   : > { %4550 = vmatpush3.bf16.msra.mxu1 %v5318_v6 }
 0xfbd   : > { %4563 = vmatprep.subr.bf16.mxu1 %v5130_v0 }
0x108a   : > { %v1535_v50 = vpop.f32.mrb[64].mxu1 }
0x108b   : > { %v1541_v51 = vadd.f32 %v1535_v50, %v1496_v49  ;;  %v4537_v52 = vpop.f32.mrb[65].mxu1 }
0x108c   : > { %v1538_v53 = vpop.f32.mrb[66].mxu1 }
0x108d   : > { %v1542_v54 = vmax.f32 %v1541_v51, 0.0  ;;  %v4538_v55 = vpop.f32.mrb[67].mxu1  ;;  %v1896_v53 = vld [vmem:[#allocation3 + $0xd0] sm:$0xff] }
0x108f   : > { %1544 = vst.msk [vmem:[#allocation2 + $0x90] sm:$0xff] %vm357_vm1, %v1542_v54  ;;  %v1547_v56 = vpack.c.bf16 %v1542_v54, %v1542_v54 }
0x1091   : > { %4544 = vmatmul.mubr.msk.bf16.vlgmr.msra.gmra.mrb[68].mxu0 %vm357_vm1, %v1547_v56 }
0x1092   : > { %4556 = vmatpush3.bf16.msra.mxu0 %v5316_v5  ;;  %4559 = vmatprep.mubr.msk.bf16.mxu0 %vm5131_vm0, %v5130_v0  ;;  %v5628_v5 = vld [vmem:[#allocation6] sm:$0xff]  }
0x1093   : > { %4557 = vmatprep.subr.bf16.mxu0 %v5130_v0 }
0x1096   : > { %4558 = vmatpush3.bf16.msra.mxu0 %v5318_v6  ;;  %v5634_v6 = vld [vmem:[#allocation6 + $0x8] sm:$0xff]  }
0x1097   : > { %4571 = vmatprep.subr.bf16.mxu0 %v5130_v0 }
0x1164   : > { %v1585_v58 = vpop.f32.mrb[68].mxu0 }
0x1165   : > { %v1591_v59 = vadd.f32 %v1585_v58, %v1546_v57  ;;  %v4545_v60 = vpop.f32.mrb[69].mxu0 }
0x1166   : > { %v1588_v61 = vpop.f32.mrb[70].mxu0 }
0x1167   : > { %v1592_v62 = vmax.f32 %v1591_v59, 0.0  ;;  %v4546_v63 = vpop.f32.mrb[71].mxu0  ;;  %v1946_v61 = vld [vmem:[#allocation3 + $0xd8] sm:$0xff] }
0x1169   : > { %1594 = vst.msk [vmem:[#allocation2 + $0x98] sm:$0xff] %vm357_vm1, %v1592_v62  ;;  %v1597_v1 = vpack.c.bf16 %v1592_v62, %v1592_v62 }
0x116b   : > { %4552 = vmatmul.mubr.msk.bf16.vlgmr.msra.gmra.mrb[68].mxu1 %vm357_vm1, %v1597_v1 }
0x116c   : > { %4564 = vmatpush3.bf16.msra.mxu1 %v5628_v5  ;;  %4567 = vmatprep.mubr.msk.bf16.mxu1 %vm5131_vm0, %v5130_v0 }
0x116d   : > { %4565 = vmatprep.subr.bf16.mxu1 %v5130_v0 }
0x1170   : > { %4566 = vmatpush3.bf16.msra.mxu1 %v5634_v6 }
0x1171   : > { %4579 = vmatprep.subr.bf16.mxu1 %v5130_v0 }
0x123e   : > { %v1635_v3 = vpop.f32.mrb[68].mxu1 }
0x123f   : > { %v1641_v4 = vadd.f32 %v1635_v3, %v1596_v2  ;;  %v4553_v7 = vpop.f32.mrb[69].mxu1 }
0x1240   : > { %v1638_v9 = vpop.f32.mrb[70].mxu1 }
0x1241   : > { %v1642_v10 = vmax.f32 %v1641_v4, 0.0  ;;  %v4554_v11 = vpop.f32.mrb[71].mxu1  ;;  %v2108_v9 = vld [vmem:[#allocation2 + $0x8] sm:$0xff] }
0x1243   : > { %1644 = vst.msk [vmem:[#allocation2 + $0xa0] sm:$0xff] %vm357_vm1, %v1642_v10  ;;  %v1647_v13 = vpack.c.bf16 %v1642_v10, %v1642_v10  ;;  %v2107_v10 = vld [vmem:[#allocation2] sm:$0xff] }
0x1244   : > { %v2137_v11 = vpack.c.bf16 %v2108_v9, %v2107_v10 }
0x1245   : > { %4560 = vmatmul.mubr.msk.bf16.vlgmr.msra.gmra.mrb[72].mxu0 %vm357_vm1, %v1647_v13  ;;  %v2110_v13 = vld [vmem:[#allocation2 + $0x18] sm:$0xff] }
0x1246   : > { %4572 = vmatpush3.bf16.msra.mxu0 %v5628_v5  ;;  %4575 = vmatprep.mubr.msk.bf16.mxu0 %vm5131_vm0, %v5130_v0 }
0x1247   : > { %4573 = vmatprep.subr.bf16.mxu0 %v5130_v0 }
0x124a   : > { %4574 = vmatpush3.bf16.msra.mxu0 %v5634_v6 }
0x124b   : > { %4587 = vmatprep.subr.bf16.mxu0 %v5130_v0 }
0x1318   : > { %v1685_v15 = vpop.f32.mrb[72].mxu0 }
0x1319   : > { %v1691_v16 = vadd.f32 %v1685_v15, %v1646_v14  ;;  %v4561_v17 = vpop.f32.mrb[73].mxu0  ;;  %v2109_v14 = vld [vmem:[#allocation2 + $0x10] sm:$0xff] }
0x131a   : > { %v1688_v18 = vpop.f32.mrb[74].mxu0  ;;  %v2138_v15 = vpack.c.bf16 %v2110_v13, %v2109_v14  ;;  %v2111_v17 = vld [vmem:[#allocation2 + $0x20] sm:$0xff] }
0x131b   : > { %v1692_v19 = vmax.f32 %v1691_v16, 0.0  ;;  %v4562_v20 = vpop.f32.mrb[75].mxu0  ;;  %v2112_v16 = vld [vmem:[#allocation2 + $0x28] sm:$0xff] }
0x131c   : > { %v2139_v18 = vpack.c.bf16 %v2112_v16, %v2111_v17  ;;  %v2113_v20 = vld [vmem:[#allocation2 + $0x30] sm:$0xff] }
0x131d   : > { %1694 = vst.msk [vmem:[#allocation2 + $0xa8] sm:$0xff] %vm357_vm1, %v1692_v19  ;;  %v1697_v21 = vpack.c.bf16 %v1692_v19, %v1692_v19  ;;  %v2114_v19 = vld [vmem:[#allocation2 + $0x38] sm:$0xff] }
0x131f   : > { %4568 = vmatmul.mubr.msk.bf16.vlgmr.msra.gmra.mrb[72].mxu1 %vm357_vm1, %v1697_v21  ;;  %v2140_v21 = vpack.c.bf16 %v2114_v19, %v2113_v20 }
0x1320   : > { %4580 = vmatpush3.bf16.msra.mxu1 %v5628_v5  ;;  %4583 = vmatprep.mubr.msk.bf16.mxu1 %vm5131_vm0, %v5130_v0 }
0x1321   : > { %4581 = vmatprep.subr.bf16.mxu1 %v5130_v0 }
0x1324   : > { %4582 = vmatpush3.bf16.msra.mxu1 %v5634_v6 }
0x1325   : > { %4595 = vmatprep.subr.bf16.mxu1 %v5130_v0 }
0x13f2   : > { %v1735_v23 = vpop.f32.mrb[72].mxu1 }
0x13f3   : > { %v1741_v24 = vadd.f32 %v1735_v23, %v1696_v22  ;;  %v4569_v25 = vpop.f32.mrb[73].mxu1  ;;  %v2116_v22 = vld [vmem:[#allocation2 + $0x48] sm:$0xff]  ;;  %v2115_v23 = vld [vmem:[#allocation2 + $0x40] sm:$0xff] }
0x13f4   : > { %v1738_v12 = vpop.f32.mrb[74].mxu1  ;;  %v2118_v25 = vld [vmem:[#allocation2 + $0x58] sm:$0xff] }
0x13f5   : > { %v1742_v26 = vmax.f32 %v1741_v24, 0.0  ;;  %v4570_v27 = vpop.f32.mrb[75].mxu1  ;;  %v2141_v24 = vpack.c.bf16 %v2116_v22, %v2115_v23  ;;  %v2117_v12 = vld [vmem:[#allocation2 + $0x50] sm:$0xff] }
0x13f6   : > { %v2120_v27 = vld [vmem:[#allocation2 + $0x68] sm:$0xff] }
0x13f7   : > { %1744 = vst.msk [vmem:[#allocation2 + $0xb0] sm:$0xff] %vm357_vm1, %v1742_v26  ;;  %v1747_v28 = vpack.c.bf16 %v1742_v26, %v1742_v26  ;;  %v2142_v26 = vpack.c.bf16 %v2118_v25, %v2117_v12 }
0x13f9   : > { %4576 = vmatmul.mubr.msk.bf16.vlgmr.msra.gmra.mrb[76].mxu0 %vm357_vm1, %v1747_v28  ;;  %v2119_v28 = vld [vmem:[#allocation2 + $0x60] sm:$0xff] }
0x13fa   : > { %4588 = vmatpush3.bf16.msra.mxu0 %v5628_v5  ;;  %4591 = vmatprep.mubr.msk.bf16.mxu0 %vm5131_vm0, %v5130_v0 }
0x13fb   : > { %4589 = vmatprep.subr.bf16.mxu0 %v5130_v0 }
0x13fe   : > { %4590 = vmatpush3.bf16.msra.mxu0 %v5634_v6 }
0x13ff   : > { %4603 = vmatprep.subr.bf16.mxu0 %v5130_v0 }
0x14cc   : > { %v1785_v30 = vpop.f32.mrb[76].mxu0 }
0x14cd   : > { %v1791_v31 = vadd.f32 %v1785_v30, %v1746_v29  ;;  %v4577_v32 = vpop.f32.mrb[77].mxu0  ;;  %v2143_v29 = vpack.c.bf16 %v2120_v27, %v2119_v28  ;;  %v2122_v30 = vld [vmem:[#allocation2 + $0x78] sm:$0xff] }
0x14ce   : > { %v1788_v33 = vpop.f32.mrb[78].mxu0 }
0x14cf   : > { %v1792_v34 = vmax.f32 %v1791_v31, 0.0  ;;  %v4578_v35 = vpop.f32.mrb[79].mxu0  ;;  %v2121_v31 = vld [vmem:[#allocation2 + $0x70] sm:$0xff]  ;;  %v2124_v33 = vld [vmem:[#allocation2 + $0x88] sm:$0xff] }
0x14d0   : > { %v2144_v32 = vpack.c.bf16 %v2122_v30, %v2121_v31 }
0x14d1   : > { %1794 = vst.msk [vmem:[#allocation2 + $0xb8] sm:$0xff] %vm357_vm1, %v1792_v34  ;;  %v1797_v36 = vpack.c.bf16 %v1792_v34, %v1792_v34  ;;  %v2123_v34 = vld [vmem:[#allocation2 + $0x80] sm:$0xff] }
0x14d2   : > { %v2145_v35 = vpack.c.bf16 %v2124_v33, %v2123_v34 }
0x14d3   : > { %4584 = vmatmul.mubr.msk.bf16.vlgmr.msra.gmra.mrb[76].mxu1 %vm357_vm1, %v1797_v36  ;;  %v2126_v36 = vld [vmem:[#allocation2 + $0x98] sm:$0xff] }
0x14d4   : > { %4596 = vmatpush3.bf16.msra.mxu1 %v5628_v5  ;;  %4599 = vmatprep.mubr.msk.bf16.mxu1 %vm5131_vm0, %v5130_v0 }
0x14d5   : > { %4597 = vmatprep.subr.bf16.mxu1 %v5130_v0 }
0x14d8   : > { %4598 = vmatpush3.bf16.msra.mxu1 %v5634_v6 }
0x14d9   : > { %4611 = vmatprep.subr.bf16.mxu1 %v5130_v0 }
0x15a6   : > { %v1835_v38 = vpop.f32.mrb[76].mxu1 }
0x15a7   : > { %v1841_v39 = vadd.f32 %v1835_v38, %v1796_v37  ;;  %v4585_v40 = vpop.f32.mrb[77].mxu1  ;;  %v2125_v37 = vld [vmem:[#allocation2 + $0x90] sm:$0xff] }
0x15a8   : > { %v1838_v41 = vpop.f32.mrb[78].mxu1  ;;  %v2146_v38 = vpack.c.bf16 %v2126_v36, %v2125_v37  ;;  %v2127_v40 = vld [vmem:[#allocation2 + $0xa0] sm:$0xff] }
0x15a9   : > { %v1842_v42 = vmax.f32 %v1841_v39, 0.0  ;;  %v4586_v43 = vpop.f32.mrb[79].mxu1  ;;  %v2128_v39 = vld [vmem:[#allocation2 + $0xa8] sm:$0xff] }
0x15aa   : > { %v2147_v41 = vpack.c.bf16 %v2128_v39, %v2127_v40  ;;  %v2130_v43 = vld [vmem:[#allocation2 + $0xb8] sm:$0xff] }
0x15ab   : > { %1844 = vst.msk [vmem:[#allocation2 + $0xc0] sm:$0xff] %vm357_vm1, %v1842_v42  ;;  %v1847_v44 = vpack.c.bf16 %v1842_v42, %v1842_v42  ;;  %v5739_v42 = vld [vmem:[#allocation6 + $0x10] sm:$0xff]  }
0x15ad   : > { %4592 = vmatmul.mubr.msk.bf16.vlgmr.msra.gmra.mrb[80].mxu0 %vm357_vm1, %v1847_v44  ;;  %v2129_v44 = vld [vmem:[#allocation2 + $0xb0] sm:$0xff] }
0x15ae   : > { %4604 = vmatpush3.bf16.msra.mxu0 %v5628_v5  ;;  %4607 = vmatprep.mubr.msk.bf16.mxu0 %vm5131_vm0, %v5130_v0 }
0x15af   : > { %4605 = vmatprep.subr.bf16.mxu0 %v5130_v0 }
0x15b2   : > { %4606 = vmatpush3.bf16.msra.mxu0 %v5634_v6 }
0x15b3   : > { %4619 = vmatprep.subr.bf16.mxu0 %v5130_v0 }
0x1680   : > { %v1885_v46 = vpop.f32.mrb[80].mxu0 }
0x1681   : > { %v1891_v47 = vadd.f32 %v1885_v46, %v1846_v45  ;;  %v4593_v48 = vpop.f32.mrb[81].mxu0  ;;  %v5743_v45 = vld [vmem:[#allocation6 + $0x18] sm:$0xff]   ;;  %v2148_v46 = vpack.c.bf16 %v2130_v43, %v2129_v44 }
0x1682   : > { %v1888_v49 = vpop.f32.mrb[82].mxu0  ;;  %v2131_v48 = vld [vmem:[#allocation2 + $0xc0] sm:$0xff] }
0x1683   : > { %v1892_v50 = vmax.f32 %v1891_v47, 0.0  ;;  %v4594_v51 = vpop.f32.mrb[83].mxu0 }
0x1685   : > { %1894 = vst.msk [vmem:[#allocation2 + $0xc8] sm:$0xff] %vm357_vm1, %v1892_v50  ;;  %v1897_v52 = vpack.c.bf16 %v1892_v50, %v1892_v50 }
0x1687   : > { %4600 = vmatmul.mubr.msk.bf16.vlgmr.msra.gmra.mrb[80].mxu1 %vm357_vm1, %v1897_v52 }
0x1688   : > { %4612 = vmatpush3.bf16.msra.mxu1 %v5628_v5  ;;  %4615 = vmatprep.mubr.msk.bf16.mxu1 %vm5131_vm0, %v5130_v0 }
0x1689   : > { %4613 = vmatprep.subr.bf16.mxu1 %v5130_v0 }
0x168c   : > { %4614 = vmatpush3.bf16.msra.mxu1 %v5634_v6  ;;  %v2132_v47 = vld [vmem:[#allocation2 + $0xc8] sm:$0xff] }
0x168d   : > { %4627 = vmatprep.subr.bf16.mxu1 %v5130_v0  ;;  %v2149_v49 = vpack.c.bf16 %v2132_v47, %v2131_v48 }
0x175a   : > { %v1935_v54 = vpop.f32.mrb[80].mxu1 }
0x175b   : > { %v1941_v55 = vadd.f32 %v1935_v54, %v1896_v53  ;;  %v4601_v56 = vpop.f32.mrb[81].mxu1  ;;  %v1996_v53 = vld [vmem:[#allocation3 + $0xe0] sm:$0xff] }
0x175c   : > { %v1938_v57 = vpop.f32.mrb[82].mxu1 }
0x175d   : > { %v1942_v58 = vmax.f32 %v1941_v55, 0.0  ;;  %v4602_v59 = vpop.f32.mrb[83].mxu1 }
0x175f   : > { %1944 = vst.msk [vmem:[#allocation2 + $0xd0] sm:$0xff] %vm357_vm1, %v1942_v58  ;;  %v1947_v60 = vpack.c.bf16 %v1942_v58, %v1942_v58 }
0x1761   : > { %4608 = vmatmul.mubr.msk.bf16.vlgmr.msra.gmra.mrb[84].mxu0 %vm357_vm1, %v1947_v60 }
0x1762   : > { %4620 = vmatpush3.bf16.msra.mxu0 %v5628_v5  ;;  %4623 = vmatprep.mubr.msk.bf16.mxu0 %vm5131_vm0, %v5130_v0  ;;  %v5013_v5 = vld [vmem:[%s6063_s1 + $0x10] sm:$0xff]  }
0x1763   : > { %4621 = vmatprep.subr.bf16.mxu0 %v5130_v0 }
0x1766   : > { %4622 = vmatpush3.bf16.msra.mxu0 %v5634_v6  ;;  %v5014_v6 = vld [vmem:[%s6063_s1 + $0x18] sm:$0xff]   ;;  %v2133_v51 = vld [vmem:[#allocation2 + $0xd0] sm:$0xff] }
0x1767   : > { %4691 = vmatprep.subr.bf16.mxu0 %v5130_v0 }
0x1834   : > { %v1985_v62 = vpop.f32.mrb[84].mxu0 }
0x1835   : > { %v1991_v63 = vadd.f32 %v1985_v62, %v1946_v61  ;;  %v4609_v1 = vpop.f32.mrb[85].mxu0  ;;  %v5760_v61 = vld [vmem:[%s6065_s3 + $0x1] ss:$0 sm:$0xff] }
0x1836   : > { %v1988_v2 = vpop.f32.mrb[86].mxu0 }
0x1837   : > { %v1992_v3 = vmax.f32 %v1991_v63, 0.0  ;;  %v4610_v4 = vpop.f32.mrb[87].mxu0 }
0x1839   : > { %1994 = vst.msk [vmem:[#allocation2 + $0xd8] sm:$0xff] %vm357_vm1, %v1992_v3  ;;  %v1997_v7 = vpack.c.bf16 %v1992_v3, %v1992_v3 }
0x183b   : > { %4616 = vmatmul.mubr.msk.bf16.vlgmr.msra.gmra.mrb[84].mxu1 %vm357_vm1, %v1997_v7 }
0x183c   : > { %4628 = vmatpush3.bf16.msra.mxu1 %v5013_v5  ;;  %4631 = vmatprep.mubr.msk.bf16.mxu1 %vm5131_vm0, %v5130_v0 }
0x183d   : > { %4629 = vmatprep.subr.bf16.mxu1 %v5130_v0 }
0x1840   : > { %4630 = vmatpush3.bf16.msra.mxu1 %v5014_v6  ;;  %v2134_v50 = vld [vmem:[#allocation2 + $0xd8] sm:$0xff] }
0x1841   : > { %4811 = vmatprep.subr.bf16.mxu1 %v5130_v0  ;;  %v2150_v52 = vpack.c.bf16 %v2134_v50, %v2133_v51 }
0x1843   : > { %4632 = vmatmul.mubr.msk.bf16.vlgmr.msra.gmra.mrb[88].mxu1 %vm357_vm1, %v2137_v11 }
0x1844   : > { %4635 = vmatprep.mubr.msk.bf16.mxu1 %vm5131_vm0, %v5130_v0  ;;  %4812 = vmatpush3.bf16.msra.mxu1 %v5739_v42 }
0x1845   : > { %4813 = vmatprep.subr.bf16.mxu1 %v5130_v0 }
0x1848   : > { %4814 = vmatpush3.bf16.msra.mxu1 %v5743_v45 }
0x1849   : > { %4827 = vmatprep.subr.bf16.mxu1 %v5130_v0 }
0x184b   : > { %4636 = vmatmul.mubr.msk.bf16.gmra.mrb[92].mxu1 %vm357_vm1, %v2138_v15 }
0x184c   : > { %4639 = vmatprep.mubr.msk.bf16.mxu1 %vm5131_vm0, %v5130_v0 }
0x1853   : > { %4640 = vmatmul.mubr.msk.bf16.gmra.mrb[96].mxu1 %vm357_vm1, %v2139_v18 }
0x1854   : > { %4643 = vmatprep.mubr.msk.bf16.mxu1 %vm5131_vm0, %v5130_v0 }
0x185b   : > { %4644 = vmatmul.mubr.msk.bf16.gmra.mrb[100].mxu1 %vm357_vm1, %v2140_v21 }
0x185c   : > { %4647 = vmatprep.mubr.msk.bf16.mxu1 %vm5131_vm0, %v5130_v0 }
0x1863   : > { %4648 = vmatmul.mubr.msk.bf16.gmra.mrb[104].mxu1 %vm357_vm1, %v2141_v24 }
0x1864   : > { %4651 = vmatprep.mubr.msk.bf16.mxu1 %vm5131_vm0, %v5130_v0 }
0x186b   : > { %4652 = vmatmul.mubr.msk.bf16.gmra.mrb[108].mxu1 %vm357_vm1, %v2142_v26 }
0x186c   : > { %4655 = vmatprep.mubr.msk.bf16.mxu1 %vm5131_vm0, %v5130_v0 }
0x1873   : > { %4656 = vmatmul.mubr.msk.bf16.gmra.mrb[112].mxu1 %vm357_vm1, %v2143_v29 }
0x1874   : > { %4659 = vmatprep.mubr.msk.bf16.mxu1 %vm5131_vm0, %v5130_v0 }
0x187b   : > { %4660 = vmatmul.mubr.msk.bf16.gmra.mrb[116].mxu1 %vm357_vm1, %v2144_v32 }
0x187c   : > { %4663 = vmatprep.mubr.msk.bf16.mxu1 %vm5131_vm0, %v5130_v0 }
0x1883   : > { %4664 = vmatmul.mubr.msk.bf16.gmra.mrb[120].mxu1 %vm357_vm1, %v2145_v35 }
0x1884   : > { %4667 = vmatprep.mubr.msk.bf16.mxu1 %vm5131_vm0, %v5130_v0 }
0x188b   : > { %4668 = vmatmul.mubr.msk.bf16.gmra.mrb[124].mxu1 %vm357_vm1, %v2146_v38 }
0x188c   : > { %4671 = vmatprep.mubr.msk.bf16.mxu1 %vm5131_vm0, %v5130_v0 }
0x1893   : > { %4672 = vmatmul.mubr.msk.bf16.gmra.mrb[128].mxu1 %vm357_vm1, %v2147_v41 }
0x1894   : > { %4675 = vmatprep.mubr.msk.bf16.mxu1 %vm5131_vm0, %v5130_v0 }
0x189b   : > { %4676 = vmatmul.mubr.msk.bf16.gmra.mrb[132].mxu1 %vm357_vm1, %v2148_v46 }
0x189c   : > { %4679 = vmatprep.mubr.msk.bf16.mxu1 %vm5131_vm0, %v5130_v0 }
0x18a3   : > { %4680 = vmatmul.mubr.msk.bf16.gmra.mrb[136].mxu1 %vm357_vm1, %v2149_v49 }
0x18a4   : > { %4683 = vmatprep.mubr.msk.bf16.mxu1 %vm5131_vm0, %v5130_v0 }
0x18ab   : > { %4684 = vmatmul.mubr.msk.bf16.gmra.mrb[140].mxu1 %vm357_vm1, %v2150_v52 }
0x18ac   : > { %4687 = vmatprep.mubr.msk.bf16.mxu1 %vm5131_vm0, %v5130_v0 }
0x190e   : > { %v2035_v54 = vpop.f32.mrb[84].mxu1 }
0x190f   : > { %v2041_v55 = vadd.f32 %v2035_v54, %v1996_v53  ;;  %v4617_v56 = vpop.f32.mrb[85].mxu1 }
0x1910   : > { %v2038_v57 = vpop.f32.mrb[86].mxu1 }
0x1911   : > { %v2042_v58 = vmax.f32 %v2041_v55, 0.0  ;;  %v4618_v59 = vpop.f32.mrb[87].mxu1 }
0x1913   : > { %2044 = vst.msk [vmem:[#allocation2 + $0xe0] sm:$0xff] %vm357_vm1, %v2042_v58  ;;  %v2047_v60 = vpack.c.bf16 %v2042_v58, %v2042_v58 }
0x1915   : > { %4624 = vmatmul.mubr.msk.bf16.vlgmr.msra.gmra.mrb[88].mxu0 %vm357_vm1, %v2047_v60 }
0x1916   : > { %4692 = vmatpush3.bf16.msra.mxu0 %v5739_v42  ;;  %v2249_v62 = vpop.f32.mrb[88].mxu1  ;;  %4695 = vmatprep.mubr.msk.bf16.mxu0 %vm5131_vm0, %v5130_v0 }
0x1917   : > { %v2250_v63 = vadd.f32 %v5760_v61, %v2249_v62  ;;  %v4633_v1 = vpop.f32.mrb[89].mxu1  ;;  %4693 = vmatprep.subr.bf16.mxu0 %v5130_v0 }
0x1918   : > { %v2252_v2 = vpop.f32.mrb[90].mxu1 }
0x1919   : > { %2368 = vst.msk [vmem:[#allocation3] sm:$0xff] %vm357_vm1, %v2250_v63  ;;  %v2253_v3 = vadd.f32 %v5760_v61, %v2252_v2  ;;  %v4634_v4 = vpop.f32.mrb[91].mxu1 }
0x191a   : > { %4694 = vmatpush3.bf16.msra.mxu0 %v5743_v45 }
0x191b   : > { %2369 = vst.msk [vmem:[#allocation3 + $0x8] sm:$0xff] %vm357_vm1, %v2253_v3  ;;  %4699 = vmatprep.subr.bf16.mxu0 %v5130_v0 }
0x191d   : > { %4696 = vmatmul.mubr.bf16.vlgmr.msra.gmra.mrb[92].mxu0 %v5132_v8 }
0x191e   : > { %v2257_v5 = vpop.f32.mrb[92].mxu1  ;;  %4700 = vmatpush3.bf16.msra.mxu0 %v5739_v42  ;;  %4703 = vmatprep.mubr.msk.bf16.mxu0 %vm5131_vm0, %v5130_v0 }
0x191f   : > { %v2258_v7 = vadd.f32 %v5760_v61, %v2257_v5  ;;  %v4637_v6 = vpop.f32.mrb[93].mxu1  ;;  %4701 = vmatprep.subr.bf16.mxu0 %v5130_v0 }
0x1920   : > { %v2260_v9 = vpop.f32.mrb[94].mxu1 }
0x1921   : > { %2370 = vst.msk [vmem:[#allocation3 + $0x10] sm:$0xff] %vm357_vm1, %v2258_v7  ;;  %v2261_v10 = vadd.f32 %v5760_v61, %v2260_v9  ;;  %v4638_v11 = vpop.f32.mrb[95].mxu1 }
0x1922   : > { %4702 = vmatpush3.bf16.msra.mxu0 %v5743_v45 }
0x1923   : > { %2371 = vst.msk [vmem:[#allocation3 + $0x18] sm:$0xff] %vm357_vm1, %v2261_v10  ;;  %4707 = vmatprep.subr.bf16.mxu0 %v5130_v0 }
0x1926   : > { %v2265_v8 = vpop.f32.mrb[96].mxu1 }
0x1927   : > { %v2266_v13 = vadd.f32 %v5760_v61, %v2265_v8  ;;  %v4641_v14 = vpop.f32.mrb[97].mxu1 }
0x1928   : > { %v2268_v15 = vpop.f32.mrb[98].mxu1 }
0x1929   : > { %2372 = vst.msk [vmem:[#allocation3 + $0x20] sm:$0xff] %vm357_vm1, %v2266_v13  ;;  %v2269_v16 = vadd.f32 %v5760_v61, %v2268_v15  ;;  %v4642_v17 = vpop.f32.mrb[99].mxu1 }
0x192b   : > { %2373 = vst.msk [vmem:[#allocation3 + $0x28] sm:$0xff] %vm357_vm1, %v2269_v16 }
0x192e   : > { %v2273_v18 = vpop.f32.mrb[100].mxu1 }
0x192f   : > { %v2274_v19 = vadd.f32 %v5760_v61, %v2273_v18  ;;  %v4645_v20 = vpop.f32.mrb[101].mxu1 }
0x1930   : > { %v2276_v21 = vpop.f32.mrb[102].mxu1 }
0x1931   : > { %2374 = vst.msk [vmem:[#allocation3 + $0x30] sm:$0xff] %vm357_vm1, %v2274_v19  ;;  %v2277_v22 = vadd.f32 %v5760_v61, %v2276_v21  ;;  %v4646_v23 = vpop.f32.mrb[103].mxu1 }
0x1933   : > { %2375 = vst.msk [vmem:[#allocation3 + $0x38] sm:$0xff] %vm357_vm1, %v2277_v22 }
0x1936   : > { %v2281_v24 = vpop.f32.mrb[104].mxu1 }
0x1937   : > { %v2282_v25 = vadd.f32 %v5760_v61, %v2281_v24  ;;  %v4649_v12 = vpop.f32.mrb[105].mxu1  ;;  %v2046_v24 = vld [vmem:[#allocation3 + $0xe8] sm:$0xff] }
0x1938   : > { %v2284_v26 = vpop.f32.mrb[106].mxu1 }
0x1939   : > { %2376 = vst.msk [vmem:[#allocation3 + $0x40] sm:$0xff] %vm357_vm1, %v2282_v25  ;;  %v2285_v27 = vadd.f32 %v5760_v61, %v2284_v26  ;;  %v4650_v28 = vpop.f32.mrb[107].mxu1 }
0x193b   : > { %2377 = vst.msk [vmem:[#allocation3 + $0x48] sm:$0xff] %vm357_vm1, %v2285_v27 }
0x193e   : > { %v2289_v29 = vpop.f32.mrb[108].mxu1 }
0x193f   : > { %v2290_v30 = vadd.f32 %v5760_v61, %v2289_v29  ;;  %v4653_v31 = vpop.f32.mrb[109].mxu1 }
0x1940   : > { %v2292_v32 = vpop.f32.mrb[110].mxu1 }
0x1941   : > { %2378 = vst.msk [vmem:[#allocation3 + $0x50] sm:$0xff] %vm357_vm1, %v2290_v30  ;;  %v2293_v33 = vadd.f32 %v5760_v61, %v2292_v32  ;;  %v4654_v34 = vpop.f32.mrb[111].mxu1  ;;  %v2398_v30 = vld [vmem:[#allocation3] sm:$0xff] }
0x1943   : > { %2379 = vst.msk [vmem:[#allocation3 + $0x58] sm:$0xff] %vm357_vm1, %v2293_v33 }
0x1946   : > { %v2297_v35 = vpop.f32.mrb[112].mxu1 }
0x1947   : > { %v2298_v36 = vadd.f32 %v5760_v61, %v2297_v35  ;;  %v4657_v37 = vpop.f32.mrb[113].mxu1 }
0x1948   : > { %v2300_v38 = vpop.f32.mrb[114].mxu1  ;;  %v2135_v37 = vld [vmem:[#allocation2 + $0xe0] sm:$0xff] }
0x1949   : > { %2380 = vst.msk [vmem:[#allocation3 + $0x60] sm:$0xff] %vm357_vm1, %v2298_v36  ;;  %v2301_v39 = vadd.f32 %v5760_v61, %v2300_v38  ;;  %v4658_v40 = vpop.f32.mrb[115].mxu1 }
0x194b   : > { %2381 = vst.msk [vmem:[#allocation3 + $0x68] sm:$0xff] %vm357_vm1, %v2301_v39 }
0x194e   : > { %v2305_v41 = vpop.f32.mrb[116].mxu1 }
0x194f   : > { %v2306_v43 = vadd.f32 %v5760_v61, %v2305_v41  ;;  %v4661_v44 = vpop.f32.mrb[117].mxu1 }
0x1950   : > { %v2308_v46 = vpop.f32.mrb[118].mxu1 }
0x1951   : > { %2382 = vst.msk [vmem:[#allocation3 + $0x70] sm:$0xff] %vm357_vm1, %v2306_v43  ;;  %v2309_v47 = vadd.f32 %v5760_v61, %v2308_v46  ;;  %v4662_v48 = vpop.f32.mrb[119].mxu1  ;;  %v2453_v43 = vld [vmem:[#allocation3 + $0x8] sm:$0xff] }
0x1953   : > { %2383 = vst.msk [vmem:[#allocation3 + $0x78] sm:$0xff] %vm357_vm1, %v2309_v47 }
0x1956   : > { %v2313_v49 = vpop.f32.mrb[120].mxu1 }
0x1957   : > { %v2314_v50 = vadd.f32 %v5760_v61, %v2313_v49  ;;  %v4665_v51 = vpop.f32.mrb[121].mxu1 }
0x1958   : > { %v2316_v52 = vpop.f32.mrb[122].mxu1 }
0x1959   : > { %2384 = vst.msk [vmem:[#allocation3 + $0x80] sm:$0xff] %vm357_vm1, %v2314_v50  ;;  %v2317_v53 = vadd.f32 %v5760_v61, %v2316_v52  ;;  %v4666_v54 = vpop.f32.mrb[123].mxu1 }
0x195b   : > { %2385 = vst.msk [vmem:[#allocation3 + $0x88] sm:$0xff] %vm357_vm1, %v2317_v53 }
0x195e   : > { %v2321_v55 = vpop.f32.mrb[124].mxu1 }
0x195f   : > { %v2322_v56 = vadd.f32 %v5760_v61, %v2321_v55  ;;  %v4669_v57 = vpop.f32.mrb[125].mxu1 }
0x1960   : > { %v2324_v58 = vpop.f32.mrb[126].mxu1  ;;  %v2500_v57 = vld [vmem:[#allocation3 + $0x10] sm:$0xff] }
0x1961   : > { %2386 = vst.msk [vmem:[#allocation3 + $0x90] sm:$0xff] %vm357_vm1, %v2322_v56  ;;  %v2325_v59 = vadd.f32 %v5760_v61, %v2324_v58  ;;  %v4670_v60 = vpop.f32.mrb[127].mxu1 }
0x1963   : > { %2387 = vst.msk [vmem:[#allocation3 + $0x98] sm:$0xff] %vm357_vm1, %v2325_v59 }
0x1966   : > { %v2329_v62 = vpop.f32.mrb[128].mxu1 }
0x1967   : > { %v2330_v63 = vadd.f32 %v5760_v61, %v2329_v62  ;;  %v4673_v1 = vpop.f32.mrb[129].mxu1 }
0x1968   : > { %v2332_v2 = vpop.f32.mrb[130].mxu1 }
0x1969   : > { %2388 = vst.msk [vmem:[#allocation3 + $0xa0] sm:$0xff] %vm357_vm1, %v2330_v63  ;;  %v2333_v3 = vadd.f32 %v5760_v61, %v2332_v2  ;;  %v4674_v4 = vpop.f32.mrb[131].mxu1  ;;  %v2547_v2 = vld [vmem:[#allocation3 + $0x18] sm:$0xff] }
0x196b   : > { %2389 = vst.msk [vmem:[#allocation3 + $0xa8] sm:$0xff] %vm357_vm1, %v2333_v3 }
0x196e   : > { %v2337_v5 = vpop.f32.mrb[132].mxu1 }
0x196f   : > { %v2338_v7 = vadd.f32 %v5760_v61, %v2337_v5  ;;  %v4677_v6 = vpop.f32.mrb[133].mxu1 }
0x1970   : > { %v2340_v9 = vpop.f32.mrb[134].mxu1 }
0x1971   : > { %2390 = vst.msk [vmem:[#allocation3 + $0xb0] sm:$0xff] %vm357_vm1, %v2338_v7  ;;  %v2341_v10 = vadd.f32 %v5760_v61, %v2340_v9  ;;  %v4678_v11 = vpop.f32.mrb[135].mxu1 }
0x1972   : > { %v2594_v11 = vld [vmem:[#allocation3 + $0x20] sm:$0xff] }
0x1973   : > { %2391 = vst.msk [vmem:[#allocation3 + $0xb8] sm:$0xff] %vm357_vm1, %v2341_v10 }
0x1976   : > { %v2345_v8 = vpop.f32.mrb[136].mxu1 }
0x1977   : > { %v2346_v13 = vadd.f32 %v5760_v61, %v2345_v8  ;;  %v4681_v14 = vpop.f32.mrb[137].mxu1 }
0x1978   : > { %v2348_v15 = vpop.f32.mrb[138].mxu1 }
0x1979   : > { %2392 = vst.msk [vmem:[#allocation3 + $0xc0] sm:$0xff] %vm357_vm1, %v2346_v13  ;;  %v2349_v16 = vadd.f32 %v5760_v61, %v2348_v15  ;;  %v4682_v17 = vpop.f32.mrb[139].mxu1 }
0x197b   : > { %2393 = vst.msk [vmem:[#allocation3 + $0xc8] sm:$0xff] %vm357_vm1, %v2349_v16 }
0x197e   : > { %v2353_v18 = vpop.f32.mrb[140].mxu1 }
0x197f   : > { %v2354_v19 = vadd.f32 %v5760_v61, %v2353_v18  ;;  %v4685_v20 = vpop.f32.mrb[141].mxu1 }
0x1980   : > { %v2356_v21 = vpop.f32.mrb[142].mxu1 }
0x1981   : > { %2394 = vst.msk [vmem:[#allocation3 + $0xd0] sm:$0xff] %vm357_vm1, %v2354_v19  ;;  %v2357_v22 = vadd.f32 %v5760_v61, %v2356_v21  ;;  %v4686_v23 = vpop.f32.mrb[143].mxu1  ;;  %v2641_v19 = vld [vmem:[#allocation3 + $0x28] sm:$0xff] }
0x1983   : > { %2395 = vst.msk [vmem:[#allocation3 + $0xd8] sm:$0xff] %vm357_vm1, %v2357_v22 }
0x19e8   : > { %v2085_v25 = vpop.f32.mrb[88].mxu0 }
0x19e9   : > { %v2091_v12 = vadd.f32 %v2085_v25, %v2046_v24  ;;  %v4625_v26 = vpop.f32.mrb[89].mxu0 }
0x19ea   : > { %v2088_v27 = vpop.f32.mrb[90].mxu0  ;;  %v2688_v26 = vld [vmem:[#allocation3 + $0x30] sm:$0xff] }
0x19eb   : > { %v2092_v28 = vmax.f32 %v2091_v12, 0.0  ;;  %v4626_v29 = vpop.f32.mrb[91].mxu0 }
0x19ed   : > { %2094 = vst.msk [vmem:[#allocation2 + $0xe8] sm:$0xff] %vm357_vm1, %v2092_v28 }
0x19f0   : > { %v2445_v31 = vpop.f32.mrb[92].mxu0 }
0x19f1   : > { %v2451_v32 = vadd.f32 %v2445_v31, %v2398_v30  ;;  %v4697_v33 = vpop.f32.mrb[93].mxu0 }
0x19f2   : > { %v2448_v34 = vpop.f32.mrb[94].mxu0 }
0x19f3   : > { %v2452_v35 = vmax.f32 %v2451_v32, 0.0  ;;  %v4698_v36 = vpop.f32.mrb[95].mxu0  ;;  %v2735_v34 = vld [vmem:[#allocation3 + $0x38] sm:$0xff] }
0x19f4   : > { %v2136_v38 = vld [vmem:[#allocation2 + $0xe8] sm:$0xff] }
0x19f5   : > { %v2454_v39 = vpack.c.bf16 %v2452_v35, %v2452_v35  ;;  %v2151_v40 = vpack.c.bf16 %v2136_v38, %v2135_v37 }
0x19f7   : > { %4688 = vmatmul.mubr.msk.bf16.gmra.mrb[144].mxu1 %vm357_vm1, %v2151_v40  ;;  %4704 = vmatmul.mubr.msk.bf16.vlgmr.msra.gmra.mrb[96].mxu0 %vm357_vm1, %v2454_v39 }
0x19f8   : > { %4708 = vmatpush3.bf16.msra.mxu0 %v5739_v42  ;;  %4711 = vmatprep.mubr.msk.bf16.mxu0 %vm5131_vm0, %v5130_v0 }
0x19f9   : > { %4709 = vmatprep.subr.bf16.mxu0 %v5130_v0  ;;  %4815 = vmatprep.mubr.msk.bf16.mxu1 %vm5131_vm0, %v5130_v0 }
0x19fc   : > { %4710 = vmatpush3.bf16.msra.mxu0 %v5743_v45 }
0x19fd   : > { %4715 = vmatprep.subr.bf16.mxu0 %v5130_v0 }
0x1aca   : > { %v2361_v41 = vpop.f32.mrb[144].mxu1  ;;  %v2492_v44 = vpop.f32.mrb[96].mxu0 }
0x1acb   : > { %v2362_v46 = vadd.f32 %v5760_v61, %v2361_v41  ;;  %v2498_v47 = vadd.f32 %v2492_v44, %v2453_v43  ;;  %v4689_v48 = vpop.f32.mrb[145].mxu1  ;;  %v4705_v49 = vpop.f32.mrb[97].mxu0  ;;  %v2782_v43 = vld [vmem:[#allocation3 + $0x40] sm:$0xff] }
0x1acc   : > { %v2364_v50 = vpop.f32.mrb[146].mxu1  ;;  %v2495_v51 = vpop.f32.mrb[98].mxu0 }
0x1acd   : > { %2396 = vst.msk [vmem:[#allocation3 + $0xe0] sm:$0xff] %vm357_vm1, %v2362_v46  ;;  %v2499_v52 = vmax.f32 %v2498_v47, 0.0  ;;  %v2365_v53 = vadd.f32 %v5760_v61, %v2364_v50  ;;  %v4690_v54 = vpop.f32.mrb[147].mxu1  ;;  %v4706_v55 = vpop.f32.mrb[99].mxu0 }
0x1acf   : > { %v2501_v56 = vpack.c.bf16 %v2499_v52, %v2499_v52  ;;  %2397 = vst.msk [vmem:[#allocation3 + $0xe8] sm:$0xff] %vm357_vm1, %v2365_v53  ;;  %v2829_v52 = vld [vmem:[#allocation3 + $0x48] sm:$0xff] }
0x1ad1   : > { %4712 = vmatmul.mubr.msk.bf16.vlgmr.msra.gmra.mrb[100].mxu0 %vm357_vm1, %v2501_v56 }
0x1ad2   : > { %4716 = vmatpush3.bf16.msra.mxu0 %v5739_v42  ;;  %4719 = vmatprep.mubr.msk.bf16.mxu0 %vm5131_vm0, %v5130_v0 }
0x1ad3   : > { %4717 = vmatprep.subr.bf16.mxu0 %v5130_v0 }
0x1ad6   : > { %4718 = vmatpush3.bf16.msra.mxu0 %v5743_v45 }
0x1ad7   : > { %4723 = vmatprep.subr.bf16.mxu0 %v5130_v0 }
0x1ba4   : > { %v2539_v61 = vpop.f32.mrb[100].mxu0 }
0x1ba5   : > { %v2545_v58 = vadd.f32 %v2539_v61, %v2500_v57  ;;  %v4713_v59 = vpop.f32.mrb[101].mxu0 }
0x1ba6   : > { %v2542_v60 = vpop.f32.mrb[102].mxu0  ;;  %v2876_v59 = vld [vmem:[#allocation3 + $0x50] sm:$0xff] }
0x1ba7   : > { %v2546_v62 = vmax.f32 %v2545_v58, 0.0  ;;  %v4714_v63 = vpop.f32.mrb[103].mxu0 }
0x1ba9   : > { %v2548_v1 = vpack.c.bf16 %v2546_v62, %v2546_v62 }
0x1bab   : > { %4720 = vmatmul.mubr.msk.bf16.vlgmr.msra.gmra.mrb[104].mxu0 %vm357_vm1, %v2548_v1 }
0x1bac   : > { %4724 = vmatpush3.bf16.msra.mxu0 %v5739_v42  ;;  %4727 = vmatprep.mubr.msk.bf16.mxu0 %vm5131_vm0, %v5130_v0 }
0x1bad   : > { %4725 = vmatprep.subr.bf16.mxu0 %v5130_v0 }
0x1bb0   : > { %4726 = vmatpush3.bf16.msra.mxu0 %v5743_v45 }
0x1bb1   : > { %4731 = vmatprep.subr.bf16.mxu0 %v5130_v0 }
0x1c7e   : > { %v2586_v3 = vpop.f32.mrb[104].mxu0 }
0x1c7f   : > { %v2592_v4 = vadd.f32 %v2586_v3, %v2547_v2  ;;  %v4721_v5 = vpop.f32.mrb[105].mxu0 }
0x1c80   : > { %v2589_v7 = vpop.f32.mrb[106].mxu0  ;;  %v2923_v5 = vld [vmem:[#allocation3 + $0x58] sm:$0xff] }
0x1c81   : > { %v2593_v6 = vmax.f32 %v2592_v4, 0.0  ;;  %v4722_v9 = vpop.f32.mrb[107].mxu0 }
0x1c83   : > { %v2595_v10 = vpack.c.bf16 %v2593_v6, %v2593_v6 }
0x1c85   : > { %4728 = vmatmul.mubr.msk.bf16.vlgmr.msra.gmra.mrb[108].mxu0 %vm357_vm1, %v2595_v10 }
0x1c86   : > { %4732 = vmatpush3.bf16.msra.mxu0 %v5739_v42  ;;  %4735 = vmatprep.mubr.msk.bf16.mxu0 %vm5131_vm0, %v5130_v0 }
0x1c87   : > { %4733 = vmatprep.subr.bf16.mxu0 %v5130_v0 }
0x1c8a   : > { %4734 = vmatpush3.bf16.msra.mxu0 %v5743_v45 }
0x1c8b   : > { %4739 = vmatprep.subr.bf16.mxu0 %v5130_v0 }
0x1d58   : > { %v2633_v8 = vpop.f32.mrb[108].mxu0 }
0x1d59   : > { %v2639_v13 = vadd.f32 %v2633_v8, %v2594_v11  ;;  %v4729_v14 = vpop.f32.mrb[109].mxu0 }
0x1d5a   : > { %v2636_v15 = vpop.f32.mrb[110].mxu0  ;;  %v2970_v14 = vld [vmem:[#allocation3 + $0x60] sm:$0xff] }
0x1d5b   : > { %v2640_v16 = vmax.f32 %v2639_v13, 0.0  ;;  %v4730_v17 = vpop.f32.mrb[111].mxu0 }
0x1d5d   : > { %v2642_v18 = vpack.c.bf16 %v2640_v16, %v2640_v16 }
0x1d5f   : > { %4736 = vmatmul.mubr.msk.bf16.vlgmr.msra.gmra.mrb[112].mxu0 %vm357_vm1, %v2642_v18 }
0x1d60   : > { %4740 = vmatpush3.bf16.msra.mxu0 %v5739_v42  ;;  %4743 = vmatprep.mubr.msk.bf16.mxu0 %vm5131_vm0, %v5130_v0 }
0x1d61   : > { %4741 = vmatprep.subr.bf16.mxu0 %v5130_v0 }
0x1d64   : > { %4742 = vmatpush3.bf16.msra.mxu0 %v5743_v45 }
0x1d65   : > { %4747 = vmatprep.subr.bf16.mxu0 %v5130_v0 }
0x1e32   : > { %v2680_v20 = vpop.f32.mrb[112].mxu0 }
0x1e33   : > { %v2686_v21 = vadd.f32 %v2680_v20, %v2641_v19  ;;  %v4737_v22 = vpop.f32.mrb[113].mxu0 }
0x1e34   : > { %v2683_v23 = vpop.f32.mrb[114].mxu0  ;;  %v3017_v22 = vld [vmem:[#allocation3 + $0x68] sm:$0xff] }
0x1e35   : > { %v2687_v24 = vmax.f32 %v2686_v21, 0.0  ;;  %v4738_v25 = vpop.f32.mrb[115].mxu0 }
0x1e37   : > { %v2689_v12 = vpack.c.bf16 %v2687_v24, %v2687_v24 }
0x1e39   : > { %4744 = vmatmul.mubr.msk.bf16.vlgmr.msra.gmra.mrb[116].mxu0 %vm357_vm1, %v2689_v12 }
0x1e3a   : > { %4748 = vmatpush3.bf16.msra.mxu0 %v5739_v42  ;;  %4751 = vmatprep.mubr.msk.bf16.mxu0 %vm5131_vm0, %v5130_v0 }
0x1e3b   : > { %4749 = vmatprep.subr.bf16.mxu0 %v5130_v0 }
0x1e3e   : > { %4750 = vmatpush3.bf16.msra.mxu0 %v5743_v45 }
0x1e3f   : > { %4755 = vmatprep.subr.bf16.mxu0 %v5130_v0 }
0x1f0c   : > { %v2727_v27 = vpop.f32.mrb[116].mxu0 }
0x1f0d   : > { %v2733_v28 = vadd.f32 %v2727_v27, %v2688_v26  ;;  %v4745_v29 = vpop.f32.mrb[117].mxu0 }
0x1f0e   : > { %v2730_v30 = vpop.f32.mrb[118].mxu0  ;;  %v3064_v29 = vld [vmem:[#allocation3 + $0x70] sm:$0xff] }
0x1f0f   : > { %v2734_v31 = vmax.f32 %v2733_v28, 0.0  ;;  %v4746_v32 = vpop.f32.mrb[119].mxu0 }
0x1f11   : > { %v2736_v33 = vpack.c.bf16 %v2734_v31, %v2734_v31 }
0x1f13   : > { %4752 = vmatmul.mubr.msk.bf16.vlgmr.msra.gmra.mrb[120].mxu0 %vm357_vm1, %v2736_v33 }
0x1f14   : > { %4756 = vmatpush3.bf16.msra.mxu0 %v5739_v42  ;;  %4759 = vmatprep.mubr.msk.bf16.mxu0 %vm5131_vm0, %v5130_v0 }
0x1f15   : > { %4757 = vmatprep.subr.bf16.mxu0 %v5130_v0 }
0x1f18   : > { %4758 = vmatpush3.bf16.msra.mxu0 %v5743_v45 }
0x1f19   : > { %4763 = vmatprep.subr.bf16.mxu0 %v5130_v0 }
0x1fe6   : > { %v2774_v35 = vpop.f32.mrb[120].mxu0 }
0x1fe7   : > { %v2780_v36 = vadd.f32 %v2774_v35, %v2735_v34  ;;  %v4753_v37 = vpop.f32.mrb[121].mxu0 }
0x1fe8   : > { %v2777_v38 = vpop.f32.mrb[122].mxu0  ;;  %v3111_v37 = vld [vmem:[#allocation3 + $0x78] sm:$0xff] }
0x1fe9   : > { %v2781_v39 = vmax.f32 %v2780_v36, 0.0  ;;  %v4754_v40 = vpop.f32.mrb[123].mxu0 }
0x1feb   : > { %v2783_v41 = vpack.c.bf16 %v2781_v39, %v2781_v39 }
0x1fed   : > { %4760 = vmatmul.mubr.msk.bf16.vlgmr.msra.gmra.mrb[124].mxu0 %vm357_vm1, %v2783_v41 }
0x1fee   : > { %4764 = vmatpush3.bf16.msra.mxu0 %v5739_v42  ;;  %4767 = vmatprep.mubr.msk.bf16.mxu0 %vm5131_vm0, %v5130_v0 }
0x1fef   : > { %4765 = vmatprep.subr.bf16.mxu0 %v5130_v0 }
0x1ff2   : > { %4766 = vmatpush3.bf16.msra.mxu0 %v5743_v45 }
0x1ff3   : > { %4771 = vmatprep.subr.bf16.mxu0 %v5130_v0 }
0x20c0   : > { %v2821_v44 = vpop.f32.mrb[124].mxu0 }
0x20c1   : > { %v2827_v46 = vadd.f32 %v2821_v44, %v2782_v43  ;;  %v4761_v47 = vpop.f32.mrb[125].mxu0 }
0x20c2   : > { %v2824_v48 = vpop.f32.mrb[126].mxu0  ;;  %v3158_v47 = vld [vmem:[#allocation3 + $0x80] sm:$0xff] }
0x20c3   : > { %v2828_v49 = vmax.f32 %v2827_v46, 0.0  ;;  %v4762_v50 = vpop.f32.mrb[127].mxu0 }
0x20c5   : > { %v2830_v51 = vpack.c.bf16 %v2828_v49, %v2828_v49 }
0x20c7   : > { %4768 = vmatmul.mubr.msk.bf16.vlgmr.msra.gmra.mrb[128].mxu0 %vm357_vm1, %v2830_v51 }
0x20c8   : > { %4772 = vmatpush3.bf16.msra.mxu0 %v5739_v42  ;;  %4775 = vmatprep.mubr.msk.bf16.mxu0 %vm5131_vm0, %v5130_v0 }
0x20c9   : > { %4773 = vmatprep.subr.bf16.mxu0 %v5130_v0 }
0x20cc   : > { %4774 = vmatpush3.bf16.msra.mxu0 %v5743_v45 }
0x20cd   : > { %4779 = vmatprep.subr.bf16.mxu0 %v5130_v0 }
0x219a   : > { %v2868_v53 = vpop.f32.mrb[128].mxu0 }
0x219b   : > { %v2874_v54 = vadd.f32 %v2868_v53, %v2829_v52  ;;  %v4769_v55 = vpop.f32.mrb[129].mxu0 }
0x219c   : > { %v2871_v56 = vpop.f32.mrb[130].mxu0  ;;  %v3205_v55 = vld [vmem:[#allocation3 + $0x88] sm:$0xff] }
0x219d   : > { %v2875_v57 = vmax.f32 %v2874_v54, 0.0  ;;  %v4770_v61 = vpop.f32.mrb[131].mxu0 }
0x219f   : > { %v2877_v58 = vpack.c.bf16 %v2875_v57, %v2875_v57 }
0x21a1   : > { %4776 = vmatmul.mubr.msk.bf16.vlgmr.msra.gmra.mrb[132].mxu0 %vm357_vm1, %v2877_v58 }
0x21a2   : > { %4780 = vmatpush3.bf16.msra.mxu0 %v5739_v42  ;;  %4783 = vmatprep.mubr.msk.bf16.mxu0 %vm5131_vm0, %v5130_v0 }
0x21a3   : > { %4781 = vmatprep.subr.bf16.mxu0 %v5130_v0 }
0x21a6   : > { %4782 = vmatpush3.bf16.msra.mxu0 %v5743_v45 }
0x21a7   : > { %4787 = vmatprep.subr.bf16.mxu0 %v5130_v0 }
0x2274   : > { %v2915_v60 = vpop.f32.mrb[132].mxu0 }
0x2275   : > { %v2921_v62 = vadd.f32 %v2915_v60, %v2876_v59  ;;  %v4777_v63 = vpop.f32.mrb[133].mxu0 }
0x2276   : > { %v2918_v1 = vpop.f32.mrb[134].mxu0  ;;  %v3252_v63 = vld [vmem:[#allocation3 + $0x90] sm:$0xff] }
0x2277   : > { %v2922_v2 = vmax.f32 %v2921_v62, 0.0  ;;  %v4778_v3 = vpop.f32.mrb[135].mxu0 }
0x2279   : > { %v2924_v4 = vpack.c.bf16 %v2922_v2, %v2922_v2 }
0x227b   : > { %4784 = vmatmul.mubr.msk.bf16.vlgmr.msra.gmra.mrb[136].mxu0 %vm357_vm1, %v2924_v4 }
0x227c   : > { %4788 = vmatpush3.bf16.msra.mxu0 %v5739_v42  ;;  %4791 = vmatprep.mubr.msk.bf16.mxu0 %vm5131_vm0, %v5130_v0 }
0x227d   : > { %4789 = vmatprep.subr.bf16.mxu0 %v5130_v0 }
0x2280   : > { %4790 = vmatpush3.bf16.msra.mxu0 %v5743_v45 }
0x2281   : > { %4795 = vmatprep.subr.bf16.mxu0 %v5130_v0 }
0x234e   : > { %v2962_v7 = vpop.f32.mrb[136].mxu0 }
0x234f   : > { %v2968_v6 = vadd.f32 %v2962_v7, %v2923_v5  ;;  %v4785_v9 = vpop.f32.mrb[137].mxu0 }
0x2350   : > { %v2965_v10 = vpop.f32.mrb[138].mxu0  ;;  %v3299_v9 = vld [vmem:[#allocation3 + $0x98] sm:$0xff] }
0x2351   : > { %v2969_v11 = vmax.f32 %v2968_v6, 0.0  ;;  %v4786_v8 = vpop.f32.mrb[139].mxu0 }
0x2353   : > { %v2971_v13 = vpack.c.bf16 %v2969_v11, %v2969_v11 }
0x2355   : > { %4792 = vmatmul.mubr.msk.bf16.vlgmr.msra.gmra.mrb[140].mxu0 %vm357_vm1, %v2971_v13 }
0x2356   : > { %4796 = vmatpush3.bf16.msra.mxu0 %v5739_v42  ;;  %4799 = vmatprep.mubr.msk.bf16.mxu0 %vm5131_vm0, %v5130_v0 }
0x2357   : > { %4797 = vmatprep.subr.bf16.mxu0 %v5130_v0 }
0x235a   : > { %4798 = vmatpush3.bf16.msra.mxu0 %v5743_v45 }
0x235b   : > { %4803 = vmatprep.subr.bf16.mxu0 %v5130_v0 }
0x2428   : > { %v3009_v15 = vpop.f32.mrb[140].mxu0 }
0x2429   : > { %v3015_v16 = vadd.f32 %v3009_v15, %v2970_v14  ;;  %v4793_v17 = vpop.f32.mrb[141].mxu0 }
0x242a   : > { %v3012_v18 = vpop.f32.mrb[142].mxu0  ;;  %v3346_v17 = vld [vmem:[#allocation3 + $0xa0] sm:$0xff] }
0x242b   : > { %v3016_v19 = vmax.f32 %v3015_v16, 0.0  ;;  %v4794_v20 = vpop.f32.mrb[143].mxu0 }
0x242d   : > { %v3018_v21 = vpack.c.bf16 %v3016_v19, %v3016_v19 }
0x242f   : > { %4800 = vmatmul.mubr.msk.bf16.vlgmr.msra.gmra.mrb[144].mxu0 %vm357_vm1, %v3018_v21 }
0x2430   : > { %4804 = vmatpush3.bf16.msra.mxu0 %v5739_v42  ;;  %4807 = vmatprep.mubr.msk.bf16.mxu0 %vm5131_vm0, %v5130_v0 }
0x2431   : > { %4805 = vmatprep.subr.bf16.mxu0 %v5130_v0 }
0x2434   : > { %4806 = vmatpush3.bf16.msra.mxu0 %v5743_v45 }
0x2435   : > { %4819 = vmatprep.subr.bf16.mxu0 %v5130_v0 }
0x2502   : > { %v3056_v23 = vpop.f32.mrb[144].mxu0 }
0x2503   : > { %v3062_v24 = vadd.f32 %v3056_v23, %v3017_v22  ;;  %v4801_v25 = vpop.f32.mrb[145].mxu0 }
0x2504   : > { %v3059_v12 = vpop.f32.mrb[146].mxu0  ;;  %v3393_v25 = vld [vmem:[#allocation3 + $0xa8] sm:$0xff] }
0x2505   : > { %v3063_v26 = vmax.f32 %v3062_v24, 0.0  ;;  %v4802_v27 = vpop.f32.mrb[147].mxu0 }
0x2507   : > { %v3065_v28 = vpack.c.bf16 %v3063_v26, %v3063_v26 }
0x2509   : > { %4808 = vmatmul.mubr.msk.bf16.vlgmr.msra.gmra.mrb[148].mxu0 %vm357_vm1, %v3065_v28 }
0x250a   : > { %4820 = vmatpush3.bf16.msra.mxu0 %v5739_v42  ;;  %4823 = vmatprep.mubr.msk.bf16.mxu0 %vm5131_vm0, %v5130_v0 }
0x250b   : > { %4821 = vmatprep.subr.bf16.mxu0 %v5130_v0 }
0x250e   : > { %4822 = vmatpush3.bf16.msra.mxu0 %v5743_v45 }
0x250f   : > { %4835 = vmatprep.subr.bf16.mxu0 %v5130_v0 }
0x25dc   : > { %v3103_v30 = vpop.f32.mrb[148].mxu0 }
0x25dd   : > { %v3109_v31 = vadd.f32 %v3103_v30, %v3064_v29  ;;  %v4809_v32 = vpop.f32.mrb[149].mxu0 }
0x25de   : > { %v3106_v33 = vpop.f32.mrb[150].mxu0  ;;  %v3440_v32 = vld [vmem:[#allocation3 + $0xb0] sm:$0xff] }
0x25df   : > { %v3110_v34 = vmax.f32 %v3109_v31, 0.0  ;;  %v4810_v35 = vpop.f32.mrb[151].mxu0 }
0x25e1   : > { %v3112_v36 = vpack.c.bf16 %v3110_v34, %v3110_v34 }
0x25e3   : > { %4816 = vmatmul.mubr.msk.bf16.vlgmr.msra.gmra.mrb[148].mxu1 %vm357_vm1, %v3112_v36 }
0x25e4   : > { %4828 = vmatpush3.bf16.msra.mxu1 %v5739_v42  ;;  %4831 = vmatprep.mubr.msk.bf16.mxu1 %vm5131_vm0, %v5130_v0 }
0x25e5   : > { %4829 = vmatprep.subr.bf16.mxu1 %v5130_v0 }
0x25e8   : > { %4830 = vmatpush3.bf16.msra.mxu1 %v5743_v45 }
0x25e9   : > { %4843 = vmatprep.subr.bf16.mxu1 %v5130_v0 }
0x26b6   : > { %v3150_v38 = vpop.f32.mrb[148].mxu1 }
0x26b7   : > { %v3156_v39 = vadd.f32 %v3150_v38, %v3111_v37  ;;  %v4817_v40 = vpop.f32.mrb[149].mxu1 }
0x26b8   : > { %v3153_v41 = vpop.f32.mrb[150].mxu1  ;;  %v3487_v40 = vld [vmem:[#allocation3 + $0xb8] sm:$0xff] }
0x26b9   : > { %v3157_v43 = vmax.f32 %v3156_v39, 0.0  ;;  %v4818_v44 = vpop.f32.mrb[151].mxu1 }
0x26bb   : > { %v3159_v46 = vpack.c.bf16 %v3157_v43, %v3157_v43 }
0x26bd   : > { %4824 = vmatmul.mubr.msk.bf16.vlgmr.msra.gmra.mrb[152].mxu0 %vm357_vm1, %v3159_v46 }
0x26be   : > { %4836 = vmatpush3.bf16.msra.mxu0 %v5739_v42  ;;  %4839 = vmatprep.mubr.msk.bf16.mxu0 %vm5131_vm0, %v5130_v0 }
0x26bf   : > { %4837 = vmatprep.subr.bf16.mxu0 %v5130_v0 }
0x26c2   : > { %4838 = vmatpush3.bf16.msra.mxu0 %v5743_v45 }
0x26c3   : > { %4851 = vmatprep.subr.bf16.mxu0 %v5130_v0 }
0x2790   : > { %v3197_v48 = vpop.f32.mrb[152].mxu0 }
0x2791   : > { %v3203_v49 = vadd.f32 %v3197_v48, %v3158_v47  ;;  %v4825_v50 = vpop.f32.mrb[153].mxu0 }
0x2792   : > { %v3200_v51 = vpop.f32.mrb[154].mxu0  ;;  %v3534_v50 = vld [vmem:[#allocation3 + $0xc0] sm:$0xff] }
0x2793   : > { %v3204_v52 = vmax.f32 %v3203_v49, 0.0  ;;  %v4826_v53 = vpop.f32.mrb[155].mxu0 }
0x2795   : > { %v3206_v54 = vpack.c.bf16 %v3204_v52, %v3204_v52 }
0x2797   : > { %4832 = vmatmul.mubr.msk.bf16.vlgmr.msra.gmra.mrb[152].mxu1 %vm357_vm1, %v3206_v54 }
0x2798   : > { %4844 = vmatpush3.bf16.msra.mxu1 %v5739_v42  ;;  %4847 = vmatprep.mubr.msk.bf16.mxu1 %vm5131_vm0, %v5130_v0 }
0x2799   : > { %4845 = vmatprep.subr.bf16.mxu1 %v5130_v0 }
0x279c   : > { %4846 = vmatpush3.bf16.msra.mxu1 %v5743_v45 }
0x279d   : > { %4859 = vmatprep.subr.bf16.mxu1 %v5130_v0 }
0x286a   : > { %v3244_v56 = vpop.f32.mrb[152].mxu1 }
0x286b   : > { %v3250_v57 = vadd.f32 %v3244_v56, %v3205_v55  ;;  %v4833_v61 = vpop.f32.mrb[153].mxu1 }
0x286c   : > { %v3247_v58 = vpop.f32.mrb[154].mxu1  ;;  %v3581_v61 = vld [vmem:[#allocation3 + $0xc8] sm:$0xff] }
0x286d   : > { %v3251_v59 = vmax.f32 %v3250_v57, 0.0  ;;  %v4834_v60 = vpop.f32.mrb[155].mxu1 }
0x286f   : > { %v3253_v62 = vpack.c.bf16 %v3251_v59, %v3251_v59 }
0x2871   : > { %4840 = vmatmul.mubr.msk.bf16.vlgmr.msra.gmra.mrb[156].mxu0 %vm357_vm1, %v3253_v62 }
0x2872   : > { %4852 = vmatpush3.bf16.msra.mxu0 %v5739_v42  ;;  %4855 = vmatprep.mubr.msk.bf16.mxu0 %vm5131_vm0, %v5130_v0 }
0x2873   : > { %4853 = vmatprep.subr.bf16.mxu0 %v5130_v0 }
0x2876   : > { %4854 = vmatpush3.bf16.msra.mxu0 %v5743_v45 }
0x2877   : > { %4867 = vmatprep.subr.bf16.mxu0 %v5130_v0 }
0x2944   : > { %v3291_v1 = vpop.f32.mrb[156].mxu0 }
0x2945   : > { %v3297_v2 = vadd.f32 %v3291_v1, %v3252_v63  ;;  %v4841_v3 = vpop.f32.mrb[157].mxu0 }
0x2946   : > { %v3294_v4 = vpop.f32.mrb[158].mxu0  ;;  %v3628_v3 = vld [vmem:[#allocation3 + $0xd0] sm:$0xff] }
0x2947   : > { %v3298_v5 = vmax.f32 %v3297_v2, 0.0  ;;  %v4842_v7 = vpop.f32.mrb[159].mxu0 }
0x2949   : > { %v3300_v6 = vpack.c.bf16 %v3298_v5, %v3298_v5 }
0x294b   : > { %4848 = vmatmul.mubr.msk.bf16.vlgmr.msra.gmra.mrb[156].mxu1 %vm357_vm1, %v3300_v6 }
0x294c   : > { %4860 = vmatpush3.bf16.msra.mxu1 %v5739_v42  ;;  %4863 = vmatprep.mubr.msk.bf16.mxu1 %vm5131_vm0, %v5130_v0 }
0x294d   : > { %4861 = vmatprep.subr.bf16.mxu1 %v5130_v0 }
0x2950   : > { %4862 = vmatpush3.bf16.msra.mxu1 %v5743_v45 }
0x2951   : > { %4875 = vmatprep.subr.bf16.mxu1 %v5130_v0 }
0x2a1e   : > { %v3338_v10 = vpop.f32.mrb[156].mxu1 }
0x2a1f   : > { %v3344_v11 = vadd.f32 %v3338_v10, %v3299_v9  ;;  %v4849_v8 = vpop.f32.mrb[157].mxu1 }
0x2a20   : > { %v3341_v13 = vpop.f32.mrb[158].mxu1  ;;  %v3675_v8 = vld [vmem:[#allocation3 + $0xd8] sm:$0xff] }
0x2a21   : > { %v3345_v14 = vmax.f32 %v3344_v11, 0.0  ;;  %v4850_v15 = vpop.f32.mrb[159].mxu1 }
0x2a23   : > { %v3347_v16 = vpack.c.bf16 %v3345_v14, %v3345_v14 }
0x2a25   : > { %4856 = vmatmul.mubr.msk.bf16.vlgmr.msra.gmra.mrb[160].mxu0 %vm357_vm1, %v3347_v16 }
0x2a26   : > { %4868 = vmatpush3.bf16.msra.mxu0 %v5739_v42  ;;  %4871 = vmatprep.mubr.msk.bf16.mxu0 %vm5131_vm0, %v5130_v0 }
0x2a27   : > { %4869 = vmatprep.subr.bf16.mxu0 %v5130_v0 }
0x2a2a   : > { %4870 = vmatpush3.bf16.msra.mxu0 %v5743_v45 }
0x2a2b   : > { %4883 = vmatprep.subr.bf16.mxu0 %v5130_v0 }
0x2af8   : > { %v3385_v18 = vpop.f32.mrb[160].mxu0 }
0x2af9   : > { %v3391_v19 = vadd.f32 %v3385_v18, %v3346_v17  ;;  %v4857_v20 = vpop.f32.mrb[161].mxu0 }
0x2afa   : > { %v3388_v21 = vpop.f32.mrb[162].mxu0  ;;  %v3816_v20 = vld [vmem:[%s6066_s4] sm:$0xff] }
0x2afb   : > { %v3392_v22 = vmax.f32 %v3391_v19, 0.0  ;;  %v4858_v23 = vpop.f32.mrb[163].mxu0  ;;  %v3817_v21 = vld [vmem:[%s6066_s4 + $0x8] sm:$0xff] }
0x2afc   : > { %v4943_v23 = vpack.c.bf16 %v3817_v21, %v3816_v20 }
0x2afd   : > { %v3394_v24 = vpack.c.bf16 %v3392_v22, %v3392_v22  ;;  %v5133_v22 = vmov 0.0|0.0  }
0x2aff   : > { %4864 = vmatmul.mubr.msk.bf16.vlgmr.msra.gmra.mrb[160].mxu1 %vm357_vm1, %v3394_v24  ;;  %v3722_v24 = vld [vmem:[#allocation3 + $0xe0] sm:$0xff] }
0x2b00   : > { %4876 = vmatpush3.bf16.msra.mxu1 %v5739_v42  ;;  %4879 = vmatprep.mubr.msk.bf16.mxu1 %vm5131_vm0, %v5130_v0 }
0x2b01   : > { %4877 = vmatprep.subr.bf16.mxu1 %v5130_v0 }
0x2b04   : > { %4878 = vmatpush3.bf16.msra.mxu1 %v5743_v45 }
0x2b05   : > { %4891 = vmatprep.subr.bf16.mxu1 %v5130_v0 }
0x2bd2   : > { %v3432_v12 = vpop.f32.mrb[160].mxu1 }
0x2bd3   : > { %v3438_v26 = vadd.f32 %v3432_v12, %v3393_v25  ;;  %v4865_v27 = vpop.f32.mrb[161].mxu1 }
0x2bd4   : > { %v3435_v28 = vpop.f32.mrb[162].mxu1 }
0x2bd5   : > { %v3439_v29 = vmax.f32 %v3438_v26, 0.0  ;;  %v4866_v30 = vpop.f32.mrb[163].mxu1 }
0x2bd6   : > { %v3818_v30 = vld [vmem:[%s6066_s4 + $0x10] sm:$0xff] }
0x2bd7   : > { %v3441_v31 = vpack.c.bf16 %v3439_v29, %v3439_v29 }
0x2bd9   : > { %4872 = vmatmul.mubr.msk.bf16.vlgmr.msra.gmra.mrb[164].mxu0 %vm357_vm1, %v3441_v31  ;;  %v3819_v31 = vld [vmem:[%s6066_s4 + $0x18] sm:$0xff] }
0x2bda   : > { %4884 = vmatpush3.bf16.msra.mxu0 %v5739_v42  ;;  %4887 = vmatprep.mubr.msk.bf16.mxu0 %vm5131_vm0, %v5130_v0 }
0x2bdb   : > { %4885 = vmatprep.subr.bf16.mxu0 %v5130_v0 }
0x2bde   : > { %4886 = vmatpush3.bf16.msra.mxu0 %v5743_v45 }
0x2bdf   : > { %4899 = vmatprep.subr.bf16.mxu0 %v5130_v0 }
0x2cac   : > { %v3479_v33 = vpop.f32.mrb[164].mxu0 }
0x2cad   : > { %v3485_v34 = vadd.f32 %v3479_v33, %v3440_v32  ;;  %v4873_v35 = vpop.f32.mrb[165].mxu0  ;;  %v4946_v32 = vpack.c.bf16 %v3819_v31, %v3818_v30  ;;  %v3769_v33 = vld [vmem:[#allocation3 + $0xe8] sm:$0xff] }
0x2cae   : > { %v3482_v36 = vpop.f32.mrb[166].mxu0 }
0x2caf   : > { %v3486_v37 = vmax.f32 %v3485_v34, 0.0  ;;  %v4874_v38 = vpop.f32.mrb[167].mxu0 }
0x2cb1   : > { %v3488_v39 = vpack.c.bf16 %v3486_v37, %v3486_v37 }
0x2cb3   : > { %4880 = vmatmul.mubr.msk.bf16.vlgmr.msra.gmra.mrb[164].mxu1 %vm357_vm1, %v3488_v39 }
0x2cb4   : > { %4892 = vmatpush3.bf16.msra.mxu1 %v5739_v42  ;;  %4895 = vmatprep.mubr.msk.bf16.mxu1 %vm5131_vm0, %v5130_v0 }
0x2cb5   : > { %4893 = vmatprep.subr.bf16.mxu1 %v5130_v0 }
0x2cb8   : > { %4894 = vmatpush3.bf16.msra.mxu1 %v5743_v45 }
0x2cb9   : > { %4907 = vmatprep.subr.bf16.mxu1 %v5130_v0 }
0x2d86   : > { %v3526_v41 = vpop.f32.mrb[164].mxu1 }
0x2d87   : > { %v3532_v43 = vadd.f32 %v3526_v41, %v3487_v40  ;;  %v4881_v44 = vpop.f32.mrb[165].mxu1  ;;  %v4100_v40 = vld [vmem:[%s6067_s5] ss:$0 sm:$0xff] }
0x2d88   : > { %v3529_v46 = vpop.f32.mrb[166].mxu1 }
0x2d89   : > { %v3533_v47 = vmax.f32 %v3532_v43, 0.0  ;;  %v4882_v48 = vpop.f32.mrb[167].mxu1 }
0x2d8b   : > { %v3535_v49 = vpack.c.bf16 %v3533_v47, %v3533_v47 }
0x2d8d   : > { %4888 = vmatmul.mubr.msk.bf16.vlgmr.msra.gmra.mrb[168].mxu0 %vm357_vm1, %v3535_v49 }
0x2d8e   : > { %4900 = vmatpush3.bf16.msra.mxu0 %v5739_v42  ;;  %4903 = vmatprep.mubr.msk.bf16.mxu0 %vm5131_vm0, %v5130_v0  ;;  %v5023_v42 = vld [vmem:[#allocation6 + $0x10] sm:$0xff]  }
0x2d8f   : > { %4901 = vmatprep.subr.bf16.mxu0 %v5130_v0 }
0x2d92   : > { %4902 = vmatpush3.bf16.msra.mxu0 %v5743_v45  ;;  %v5024_v45 = vld [vmem:[#allocation6 + $0x18] sm:$0xff]  }
0x2d93   : > { %4915 = vmatprep.subr.bf16.mxu0 %v5130_v0 }
0x2e60   : > { %v3573_v51 = vpop.f32.mrb[168].mxu0 }
0x2e61   : > { %v3579_v52 = vadd.f32 %v3573_v51, %v3534_v50  ;;  %v4889_v53 = vpop.f32.mrb[169].mxu0 }
0x2e62   : > { %v3576_v54 = vpop.f32.mrb[170].mxu0 }
0x2e63   : > { %v3580_v55 = vmax.f32 %v3579_v52, 0.0  ;;  %v4890_v56 = vpop.f32.mrb[171].mxu0 }
0x2e65   : > { %v3582_v57 = vpack.c.bf16 %v3580_v55, %v3580_v55 }
0x2e67   : > { %4896 = vmatmul.mubr.msk.bf16.vlgmr.msra.gmra.mrb[168].mxu1 %vm357_vm1, %v3582_v57 }
0x2e68   : > { %4908 = vmatpush3.bf16.msra.mxu1 %v5023_v42  ;;  %4911 = vmatprep.mubr.msk.bf16.mxu1 %vm5131_vm0, %v5130_v0 }
0x2e69   : > { %4909 = vmatprep.subr.bf16.mxu1 %v5130_v0 }
0x2e6c   : > { %4910 = vmatpush3.bf16.msra.mxu1 %v5024_v45 }
0x2e6d   : > { %4923 = vmatprep.subr.bf16.mxu1 %v5130_v0 }
0x2f3a   : > { %v3620_v58 = vpop.f32.mrb[168].mxu1 }
0x2f3b   : > { %v3626_v59 = vadd.f32 %v3620_v58, %v3581_v61  ;;  %v4897_v60 = vpop.f32.mrb[169].mxu1 }
0x2f3c   : > { %v3623_v62 = vpop.f32.mrb[170].mxu1 }
0x2f3d   : > { %v3627_v63 = vmax.f32 %v3626_v59, 0.0  ;;  %v4898_v1 = vpop.f32.mrb[171].mxu1 }
0x2f3f   : > { %v3629_v2 = vpack.c.bf16 %v3627_v63, %v3627_v63 }
0x2f41   : > { %4904 = vmatmul.mubr.msk.bf16.vlgmr.msra.gmra.mrb[172].mxu0 %vm357_vm1, %v3629_v2 }
0x2f42   : > { %4916 = vmatpush3.bf16.msra.mxu0 %v5023_v42  ;;  %4919 = vmatprep.mubr.msk.bf16.mxu0 %vm5131_vm0, %v5130_v0 }
0x2f43   : > { %4917 = vmatprep.subr.bf16.mxu0 %v5130_v0 }
0x2f46   : > { %4918 = vmatpush3.bf16.msra.mxu0 %v5024_v45 }
0x2f47   : > { %4942 = vmatprep.subr.bf16.mxu0 %v5133_v22 }
0x3014   : > { %v3667_v4 = vpop.f32.mrb[172].mxu0 }
0x3015   : > { %v3673_v5 = vadd.f32 %v3667_v4, %v3628_v3  ;;  %v4905_v7 = vpop.f32.mrb[173].mxu0 }
0x3016   : > { %v3670_v6 = vpop.f32.mrb[174].mxu0 }
0x3017   : > { %v3674_v9 = vmax.f32 %v3673_v5, 0.0  ;;  %v4906_v10 = vpop.f32.mrb[175].mxu0 }
0x3019   : > { %v3676_v11 = vpack.c.bf16 %v3674_v9, %v3674_v9 }
0x301b   : > { %4912 = vmatmul.mubr.msk.bf16.vlgmr.msra.gmra.mrb[172].mxu1 %vm357_vm1, %v3676_v11 }
0x301c   : > { %4924 = vmatpush3.bf16.msra.mxu1 %v5023_v42  ;;  %4927 = vmatprep.mubr.msk.bf16.mxu1 %vm5131_vm0, %v5130_v0 }
0x301d   : > { %4925 = vmatprep.subr.bf16.mxu1 %v5130_v0 }
0x3020   : > { %4926 = vmatpush3.bf16.msra.mxu1 %v5024_v45 }
0x30ee   : > { %v3714_v13 = vpop.f32.mrb[172].mxu1 }
0x30ef   : > { %v3720_v14 = vadd.f32 %v3714_v13, %v3675_v8  ;;  %v4913_v15 = vpop.f32.mrb[173].mxu1 }
0x30f0   : > { %v3717_v16 = vpop.f32.mrb[174].mxu1 }
0x30f1   : > { %v3721_v17 = vmax.f32 %v3720_v14, 0.0  ;;  %v4914_v18 = vpop.f32.mrb[175].mxu1 }
0x30f3   : > { %v3723_v19 = vpack.c.bf16 %v3721_v17, %v3721_v17 }
0x30f5   : > { %4920 = vmatmul.mubr.msk.bf16.vlgmr.msra.gmra.mrb[176].mxu0 %vm357_vm1, %v3723_v19 }
0x30f6   : > { %4939 = vmatprep.mubr.msk.f32.mxu0 %vm5131_vm0, %v5130_v0  ;;  %4944 = vmatpush3.bf16.msra.mxu0 %v4943_v23 }
0x30f7   : > { %4945 = vmatprep.subr.bf16.mxu0 %v5133_v22 }
0x30fa   : > { %4947 = vmatpush3.bf16.msra.mxu0 %v4946_v32 }
0x31c8   : > { %v3761_v25 = vpop.f32.mrb[176].mxu0 }
0x31c9   : > { %v3767_v12 = vadd.f32 %v3761_v25, %v3722_v24  ;;  %v4921_v26 = vpop.f32.mrb[177].mxu0 }
0x31ca   : > { %v3764_v27 = vpop.f32.mrb[178].mxu0 }
0x31cb   : > { %v3768_v28 = vmax.f32 %v3767_v12, 0.0  ;;  %v4922_v0 = vpop.f32.mrb[179].mxu0 }
0x31cd   : > { %v3770_v29 = vpack.c.bf16 %v3768_v28, %v3768_v28 }
0x31cf   : > { %4928 = vmatmul.mubr.msk.bf16.vlgmr.msra.gmra.mrb[176].mxu1 %vm357_vm1, %v3770_v29 }
0x32a2   : > { %v3808_v34 = vpop.f32.mrb[176].mxu1 }
0x32a3   : > { %v3814_v35 = vadd.f32 %v3808_v34, %v3769_v33  ;;  %v4929_v36 = vpop.f32.mrb[177].mxu1 }
0x32a4   : > { %v3811_v37 = vpop.f32.mrb[178].mxu1 }
0x32a5   : > { %v3815_v38 = vmax.f32 %v3814_v35, 0.0  ;;  %v4930_v39 = vpop.f32.mrb[179].mxu1 }
0x32a7   : > { %4940 = vmatmul.mubr.msk.f32.vlgmr.msra.gmra.mrb[180].mxu0 %vm357_vm1, %v3815_v38 }
0x337a   : > { %v3896_v41 = vpop.f32.mrb[180].mxu0 }
0x337b   : > { %v3897_v43 = vadd.f32 %v4100_v40, %v3896_v41  ;;  %v4941_v44 = vpop.f32.mrb[181].mxu0 }
0x337d   : > { %v3901_v46 = vsel %vm3900_vm2, %v3897_v43, -inf }
0x337e   : > { %3902 = vmax.xlane.f32.xlu0 %v3901_v46 }
0x340b   : > { %v3903_v47 = vpop.xlane.xlu0 %3902 }
0x340c   : > { %v3904_v48 = vsub.f32 %v3897_v43, %v3903_v47 }
0x340e   : > { %v3905_v49 = vmul.f32 1.442695, %v3904_v48 }
0x3410   : > { %5017 = vpow2.f32 %v3905_v49 }
0x341a   : > { %v5018_v50 = vpop.eup %5017 }
0x341b   : > { %v3907_v51 = vsel %vm3900_vm2, %v5018_v50, 0.0 }
0x341c   : > { %3908 = vadd.xlane.f32.xlu0 %v3907_v51 }
0x34a9   : > { %v3909_v52 = vpop.xlane.xlu0 %3908 }
0x34aa   : > { %5019 = vlog2.f32 %v3909_v52 }
0x34b4   : > { %v5020_v53 = vpop.eup %5019 }
0x34b5   : > { %v3911_v54 = vmul.f32 0.6931472, %v5020_v53 }
0x34b7   : > { %v3912_v55 = vsub.f32 %v3904_v48, %v3911_v54 }
0x34b9   : > { %3913 = vst.msk [vmem:[%s283_s27] sm:$0xff] %vm3900_vm2, %v3912_v55 }
0x34ba PF: > { %p17_p6 = scmp.ge.s32.totalorder %s5191_s26, 4   ;;  %s6083_s21 = smov %s5113_s22 }
0x34bb   : > { %s6084_s22 = smov %s5117_s23  ;;  %s6085_s23 = smov %s5201_s29 }
0x34bc   : > { %s6086_s24 = smov %s5191_s26  ;;  %19 = sbr.rel (!%p17_p6) target bundleno = 4 (0x4), region = 149 }
0x34c3   :  { %3933 = vsyncpa [#allocation5], 1 }
0x34c4   :  { %3935 = vsyncpa [#allocation5 + $0x1], 1 }
0x34c5   :  { %3936 = vsyncpa [#allocation7], 1 }

</bundles_post_ra>
